<compile_context>
chip_gen: v5e
topology: v5e:2x2
jax: 0.10.0
libtpu: 0.0.40
codegen_flags: <defaults>
</compile_context>

<pallas_src>
import jax
import jax.numpy as jnp
from jax.experimental import pallas as pl
from jax.experimental.pallas import tpu as pltpu

LANE = 128


def _round_up(x, m):
    return (x + m - 1) // m * m


# -----------------------------------------------------------------------------
# Kernel 1: fused  [BN1+conv1+SiLU] -> [BN2+conv2+SiLU] -> MaxPool2d(2)
# -----------------------------------------------------------------------------
def _make_conv_pool_kernel(ww, r1, l2, r2, hp, wq, b_tile):
    """Per-grid-step kernel over B_TILE images.

    Activations are kept flat with row index p = h*ww + w (stride ww), so a
    3x3 tap (ky, kx) is a row shift of ky*ww + kx; garbage rows/columns from
    the flat wrap-around are computed but masked out by the zeroed FC-weight
    rows downstream (unchanged, verified layout).
    """
    n_rh = hp * ww      # rows of the row-maxed pooling buffer
    n_pool = hp * wq    # pooled cells per image (flat)

    def _silu(a):
        return a * pl.reciprocal(1.0 + jnp.exp(-a), approx=False)

    def kernel(x_ref, w1_ref, b1_ref, w2_ref, b2_ref, pooled_ref, y1b_ref, rh_ref):
        w1 = w1_ref[...]          # (K1P, CP) bf16, K1P = 9*C0 padded to 128
        b1 = b1_ref[...]          # (1, CP) f32
        b2 = b2_ref[...]          # (1, CP) f32
        cp = pooled_ref.shape[-1]

        for i in range(b_tile):
            # ---- block 1: conv1 (BN1 folded) as ONE bf16 matmul, SSA value.
            a1 = jnp.dot(x_ref[i], w1, preferred_element_type=jnp.float32) + b1
            y1 = _silu(a1)                                    # (r1, cp) f32

            # Cast y1 to bf16 once; store three column-shifted copies so every
            # conv2 tap load below starts at a multiple of 16 rows (aligned
            # packed-bf16 loads, no per-tap casts).
            for s in range(3):
                y1b_ref[i * 3 + s] = y1[s:s + l2, :].astype(jnp.bfloat16)

            # ---- block 2: conv2 (BN2 folded), 9 bf16 matmuls accumulated in
            # registers (no read-modify-write into VMEM scratch).
            acc = None
            for t in range(9):
                ky, kx = divmod(t, 3)
                lhs = y1b_ref[i * 3 + kx, ky * ww:ky * ww + r2, :]   # (r2, cp) bf16
                term = jnp.dot(lhs, w2_ref[t], preferred_element_type=jnp.float32)
                acc = term if acc is None else acc + term
            y2 = _silu(acc + b2)                              # (r2, cp) f32

            # ---- MaxPool2d(2), vectorized.  y2 rows are p = h*ww + w.
            y2r = y2.reshape(hp, 2 * ww, cp)                  # (HP, 2W, CP)
            rh = jnp.maximum(y2r[:, :ww, :], y2r[:, ww:, :])  # row (h) max
            rh_ref[...] = rh.reshape(n_rh, cp)                # (HP*W, CP)
            even = rh_ref[pl.ds(0, n_pool, stride=2), :]      # w even columns
            odd = rh_ref[pl.ds(1, n_pool, stride=2), :]       # w odd columns
            pooled = jnp.maximum(even, odd)                   # (HP*WQ, CP)
            pooled_ref[i] = pooled.reshape(hp, wq, cp)        # one dense store

    return kernel


def _pick_batch_tile(n, r1, l2, hp, wq, ww, cp, k1p,
                     budget_bytes=16 * 1024 * 1024, max_tile=8):
    """Largest divisor of n that (a) keeps >= 2 grid steps when n >= 2 (so a
    2-TensorCore chip gets work on both cores), (b) fits a conservative
    per-step VMEM budget, (c) keeps the unrolled kernel body small."""
    fixed = (k1p * cp * 2) * 2 + (9 * cp * cp * 2) * 2 + 4 * cp * 4 + hp * ww * cp * 4
    per_img = (r1 * k1p * 2) * 2 + (hp * wq * cp * 4) * 2 + 3 * l2 * cp * 2
    best = 1
    for bt in range(1, min(n, max_tile) + 1):
        if n % bt:
            continue
        if n >= 2 and n // bt < 2:
            continue
        if fixed + bt * per_img > budget_bytes:
            continue
        best = bt
    return best


def _conv_pool_forward(x_lhs, w1, b1, w2, b2, *, r1, l2, r2, ww, hp, wq, cp, b_tile):
    n, _, k1p = x_lhs.shape
    assert n % b_tile == 0
    kernel = _make_conv_pool_kernel(ww, r1, l2, r2, hp, wq, b_tile)
    return pl.pallas_call(
        kernel,
        out_shape=jax.ShapeDtypeStruct((n, hp, wq, cp), jnp.float32),
        grid_spec=pltpu.PrefetchScalarGridSpec(
            num_scalar_prefetch=0,
            grid=(n // b_tile,),                              # B_TILE images / step
            in_specs=[
                pl.BlockSpec((b_tile, r1, k1p), lambda b: (b, 0, 0)),
                pl.BlockSpec((k1p, cp), lambda b: (0, 0)),
                pl.BlockSpec((1, cp), lambda b: (0, 0)),
                pl.BlockSpec((9, cp, cp), lambda b: (0, 0, 0)),
                pl.BlockSpec((1, cp), lambda b: (0, 0)),
            ],
            out_specs=pl.BlockSpec((b_tile, hp, wq, cp), lambda b: (b, 0, 0, 0)),
            scratch_shapes=[
                pltpu.VMEM((b_tile * 3, l2, cp), jnp.bfloat16),  # shifted y1 copies
                pltpu.VMEM((hp * ww, cp), jnp.float32),          # row-maxed pool buf
            ],
        ),
        compiler_params=pltpu.CompilerParams(
            dimension_semantics=("parallel",),                # batch -> both TCs
            vmem_limit_bytes=32 * 1024 * 1024,
        ),
    )(x_lhs, w1, b1, w2, b2)


# -----------------------------------------------------------------------------
# Kernel 2: Flatten -> Dropout(eval) -> Linear   (bf16 weight, f32 accumulate)
# -----------------------------------------------------------------------------
# TODO(synk): fusing the classifier matmul into kernel 1 would need a
# sublane->lane flatten of the pooled tile in-kernel; kept as a second tiny
# lane-dense pallas_call instead.
def _fc_kernel(x_ref, w_ref, b_ref, o_ref):
    # TODO(synk): train-mode Dropout(0.2) would need pltpu.prng_*; eval = identity.
    acc = jnp.dot(x_ref[...], w_ref[...], preferred_element_type=jnp.float32)
    o_ref[...] = acc + b_ref[...]


def _fc_forward(x, w, b):
    n, dp = x.shape[0], w.shape[1]
    vmem = pl.BlockSpec(memory_space=pltpu.MemorySpace.VMEM)
    # Whole problem (<2 MiB) fits comfortably in VMEM -> single un-gridded step.
    return pl.pallas_call(
        _fc_kernel,
        out_shape=jax.ShapeDtypeStruct((n, dp), jnp.float32),
        in_specs=[vmem, vmem, vmem],
        out_specs=vmem,
    )(x, w, b)


# -----------------------------------------------------------------------------
# Trace-time parameter plumbing (plain JAX)
# -----------------------------------------------------------------------------
def _fold_bn_into_conv(w, b, gamma, beta, mean, var, eps=1e-5):
    """conv(BN(x)) == conv'(x) with W' = W*scale_in, b' = b + sum(W*shift_in)."""
    scale = gamma / jnp.sqrt(var + eps)
    shift = beta - mean * scale
    w_f = w * scale[None, :, None, None]
    b_f = b + jnp.einsum("oikl,i->o", w, shift)
    return w_f, b_f


def _conv1_weight_matrix(w_oihw, k_pad, cout_pad):
    """(Cout, Cin, 3, 3) -> (k_pad, cout_pad) bf16, row index t*Cin + ci."""
    cout, cin = w_oihw.shape[0], w_oihw.shape[1]
    taps = jnp.transpose(w_oihw, (2, 3, 1, 0)).reshape(9 * cin, cout)
    out = jnp.zeros((k_pad, cout_pad), jnp.float32)
    return out.at[:9 * cin, :cout].set(taps).astype(jnp.bfloat16)


def _conv_taps(w_oihw, cin_pad, cout_pad):
    """(Cout, Cin, 3, 3) -> (9, cin_pad, cout_pad) bf16, tap index t = ky*3+kx."""
    cout, cin = w_oihw.shape[0], w_oihw.shape[1]
    taps = jnp.transpose(w_oihw, (2, 3, 1, 0)).reshape(9, cin, cout)
    out = jnp.zeros((9, cin_pad, cout_pad), jnp.float32)
    return out.at[:, :cin, :cout].set(taps).astype(jnp.bfloat16)


def _pad_bias(b, cp):
    return jnp.zeros((1, cp), jnp.float32).at[0, :b.shape[0]].set(b)


@jax.jit
def conv_classifier_forward(x_nchw, params):
    n, c0, hh, ww = x_nchw.shape
    ch = params["conv1_w"].shape[0]
    nclass = params["fc_w"].shape[0]
    cp = _round_up(ch, LANE)                   # padded hidden channels
    dp = _round_up(nclass, LANE)               # padded class count
    k1p = _round_up(9 * c0, LANE)              # padded conv1 im2col K

    h2 = hh - 4                                # spatial after two VALID 3x3 convs
    assert hh > 4 and ww > 4 and ww % 2 == 0 and h2 % 2 == 0
    hp, wq, wp = h2 // 2, ww // 2, (ww - 4) // 2
    maxoff = 2 * ww + 2                        # largest 3x3 tap row shift
    r2 = h2 * ww                               # conv2 rows computed (flat, stride ww)
    l2 = _round_up(2 * ww + r2, 16)            # rows per shifted bf16 y1 copy
    r1 = _round_up(l2 + 2, 16)                 # conv1 rows computed
    rx = r1 + maxoff                           # zero-padded flat input rows
    offs = tuple(ky * ww + kx for ky in range(3) for kx in range(3))

    # NCHW -> NHWC -> flat (N, H*W, C) rows (stride ww), zero-padded, then the
    # 3x3 im2col along K (tap-major, channel-minor), K zero-padded to 128, bf16.
    x_flat = jnp.transpose(x_nchw, (0, 2, 3, 1)).astype(jnp.float32).reshape(n, hh * ww, c0)
    x_flat = jnp.pad(x_flat, ((0, 0), (0, rx - hh * ww), (0, 0)))
    x_lhs = jnp.concatenate([x_flat[:, o:o + r1, :] for o in offs], axis=-1)
    x_lhs = jnp.pad(x_lhs, ((0, 0), (0, 0), (0, k1p - 9 * c0))).astype(jnp.bfloat16)

    # Fold eval-mode BatchNorm into the conv weights/bias (exact), pad channels.
    w1f, b1f = _fold_bn_into_conv(params["conv1_w"], params["conv1_b"],
                                  params["bn1_gamma"], params["bn1_beta"],
                                  params["bn1_mean"], params["bn1_var"])
    w2f, b2f = _fold_bn_into_conv(params["conv2_w"], params["conv2_b"],
                                  params["bn2_gamma"], params["bn2_beta"],
                                  params["bn2_mean"], params["bn2_var"])
    w1m = _conv1_weight_matrix(w1f, k1p, cp)    # (K1P, CP) bf16
    w2t = _conv_taps(w2f, cp, cp)               # (9, CP, CP) bf16
    b1p = _pad_bias(b1f, cp)
    b2p = _pad_bias(b2f, cp)

    b_tile = _pick_batch_tile(n, r1, l2, hp, wq, ww, cp, k1p)

    pooled = _conv_pool_forward(x_lhs, w1m, b1p, w2t, b2p,
                                r1=r1, l2=l2, r2=r2, ww=ww,
                                hp=hp, wq=wq, cp=cp, b_tile=b_tile)
    pooled_flat = pooled.reshape(n, hp * wq * cp).astype(jnp.bfloat16)

    # Linear weight: PyTorch flatten order (c, hp, wp) -> our (hp, j, c) order.
    # Zero rows for the garbage pool columns (j >= wp) and padded channels.
    wfc = params["fc_w"].reshape(nclass, ch, hp, wp)          # (D, C, HP, WP)
    wfc = jnp.transpose(wfc, (2, 3, 1, 0))                    # (HP, WP, C, D)
    wfc_full = jnp.zeros((hp, wq, cp, dp), jnp.float32).at[:, :wp, :ch, :nclass].set(wfc)
    wfc_mat = wfc_full.reshape(hp * wq * cp, dp).astype(jnp.bfloat16)
    bfc = _pad_bias(params["fc_b"], dp)

    logits_padded = _fc_forward(pooled_flat, wfc_mat, bfc)    # (N, DP) lane-dense
    return logits_padded[:, :nclass]


# -----------------------------------------------------------------------------
# Pure-JAX reference (mirrors the PyTorch module in eval mode, all f32)
# -----------------------------------------------------------------------------
@jax.jit
def _reference_forward(x_nchw, p, eps=1e-5):
    def bn(x, g, b, m, v):
        s = g / jnp.sqrt(v + eps)
        return (x - m[None, :, None, None]) * s[None, :, None, None] \
            + b[None, :, None, None]

    def conv(x, w, b):
        y = jax.lax.conv_general_dilated(
            x, w, window_strides=(1, 1), padding="VALID",
            dimension_numbers=("NCHW", "OIHW", "NCHW"))
        return y + b[None, :, None, None]

    def silu(x):
        return x * jax.nn.sigmoid(x)

    y = silu(conv(bn(x_nchw, p["bn1_gamma"], p["bn1_beta"],
                     p["bn1_mean"], p["bn1_var"]), p["conv1_w"], p["conv1_b"]))
    y = silu(conv(bn(y, p["bn2_gamma"], p["bn2_beta"],
                     p["bn2_mean"], p["bn2_var"]), p["conv2_w"], p["conv2_b"]))
    y = jax.lax.reduce_window(y, -jnp.inf, jax.lax.max,
                              window_dimensions=(1, 1, 2, 2),
                              window_strides=(1, 1, 2, 2), padding="VALID")
    y = y.reshape(y.shape[0], -1)
    return y @ p["fc_w"].T + p["fc_b"]


# -----------------------------------------------------------------------------
# Deterministic parameter init (shapes from ConvClassifier.__init__)
# -----------------------------------------------------------------------------
def init_params(key, feature_size, feature_channel, class_num, hidden_channel):
    ks = jax.random.split(key, 12)
    fdim = ((feature_size - 4) // 2) ** 2 * hidden_channel

    def u(k, shape, scale=0.1):
        return jax.random.uniform(k, shape, jnp.float32, -1.0, 1.0) * scale

    return {
        "bn1_gamma": 1.0 + u(ks[0], (feature_channel,)),
        "bn1_beta":  u(ks[1], (feature_channel,)),
        "bn1_mean":  u(ks[2], (feature_channel,)),
        "bn1_var":   jax.random.uniform(ks[3], (feature_channel,), jnp.float32, 0.5, 1.5),
        "conv1_w":   u(ks[4], (hidden_channel, feature_channel, 3, 3)),
        "conv1_b":   u(ks[5], (hidden_channel,)),
        "bn2_gamma": 1.0 + u(ks[6], (hidden_channel,)),
        "bn2_beta":  u(ks[7], (hidden_channel,)),
        "bn2_mean":  u(ks[8], (hidden_channel,)),
        "bn2_var":   jax.random.uniform(ks[9], (hidden_channel,), jnp.float32, 0.5, 1.5),
        "conv2_w":   u(ks[10], (hidden_channel, hidden_channel, 3, 3)),
        "conv2_b":   u(ks[11], (hidden_channel,)),
        "fc_w":      u(jax.random.fold_in(key, 100), (class_num, fdim), 0.05),
        "fc_b":      u(jax.random.fold_in(key, 101), (class_num,), 0.05),
    }


if __name__ == "__main__":
    # Small shapes consistent with the module: feature_size=16, feature_channel=4,
    # hidden_channel=32, class_num=10, hidden_depth=1 (as in __init__), batch=2.
    FEATURE_SIZE, FEATURE_CHANNEL, HIDDEN_CHANNEL, CLASS_NUM, BATCH = 16, 4, 32, 10, 2

    key = jax.random.PRNGKey(0)
    kp, kx = jax.random.split(key)
    params = init_params(kp, FEATURE_SIZE, FEATURE_CHANNEL, CLASS_NUM, HIDDEN_CHANNEL)
    x = jax.random.normal(kx, (BATCH, FEATURE_CHANNEL, FEATURE_SIZE, FEATURE_SIZE),
                          jnp.float32)  # NCHW, like the PyTorch module

    logits = conv_classifier_forward(x, params)
    jax.block_until_ready(logits)
    assert logits.shape == (BATCH, CLASS_NUM), logits.shape
    assert bool(jnp.all(jnp.isfinite(logits)))

    ref = _reference_forward(x, params)
    max_err = float(jnp.max(jnp.abs(logits - ref)))
    assert max_err < 5e-2, f"max |pallas - reference| = {max_err}"

    print("KERNEL_OK")
</pallas_src>

<mosaic_0001>
module attributes {stable_mosaic.version = 11 : i64} {
  func.func @kernel(%arg0: i32, %arg1: memref<1x240x128xbf16, #tpu.memory_space<vmem>>, %arg2: memref<128x128xbf16, #tpu.memory_space<vmem>>, %arg3: memref<1x128xf32, #tpu.memory_space<vmem>>, %arg4: memref<9x128x128xbf16, #tpu.memory_space<vmem>>, %arg5: memref<1x128xf32, #tpu.memory_space<vmem>>, %arg6: memref<1x6x8x128xf32, #tpu.memory_space<vmem>>, %arg7: memref<3x224x128xbf16, #tpu.memory_space<vmem>>, %arg8: memref<96x128xf32, #tpu.memory_space<vmem>>) attributes {dimension_semantics = [#tpu.dimension_semantics<parallel>], iteration_bounds = array<i64: 2>, scalar_prefetch = 0 : i64, scratch_operands = 2 : i64, tpu.core_type = #tpu.core_type<tc>, window_params = [{transform_indices = @transform_0, window_bounds = array<i64: 1, 240, 128>}, {pipeline_mode = #tpu.pipeline_mode<synchronous>, transform_indices = @transform_1, window_bounds = array<i64: 128, 128>}, {pipeline_mode = #tpu.pipeline_mode<synchronous>, transform_indices = @transform_2, window_bounds = array<i64: 1, 128>}, {pipeline_mode = #tpu.pipeline_mode<synchronous>, transform_indices = @transform_3, window_bounds = array<i64: 9, 128, 128>}, {pipeline_mode = #tpu.pipeline_mode<synchronous>, transform_indices = @transform_4, window_bounds = array<i64: 1, 128>}, {transform_indices = @transform_5, window_bounds = array<i64: 1, 6, 8, 128>}]} {
    %c0 = arith.constant 0 : index
    %c0_0 = arith.constant 0 : index
    %0 = vector.load %arg2[%c0, %c0_0] : memref<128x128xbf16, #tpu.memory_space<vmem>>, vector<128x128xbf16>
    %c0_1 = arith.constant 0 : index
    %c0_2 = arith.constant 0 : index
    %1 = vector.load %arg3[%c0_1, %c0_2] : memref<1x128xf32, #tpu.memory_space<vmem>>, vector<1x128xf32>
    %c0_3 = arith.constant 0 : index
    %c0_4 = arith.constant 0 : index
    %2 = vector.load %arg5[%c0_3, %c0_4] : memref<1x128xf32, #tpu.memory_space<vmem>>, vector<1x128xf32>
    %c0_5 = arith.constant 0 : index
    %c0_6 = arith.constant 0 : index
    %c0_7 = arith.constant 0 : index
    %3 = vector.load %arg1[%c0_5, %c0_6, %c0_7] : memref<1x240x128xbf16, #tpu.memory_space<vmem>>, vector<1x240x128xbf16>
    %4 = vector.shape_cast %3 : vector<1x240x128xbf16> to vector<240x128xbf16>
    %cst = arith.constant dense<0.000000e+00> : vector<240x128xf32>
    %5 = tpu.matmul %4, %0, %cst {dimension_numbers = #tpu.dot_dimension_numbers<[1], [0], [0], [1], [0, 0, 1, 1], [], []>} : vector<240x128xbf16>, vector<128x128xbf16>, vector<240x128xf32> -> vector<240x128xf32>
    %6 = vector.broadcast %1 : vector<1x128xf32> to vector<240x128xf32>
    %7 = arith.addf %5, %6 : vector<240x128xf32>
    %cst_8 = arith.constant 0.000000e+00 : f32
    %8 = vector.broadcast %cst_8 : f32 to vector<240x128xf32>
    %9 = arith.subf %8, %7 : vector<240x128xf32>
    %10 = math.exp %9 : vector<240x128xf32>
    %cst_9 = arith.constant 1.000000e+00 : f32
    %11 = vector.broadcast %cst_9 : f32 to vector<240x128xf32>
    %12 = arith.addf %11, %10 : vector<240x128xf32>
    %13 = tpu.reciprocal %12 : vector<240x128xf32> -> vector<240x128xf32>
    %14 = arith.mulf %7, %13 : vector<240x128xf32>
    %15 = vector.extract_strided_slice %14 {offsets = [0, 0], sizes = [224, 128], strides = [1, 1]} : vector<240x128xf32> to vector<224x128xf32>
    %16 = arith.truncf %15 : vector<224x128xf32> to vector<224x128xbf16>
    %c0_10 = arith.constant 0 : index
    %c0_11 = arith.constant 0 : index
    %c0_12 = arith.constant 0 : index
    %17 = vector.load %arg7[%c0_10, %c0_11, %c0_12] : memref<3x224x128xbf16, #tpu.memory_space<vmem>>, vector<1x224x128xbf16>
    %18 = vector.shape_cast %17 : vector<1x224x128xbf16> to vector<224x128xbf16>
    %19 = vector.shape_cast %16 : vector<224x128xbf16> to vector<1x224x128xbf16>
    tpu.vector_store %arg7[%c0_10, %c0_11, %c0_12], %19 {strides = array<i32>} : memref<3x224x128xbf16, #tpu.memory_space<vmem>>, vector<1x224x128xbf16>,
    %20 = vector.extract_strided_slice %14 {offsets = [1, 0], sizes = [224, 128], strides = [1, 1]} : vector<240x128xf32> to vector<224x128xf32>
    %21 = arith.truncf %20 : vector<224x128xf32> to vector<224x128xbf16>
    %c1 = arith.constant 1 : index
    %c0_13 = arith.constant 0 : index
    %c0_14 = arith.constant 0 : index
    %22 = vector.load %arg7[%c1, %c0_13, %c0_14] : memref<3x224x128xbf16, #tpu.memory_space<vmem>>, vector<1x224x128xbf16>
    %23 = vector.shape_cast %22 : vector<1x224x128xbf16> to vector<224x128xbf16>
    %24 = vector.shape_cast %21 : vector<224x128xbf16> to vector<1x224x128xbf16>
    tpu.vector_store %arg7[%c1, %c0_13, %c0_14], %24 {strides = array<i32>} : memref<3x224x128xbf16, #tpu.memory_space<vmem>>, vector<1x224x128xbf16>,
    %25 = vector.extract_strided_slice %14 {offsets = [2, 0], sizes = [224, 128], strides = [1, 1]} : vector<240x128xf32> to vector<224x128xf32>
    %26 = arith.truncf %25 : vector<224x128xf32> to vector<224x128xbf16>
    %c2 = arith.constant 2 : index
    %c0_15 = arith.constant 0 : index
    %c0_16 = arith.constant 0 : index
    %27 = vector.load %arg7[%c2, %c0_15, %c0_16] : memref<3x224x128xbf16, #tpu.memory_space<vmem>>, vector<1x224x128xbf16>
    %28 = vector.shape_cast %27 : vector<1x224x128xbf16> to vector<224x128xbf16>
    %29 = vector.shape_cast %26 : vector<224x128xbf16> to vector<1x224x128xbf16>
    tpu.vector_store %arg7[%c2, %c0_15, %c0_16], %29 {strides = array<i32>} : memref<3x224x128xbf16, #tpu.memory_space<vmem>>, vector<1x224x128xbf16>,
    %c0_17 = arith.constant 0 : index
    %c0_18 = arith.constant 0 : index
    %c0_19 = arith.constant 0 : index
    %30 = vector.load %arg7[%c0_17, %c0_18, %c0_19] : memref<3x224x128xbf16, #tpu.memory_space<vmem>>, vector<1x192x128xbf16>
    %31 = vector.shape_cast %30 : vector<1x192x128xbf16> to vector<192x128xbf16>
    %c0_20 = arith.constant 0 : index
    %c0_21 = arith.constant 0 : index
    %c0_22 = arith.constant 0 : index
    %32 = vector.load %arg4[%c0_20, %c0_21, %c0_22] : memref<9x128x128xbf16, #tpu.memory_space<vmem>>, vector<1x128x128xbf16>
    %33 = vector.shape_cast %32 : vector<1x128x128xbf16> to vector<128x128xbf16>
    %cst_23 = arith.constant dense<0.000000e+00> : vector<192x128xf32>
    %34 = tpu.matmul %31, %33, %cst_23 {dimension_numbers = #tpu.dot_dimension_numbers<[1], [0], [0], [1], [0, 0, 1, 1], [], []>} : vector<192x128xbf16>, vector<128x128xbf16>, vector<192x128xf32> -> vector<192x128xf32>
    %c1_24 = arith.constant 1 : index
    %c0_25 = arith.constant 0 : index
    %c0_26 = arith.constant 0 : index
    %35 = vector.load %arg7[%c1_24, %c0_25, %c0_26] : memref<3x224x128xbf16, #tpu.memory_space<vmem>>, vector<1x192x128xbf16>
    %36 = vector.shape_cast %35 : vector<1x192x128xbf16> to vector<192x128xbf16>
    %c1_27 = arith.constant 1 : index
    %c0_28 = arith.constant 0 : index
    %c0_29 = arith.constant 0 : index
    %37 = vector.load %arg4[%c1_27, %c0_28, %c0_29] : memref<9x128x128xbf16, #tpu.memory_space<vmem>>, vector<1x128x128xbf16>
    %38 = vector.shape_cast %37 : vector<1x128x128xbf16> to vector<128x128xbf16>
    %cst_30 = arith.constant dense<0.000000e+00> : vector<192x128xf32>
    %39 = tpu.matmul %36, %38, %cst_30 {dimension_numbers = #tpu.dot_dimension_numbers<[1], [0], [0], [1], [0, 0, 1, 1], [], []>} : vector<192x128xbf16>, vector<128x128xbf16>, vector<192x128xf32> -> vector<192x128xf32>
    %40 = arith.addf %34, %39 : vector<192x128xf32>
    %c2_31 = arith.constant 2 : index
    %c0_32 = arith.constant 0 : index
    %c0_33 = arith.constant 0 : index
    %41 = vector.load %arg7[%c2_31, %c0_32, %c0_33] : memref<3x224x128xbf16, #tpu.memory_space<vmem>>, vector<1x192x128xbf16>
    %42 = vector.shape_cast %41 : vector<1x192x128xbf16> to vector<192x128xbf16>
    %c2_34 = arith.constant 2 : index
    %c0_35 = arith.constant 0 : index
    %c0_36 = arith.constant 0 : index
    %43 = vector.load %arg4[%c2_34, %c0_35, %c0_36] : memref<9x128x128xbf16, #tpu.memory_space<vmem>>, vector<1x128x128xbf16>
    %44 = vector.shape_cast %43 : vector<1x128x128xbf16> to vector<128x128xbf16>
    %cst_37 = arith.constant dense<0.000000e+00> : vector<192x128xf32>
    %45 = tpu.matmul %42, %44, %cst_37 {dimension_numbers = #tpu.dot_dimension_numbers<[1], [0], [0], [1], [0, 0, 1, 1], [], []>} : vector<192x128xbf16>, vector<128x128xbf16>, vector<192x128xf32> -> vector<192x128xf32>
    %46 = arith.addf %40, %45 : vector<192x128xf32>
    %c0_38 = arith.constant 0 : index
    %c16 = arith.constant 16 : index
    %c0_39 = arith.constant 0 : index
    %47 = vector.load %arg7[%c0_38, %c16, %c0_39] : memref<3x224x128xbf16, #tpu.memory_space<vmem>>, vector<1x192x128xbf16>
    %48 = vector.shape_cast %47 : vector<1x192x128xbf16> to vector<192x128xbf16>
    %c3 = arith.constant 3 : index
    %c0_40 = arith.constant 0 : index
    %c0_41 = arith.constant 0 : index
    %49 = vector.load %arg4[%c3, %c0_40, %c0_41] : memref<9x128x128xbf16, #tpu.memory_space<vmem>>, vector<1x128x128xbf16>
    %50 = vector.shape_cast %49 : vector<1x128x128xbf16> to vector<128x128xbf16>
    %cst_42 = arith.constant dense<0.000000e+00> : vector<192x128xf32>
    %51 = tpu.matmul %48, %50, %cst_42 {dimension_numbers = #tpu.dot_dimension_numbers<[1], [0], [0], [1], [0, 0, 1, 1], [], []>} : vector<192x128xbf16>, vector<128x128xbf16>, vector<192x128xf32> -> vector<192x128xf32>
    %52 = arith.addf %46, %51 : vector<192x128xf32>
    %c1_43 = arith.constant 1 : index
    %c16_44 = arith.constant 16 : index
    %c0_45 = arith.constant 0 : index
    %53 = vector.load %arg7[%c1_43, %c16_44, %c0_45] : memref<3x224x128xbf16, #tpu.memory_space<vmem>>, vector<1x192x128xbf16>
    %54 = vector.shape_cast %53 : vector<1x192x128xbf16> to vector<192x128xbf16>
    %c4 = arith.constant 4 : index
    %c0_46 = arith.constant 0 : index
    %c0_47 = arith.constant 0 : index
    %55 = vector.load %arg4[%c4, %c0_46, %c0_47] : memref<9x128x128xbf16, #tpu.memory_space<vmem>>, vector<1x128x128xbf16>
    %56 = vector.shape_cast %55 : vector<1x128x128xbf16> to vector<128x128xbf16>
    %cst_48 = arith.constant dense<0.000000e+00> : vector<192x128xf32>
    %57 = tpu.matmul %54, %56, %cst_48 {dimension_numbers = #tpu.dot_dimension_numbers<[1], [0], [0], [1], [0, 0, 1, 1], [], []>} : vector<192x128xbf16>, vector<128x128xbf16>, vector<192x128xf32> -> vector<192x128xf32>
    %58 = arith.addf %52, %57 : vector<192x128xf32>
    %c2_49 = arith.constant 2 : index
    %c16_50 = arith.constant 16 : index
    %c0_51 = arith.constant 0 : index
    %59 = vector.load %arg7[%c2_49, %c16_50, %c0_51] : memref<3x224x128xbf16, #tpu.memory_space<vmem>>, vector<1x192x128xbf16>
    %60 = vector.shape_cast %59 : vector<1x192x128xbf16> to vector<192x128xbf16>
    %c5 = arith.constant 5 : index
    %c0_52 = arith.constant 0 : index
    %c0_53 = arith.constant 0 : index
    %61 = vector.load %arg4[%c5, %c0_52, %c0_53] : memref<9x128x128xbf16, #tpu.memory_space<vmem>>, vector<1x128x128xbf16>
    %62 = vector.shape_cast %61 : vector<1x128x128xbf16> to vector<128x128xbf16>
    %cst_54 = arith.constant dense<0.000000e+00> : vector<192x128xf32>
    %63 = tpu.matmul %60, %62, %cst_54 {dimension_numbers = #tpu.dot_dimension_numbers<[1], [0], [0], [1], [0, 0, 1, 1], [], []>} : vector<192x128xbf16>, vector<128x128xbf16>, vector<192x128xf32> -> vector<192x128xf32>
    %64 = arith.addf %58, %63 : vector<192x128xf32>
    %c0_55 = arith.constant 0 : index
    %c32 = arith.constant 32 : index
    %c0_56 = arith.constant 0 : index
    %65 = vector.load %arg7[%c0_55, %c32, %c0_56] : memref<3x224x128xbf16, #tpu.memory_space<vmem>>, vector<1x192x128xbf16>
    %66 = vector.shape_cast %65 : vector<1x192x128xbf16> to vector<192x128xbf16>
    %c6 = arith.constant 6 : index
    %c0_57 = arith.constant 0 : index
    %c0_58 = arith.constant 0 : index
    %67 = vector.load %arg4[%c6, %c0_57, %c0_58] : memref<9x128x128xbf16, #tpu.memory_space<vmem>>, vector<1x128x128xbf16>
    %68 = vector.shape_cast %67 : vector<1x128x128xbf16> to vector<128x128xbf16>
    %cst_59 = arith.constant dense<0.000000e+00> : vector<192x128xf32>
    %69 = tpu.matmul %66, %68, %cst_59 {dimension_numbers = #tpu.dot_dimension_numbers<[1], [0], [0], [1], [0, 0, 1, 1], [], []>} : vector<192x128xbf16>, vector<128x128xbf16>, vector<192x128xf32> -> vector<192x128xf32>
    %70 = arith.addf %64, %69 : vector<192x128xf32>
    %c1_60 = arith.constant 1 : index
    %c32_61 = arith.constant 32 : index
    %c0_62 = arith.constant 0 : index
    %71 = vector.load %arg7[%c1_60, %c32_61, %c0_62] : memref<3x224x128xbf16, #tpu.memory_space<vmem>>, vector<1x192x128xbf16>
    %72 = vector.shape_cast %71 : vector<1x192x128xbf16> to vector<192x128xbf16>
    %c7 = arith.constant 7 : index
    %c0_63 = arith.constant 0 : index
    %c0_64 = arith.constant 0 : index
    %73 = vector.load %arg4[%c7, %c0_63, %c0_64] : memref<9x128x128xbf16, #tpu.memory_space<vmem>>, vector<1x128x128xbf16>
    %74 = vector.shape_cast %73 : vector<1x128x128xbf16> to vector<128x128xbf16>
    %cst_65 = arith.constant dense<0.000000e+00> : vector<192x128xf32>
    %75 = tpu.matmul %72, %74, %cst_65 {dimension_numbers = #tpu.dot_dimension_numbers<[1], [0], [0], [1], [0, 0, 1, 1], [], []>} : vector<192x128xbf16>, vector<128x128xbf16>, vector<192x128xf32> -> vector<192x128xf32>
    %76 = arith.addf %70, %75 : vector<192x128xf32>
    %c2_66 = arith.constant 2 : index
    %c32_67 = arith.constant 32 : index
    %c0_68 = arith.constant 0 : index
    %77 = vector.load %arg7[%c2_66, %c32_67, %c0_68] : memref<3x224x128xbf16, #tpu.memory_space<vmem>>, vector<1x192x128xbf16>
    %78 = vector.shape_cast %77 : vector<1x192x128xbf16> to vector<192x128xbf16>
    %c8 = arith.constant 8 : index
    %c0_69 = arith.constant 0 : index
    %c0_70 = arith.constant 0 : index
    %79 = vector.load %arg4[%c8, %c0_69, %c0_70] : memref<9x128x128xbf16, #tpu.memory_space<vmem>>, vector<1x128x128xbf16>
    %80 = vector.shape_cast %79 : vector<1x128x128xbf16> to vector<128x128xbf16>
    %cst_71 = arith.constant dense<0.000000e+00> : vector<192x128xf32>
    %81 = tpu.matmul %78, %80, %cst_71 {dimension_numbers = #tpu.dot_dimension_numbers<[1], [0], [0], [1], [0, 0, 1, 1], [], []>} : vector<192x128xbf16>, vector<128x128xbf16>, vector<192x128xf32> -> vector<192x128xf32>
    %82 = arith.addf %76, %81 : vector<192x128xf32>
    %83 = vector.broadcast %2 : vector<1x128xf32> to vector<192x128xf32>
    %84 = arith.addf %82, %83 : vector<192x128xf32>
    %cst_72 = arith.constant 0.000000e+00 : f32
    %85 = vector.broadcast %cst_72 : f32 to vector<192x128xf32>
    %86 = arith.subf %85, %84 : vector<192x128xf32>
    %87 = math.exp %86 : vector<192x128xf32>
    %cst_73 = arith.constant 1.000000e+00 : f32
    %88 = vector.broadcast %cst_73 : f32 to vector<192x128xf32>
    %89 = arith.addf %88, %87 : vector<192x128xf32>
    %90 = tpu.reciprocal %89 : vector<192x128xf32> -> vector<192x128xf32>
    %91 = arith.mulf %84, %90 : vector<192x128xf32>
    %92 = vector.shape_cast %91 : vector<192x128xf32> to vector<6x32x128xf32>
    %93 = vector.extract_strided_slice %92 {offsets = [0, 0, 0], sizes = [6, 16, 128], strides = [1, 1, 1]} : vector<6x32x128xf32> to vector<6x16x128xf32>
    %94 = vector.extract_strided_slice %92 {offsets = [0, 16, 0], sizes = [6, 16, 128], strides = [1, 1, 1]} : vector<6x32x128xf32> to vector<6x16x128xf32>
    %95 = arith.maximumf %93, %94 : vector<6x16x128xf32>
    %96 = vector.shape_cast %95 : vector<6x16x128xf32> to vector<96x128xf32>
    %c0_74 = arith.constant 0 : index
    %c0_75 = arith.constant 0 : index
    %97 = vector.load %arg8[%c0_74, %c0_75] : memref<96x128xf32, #tpu.memory_space<vmem>>, vector<96x128xf32>
    tpu.vector_store %arg8[%c0_74, %c0_75], %96 {strides = array<i32>} : memref<96x128xf32, #tpu.memory_space<vmem>>, vector<96x128xf32>,
    %c0_76 = arith.constant 0 : index
    %c0_77 = arith.constant 0 : index
    %98 = tpu.strided_load %arg8[%c0_76, %c0_77] {strides = array<i32: 2, 1>} : memref<96x128xf32, #tpu.memory_space<vmem>>, vector<48x128xf32>
    %c1_78 = arith.constant 1 : index
    %c0_79 = arith.constant 0 : index
    %99 = tpu.strided_load %arg8[%c1_78, %c0_79] {strides = array<i32: 2, 1>} : memref<96x128xf32, #tpu.memory_space<vmem>>, vector<48x128xf32>
    %100 = arith.maximumf %98, %99 : vector<48x128xf32>
    %101 = vector.shape_cast %100 : vector<48x128xf32> to vector<6x8x128xf32>
    %c0_80 = arith.constant 0 : index
    %c0_81 = arith.constant 0 : index
    %c0_82 = arith.constant 0 : index
    %c0_83 = arith.constant 0 : index
    %102 = vector.load %arg6[%c0_80, %c0_81, %c0_82, %c0_83] : memref<1x6x8x128xf32, #tpu.memory_space<vmem>>, vector<1x6x8x128xf32>
    %103 = vector.shape_cast %102 : vector<1x6x8x128xf32> to vector<6x8x128xf32>
    %104 = vector.shape_cast %101 : vector<6x8x128xf32> to vector<1x6x8x128xf32>
    tpu.vector_store %arg6[%c0_80, %c0_81, %c0_82, %c0_83], %104 {strides = array<i32>} : memref<1x6x8x128xf32, #tpu.memory_space<vmem>>, vector<1x6x8x128xf32>,
    return
  }
  func.func @transform_0(%arg0: i32) -> (i32, i32, i32) {
    %c0_i32 = arith.constant 0 : i32
    %c0_i32_0 = arith.constant 0 : i32
    %c0_i32_1 = arith.constant 0 : i32
    return %arg0, %c0_i32, %c0_i32_0 : i32, i32, i32
  }
  func.func @transform_1(%arg0: i32) -> (i32, i32) {
    %c0_i32 = arith.constant 0 : i32
    %c0_i32_0 = arith.constant 0 : i32
    %c0_i32_1 = arith.constant 0 : i32
    return %c0_i32, %c0_i32_0 : i32, i32
  }
  func.func @transform_2(%arg0: i32) -> (i32, i32) {
    %c0_i32 = arith.constant 0 : i32
    %c0_i32_0 = arith.constant 0 : i32
    %c0_i32_1 = arith.constant 0 : i32
    return %c0_i32, %c0_i32_0 : i32, i32
  }
  func.func @transform_3(%arg0: i32) -> (i32, i32, i32) {
    %c0_i32 = arith.constant 0 : i32
    %c0_i32_0 = arith.constant 0 : i32
    %c0_i32_1 = arith.constant 0 : i32
    %c0_i32_2 = arith.constant 0 : i32
    return %c0_i32, %c0_i32_0, %c0_i32_1 : i32, i32, i32
  }
  func.func @transform_4(%arg0: i32) -> (i32, i32) {
    %c0_i32 = arith.constant 0 : i32
    %c0_i32_0 = arith.constant 0 : i32
    %c0_i32_1 = arith.constant 0 : i32
    return %c0_i32, %c0_i32_0 : i32, i32
  }
  func.func @transform_5(%arg0: i32) -> (i32, i32, i32, i32) {
    %c0_i32 = arith.constant 0 : i32
    %c0_i32_0 = arith.constant 0 : i32
    %c0_i32_1 = arith.constant 0 : i32
    %c0_i32_2 = arith.constant 0 : i32
    return %arg0, %c0_i32, %c0_i32_0, %c0_i32_1 : i32, i32, i32, i32
  }
}

module attributes {stable_mosaic.version = 11 : i64} {
  func.func @_fc_kernel(%arg0: memref<2x6144xbf16, #tpu.memory_space<vmem>>, %arg1: memref<6144x128xbf16, #tpu.memory_space<vmem>>, %arg2: memref<1x128xf32, #tpu.memory_space<vmem>>, %arg3: memref<2x128xf32, #tpu.memory_space<vmem>>) attributes {dimension_semantics = [], scalar_prefetch = 0 : i64, scratch_operands = 0 : i64, tpu.core_type = #tpu.core_type<tc>} {
    %c0 = arith.constant 0 : index
    %c0_0 = arith.constant 0 : index
    %0 = vector.load %arg0[%c0, %c0_0] : memref<2x6144xbf16, #tpu.memory_space<vmem>>, vector<2x6144xbf16>
    %c0_1 = arith.constant 0 : index
    %c0_2 = arith.constant 0 : index
    %1 = vector.load %arg1[%c0_1, %c0_2] : memref<6144x128xbf16, #tpu.memory_space<vmem>>, vector<6144x128xbf16>
    %cst = arith.constant dense<0.000000e+00> : vector<2x128xf32>
    %2 = tpu.matmul %0, %1, %cst {dimension_numbers = #tpu.dot_dimension_numbers<[1], [0], [0], [1], [0, 0, 1, 1], [], []>} : vector<2x6144xbf16>, vector<6144x128xbf16>, vector<2x128xf32> -> vector<2x128xf32>
    %c0_3 = arith.constant 0 : index
    %c0_4 = arith.constant 0 : index
    %3 = vector.load %arg2[%c0_3, %c0_4] : memref<1x128xf32, #tpu.memory_space<vmem>>, vector<1x128xf32>
    %4 = vector.broadcast %3 : vector<1x128xf32> to vector<2x128xf32>
    %5 = arith.addf %2, %4 : vector<2x128xf32>
    %c0_5 = arith.constant 0 : index
    %c0_6 = arith.constant 0 : index
    %6 = vector.load %arg3[%c0_5, %c0_6] : memref<2x128xf32, #tpu.memory_space<vmem>>, vector<2x128xf32>
    tpu.vector_store %arg3[%c0_5, %c0_6], %5 {strides = array<i32>} : memref<2x128xf32, #tpu.memory_space<vmem>>, vector<2x128xf32>,
    return
  }
}

</mosaic_0001>

<bundles_post_ra>
// kernel: conv_classifier_forward.2
= control target key start
LH: loop header
LB: loop body
LE: loop exit
PB: predicated region body
PF: predicated region fallthrough
CT: control target
= control target key end

     0   :  { %s5990_s18 = smov 0   ;;  %s7753_s0 = inlined_call_operand.vmem [shape: bf16[2,240,128], index: 0, kind: input, shape index: {}]   ;;  %s7754_s1 = inlined_call_operand.vmem [shape: bf16[128,128], index: 1, kind: input, shape index: {}]   ;;  %s7755_s2 = inlined_call_operand.vmem [shape: f32[1,128], index: 2, kind: input, shape index: {}]   ;;  %s7756_s3 = inlined_call_operand.vmem [shape: bf16[9,128,128], index: 3, kind: input, shape index: {}]   ;;  %s7757_s4 = inlined_call_operand.vmem [shape: f32[1,128], index: 4, kind: input, shape index: {}]   ;;  %s7758_s5 = inlined_call_operand.vmem [shape: f32[2,6,8,128], index: 5, kind: output, shape index: {}]  }
   0x1 LB: > { %s4457_s19 = sadd.s32 4294967295, %s5958_s18   ;;  %p4461_p0 = scmp.ge.s32.totalorder %s5958_s18, 1  ;;  %s5958_s18 = sphi %s5990_s18, %s15_s18  }
   0x2   : > { %p187_p1 = scmp.lt.s32.totalorder %s5958_s18, 3 }
   0x4   : > { %p188_p2 = pnand %p4461_p0, %p187_p1 }
   0x5   : > { %p215_p3 = scmp.lt.s32.totalorder (!%p188_p2), %s4457_s19, 1 }
   0x6   : > { %191 = sbr.rel (%p188_p2) target bundleno = 1015 (0x3f7), region = 40 }
   0xb   : > { %v5414_v0 = vld [vmem:[%s7754_s1 + $0x38] sm:$0xff]  ;;  %v5413_v1 = vld [vmem:[%s7754_s1 + $0x30] sm:$0xff]  ;;  %v5412_v2 = vld [vmem:[%s7754_s1 + $0x28] sm:$0xff]  ;;  %s7818_s19 = smov (!%p215_p3, %s4457_s19), 1  ;;  %vm1105_vm8 = vsmask.f32 3328 }
   0xc   : > { %414 = vmatpush.bf16.msra.mxu0 %v5414_v0  ;;  %v5411_v3 = vld [vmem:[%s7754_s1 + $0x20] sm:$0xff]  ;;  %v5410_v4 = vld [vmem:[%s7754_s1 + $0x18] sm:$0xff]  ;;  %v5409_v5 = vld [vmem:[%s7754_s1 + $0x10] sm:$0xff]  ;;  %s5717_s9 = smul.u32 120, %s7818_s19  ;;  %vm1106_vm9 = vsmask.f32 7440 }
   0xd   : > { %v5408_v6 = vld [vmem:[%s7754_s1 + $0x8] sm:$0xff]  ;;  %v5407_v7 = vld [vmem:[%s7754_s1] sm:$0xff]  ;;  %v5469_v22 = vld [vmem:[%s7756_s3 + $0x78] sm:$0xff]  ;;  %vm1478_vm10 = vcmask 1042432   ;;  %vm1479_vm11 = vcmask 1046532   ;;  %s5718_s25 = smul.u32 48, %s7818_s19 }
   0xe   : > { %s6028_s14 = scalar_lea.vmem %s7753_s0, %s5717_s9  ;;  %v6041_v16 = vld [vmem:[%s7755_s2] ss:$0 sm:$0xff]  ;;  %1824 = vmatpush.bf16.msra.mxu1 %v5469_v22  ;;  %5693 = vmatpush.bf16.msra.mxu3 %v5469_v22  ;;  %v5468_v26 = vld [vmem:[%s7756_s3 + $0x70] sm:$0xff]  ;;  %v5467_v31 = vld [vmem:[%s7756_s3 + $0x68] sm:$0xff] }
   0xf   : > { %v5415_v8 = vld [vmem:[%s6028_s14] sm:$0xff]  ;;  %v5416_v9 = vld [vmem:[%s6028_s14 + $0x8] sm:$0xff]  ;;  %v5417_v10 = vld [vmem:[%s6028_s14 + $0x10] sm:$0xff]  ;;  %s7408_s19 = scalar_lea.vmem %s7758_s5, %s5718_s25 }
  0x10   : > { %415 = vmatpush.bf16.msra.mxu0 %v5413_v1  ;;  %v5418_v11 = vld [vmem:[%s6028_s14 + $0x18] sm:$0xff]  ;;  %v5419_v12 = vld [vmem:[%s6028_s14 + $0x20] sm:$0xff]  ;;  %v5420_v13 = vld [vmem:[%s6028_s14 + $0x28] sm:$0xff] }
  0x11   : > { %v5421_v14 = vld [vmem:[%s6028_s14 + $0x30] sm:$0xff]  ;;  %v5422_v15 = vld [vmem:[%s6028_s14 + $0x38] sm:$0xff]  ;;  %v5423_v17 = vld [vmem:[%s6028_s14 + $0x40] sm:$0xff] }
  0x12   : > { %1825 = vmatpush.bf16.msra.mxu1 %v5468_v26  ;;  %5694 = vmatpush.bf16.msra.mxu3 %v5468_v26  ;;  %v5424_v30 = vld [vmem:[%s6028_s14 + $0x48] sm:$0xff]  ;;  %v5466_v37 = vld [vmem:[%s7756_s3 + $0x60] sm:$0xff]  ;;  %v5465_v44 = vld [vmem:[%s7756_s3 + $0x58] sm:$0xff] }
  0x13   : > { %v5464_v52 = vld [vmem:[%s7756_s3 + $0x50] sm:$0xff]  ;;  %v5463_v0 = vld [vmem:[%s7756_s3 + $0x48] sm:$0xff]  ;;  %vm6104_vm12 = vmor %vm1478_vm10, %vm1479_vm11 }
  0x14   : > { %416 = vmatpush.bf16.msra.mxu0 %v5412_v2  ;;  %v5425_v58 = vld [vmem:[%s6028_s14 + $0x50] sm:$0xff]  ;;  %vm6111_vm14 = vmor %vm1105_vm8, %vm1106_vm9 }
  0x16   : > { %1826 = vmatpush.bf16.msra.mxu1 %v5467_v31  ;;  %5695 = vmatpush.bf16.msra.mxu3 %v5467_v31 }
  0x18   : > { %417 = vmatpush.bf16.msra.mxu0 %v5411_v3 }
  0x1a   : > { %1827 = vmatpush.bf16.msra.mxu1 %v5466_v37  ;;  %5696 = vmatpush.bf16.msra.mxu3 %v5466_v37 }
  0x1c   : > { %418 = vmatpush.bf16.msra.mxu0 %v5410_v4 }
  0x1e   : > { %1828 = vmatpush.bf16.msra.mxu1 %v5465_v44  ;;  %5697 = vmatpush.bf16.msra.mxu3 %v5465_v44 }
  0x20   : > { %419 = vmatpush.bf16.msra.mxu0 %v5409_v5 }
  0x22   : > { %1829 = vmatpush.bf16.msra.mxu1 %v5464_v52  ;;  %5698 = vmatpush.bf16.msra.mxu3 %v5464_v52 }
  0x24   : > { %420 = vmatpush.bf16.msra.mxu0 %v5408_v6 }
  0x26   : > { %1830 = vmatpush.bf16.msra.mxu1 %v5463_v0  ;;  %5699 = vmatpush.bf16.msra.mxu3 %v5463_v0 }
  0x28   : > { %421 = vmatpush.bf16.msra.mxu0 %v5407_v7 }
  0x2b   : > { %422 = vmatmul.bf16.vlgmr.msra.gmra.mxu0 %v5415_v8 }
  0x3b   : > { %427 = vmatmul.bf16.gmra.mxu0 %v5416_v9 }
  0x4b   : > { %432 = vmatmul.bf16.gmra.mxu0 %v5417_v10  ;;  %v5462_v10 = vld [vmem:[%s7756_s3 + $0x40] sm:$0xff] }
  0x4c   : > { %1831 = vmatpush.bf16.msra.mxu1 %v5462_v10  ;;  %5700 = vmatpush.bf16.msra.mxu3 %v5462_v10 }
  0x5b   : > { %437 = vmatmul.bf16.gmra.mxu0 %v5418_v11 }
  0x6b   : > { %442 = vmatmul.bf16.gmra.mxu0 %v5419_v12 }
  0x7b   : > { %447 = vmatmul.bf16.gmra.mxu0 %v5420_v13 }
  0x8b   : > { %452 = vmatmul.bf16.gmra.mxu0 %v5421_v14 }
  0x9b   : > { %457 = vmatmul.bf16.gmra.mxu0 %v5422_v15 }
  0xa8   : > { %v423_v18 = vpop.f32.mrf.mxu0 }
  0xa9   : > { %v6045_v19 = vadd.f32 %v6041_v16, %v423_v18 }
  0xab   : > { %v497_v20 = vsub.f32 0.0, %v6045_v19  ;;  %462 = vmatmul.bf16.gmra.mxu0 %v5423_v17 }
  0xad   : > { %v526_v21 = vmul.f32 1.442695, %v497_v20 }
  0xaf   : > { %5729 = vpow2.f32 %v526_v21 }
  0xb0   : > { %v425_v23 = vpop.f32.mrf.mxu0 }
  0xb1   : > { %v6052_v24 = vadd.f32 %v6041_v16, %v425_v23 }
  0xb3   : > { %v498_v25 = vsub.f32 0.0, %v6052_v24 }
  0xb5   : > { %v5730_v27 = vpop.eup %5729  ;;  %v528_v28 = vmul.f32 1.442695, %v498_v25 }
  0xb6   : > { %v584_v29 = vadd.f32 1.0, %v5730_v27 }
  0xb7   : > { %5731 = vpow2.f32 %v528_v28 }
  0xb8   : > { %5733 = vrcp.f32 %v584_v29  ;;  %v428_v32 = vpop.f32.mrf.mxu0  ;;  %v624_v45 = vand.u32 2147483648, %v584_v29  ;;  %v622_v47 = vand.u32 2147483647, %v584_v29  ;;  %vm618_vm1 = vweird.f32 %v584_v29 }
  0xb9   : > { %v6063_v33 = vadd.f32 %v6041_v16, %v428_v32 }
  0xba   : > { %v625_v54 = vor.u32 1.1754944e-38, %v624_v45  ;;  %vm623_vm3 = vcmp.eq.f32.partialorder %v622_v47, 8.507059e+37 }
  0xbb   : > { %v499_v34 = vsub.f32 0.0, %v6063_v33  ;;  %467 = vmatmul.bf16.gmra.mxu0 %v5424_v30 }
  0xbd   : > { %v5732_v35 = vpop.eup %5731  ;;  %v530_v36 = vmul.f32 1.442695, %v499_v34 }
  0xbe   : > { %v5734_v38 = vpop.eup %5733  ;;  %v585_v39 = vadd.f32 1.0, %v5732_v35 }
  0xbf   : > { %v614_v40 = vmul.f32 %v5734_v38, %v584_v29  ;;  %5735 = vpow2.f32 %v530_v36  ;;  %vm619_vm0 = vweird.f32 %v5734_v38 }
  0xc0   : > { %5737 = vrcp.f32 %v585_v39  ;;  %v430_v41 = vpop.f32.mrf.mxu0  ;;  %vm620_vm2 = vmor %vm618_vm1, %vm619_vm0  ;;  %v636_v1 = vand.u32 2147483647, %v585_v39  ;;  %v638_v2 = vand.u32 2147483648, %v585_v39  ;;  %vm632_vm5 = vweird.f32 %v585_v39 }
  0xc1   : > { %v615_v42 = vsub.f32 1.0, %v614_v40  ;;  %v6070_v43 = vadd.f32 %v6041_v16, %v430_v41 }
  0xc2   : > { %vm637_vm7 = vcmp.eq.f32.partialorder %v636_v1, 8.507059e+37  ;;  %v639_v12 = vor.u32 1.1754944e-38, %v638_v2 }
  0xc3   : > { %v616_v46 = vmul.f32 %v5734_v38, %v615_v42  ;;  %v500_v48 = vsub.f32 0.0, %v6070_v43 }
  0xc5   : > { %v5736_v49 = vpop.eup %5735  ;;  %v617_v50 = vadd.f32 %v5734_v38, %v616_v46  ;;  %v532_v51 = vmul.f32 1.442695, %v500_v48  ;;  %v5426_v48 = vld [vmem:[%s6028_s14 + $0x58] sm:$0xff] }
  0xc6   : > { %v5738_v53 = vpop.eup %5737  ;;  %v6079_v55 = vadd.f32 1.0, %v5736_v49 }
  0xc7   : > { %v621_v56 = vsel %vm620_vm2, %v5734_v38, %v617_v50  ;;  %v628_v57 = vmul.f32 %v5738_v53, %v585_v39  ;;  %5739 = vpow2.f32 %v532_v51  ;;  %vm633_vm4 = vweird.f32 %v5738_v53 }
  0xc8   : > { %v626_v59 = vsel %vm623_vm3, %v625_v54, %v621_v56  ;;  %5741 = vrcp.f32 %v6079_v55  ;;  %v433_v60 = vpop.f32.mrf.mxu0  ;;  %vm634_vm6 = vmor %vm632_vm5, %vm633_vm4  ;;  %v650_v25 = vand.u32 2147483647, %v6079_v55  ;;  %v652_v26 = vand.u32 2147483648, %v6079_v55 }
  0xc9   : > { %v1019_v61 = vmul.f32 %v626_v59, %v6045_v19  ;;  %v629_v62 = vsub.f32 1.0, %v628_v57  ;;  %v6085_v63 = vadd.f32 %v6041_v16, %v433_v60  ;;  %vm646_vm15 = vweird.f32 %v6079_v55 }
  0xca   : > { %vm6116_vm0 = vcmp.eq.f32.partialorder %v650_v25, 8.507059e+37  ;;  %v653_v47 = vor.u32 1.1754944e-38, %v652_v26  ;;  %v5449_v26 = vld [vmem:[%s7756_s3 + $0x38] sm:$0xff] }
  0xcb   : > { %v1048_v3 = vpack.c.bf16 %v1019_v61, %v1019_v61  ;;  %v630_v4 = vmul.f32 %v5738_v53, %v629_v62  ;;  %v501_v5 = vsub.f32 0.0, %v6085_v63  ;;  %472 = vmatmul.bf16.gmra.mxu0 %v5425_v58  ;;  %5701 = vmatpush.bf16.msra.mxu2 %v5449_v26 }
  0xcc   : > { %2013 = vmatpush.bf16.msrb.mxu0 %v5449_v26 }
  0xcd   : > { %v5740_v6 = vpop.eup %5739  ;;  %v1109_v7 = vshrl.u32 %v1048_v3, 16  ;;  %v1112_v8 = vshll.u32 %v1048_v3, 16  ;;  %v631_v9 = vadd.f32 %v5738_v53, %v630_v4  ;;  %v534_v14 = vmul.f32 1.442695, %v501_v5 }
  0xce   : > { %v5742_v11 = vpop.eup %5741  ;;  %v6094_v13 = vadd.f32 1.0, %v5740_v6  ;;  %v4556_v32 = vrot.slane %v1048_v3, 9 }
  0xcf   : > { %v1111_v15 = vrot.slane %v1109_v7, 4  ;;  %v1114_v17 = vrot.slane %v1112_v8, 5  ;;  %v635_v18 = vsel %vm634_vm6, %v5738_v53, %v631_v9  ;;  %v642_v19 = vmul.f32 %v5742_v11, %v6079_v55 }
  0xd0   : > { %v640_v20 = vsel %vm637_vm7, %v639_v12, %v635_v18  ;;  %5743 = vrcp.f32 %v6094_v13  ;;  %v435_v21 = vpop.f32.mrf.mxu0  ;;  %vm647_vm13 = vweird.f32 %v5742_v11  ;;  %v664_v60 = vand.u32 2147483647, %v6094_v13 }
  0xd1   : > { %v1020_v22 = vmul.f32 %v640_v20, %v6052_v24  ;;  %v643_v23 = vsub.f32 1.0, %v642_v19  ;;  %5745 = vpow2.f32 %v534_v14  ;;  %v6102_v27 = vadd.f32 %v6041_v16, %v435_v21  ;;  %vm648_vm1 = vmor %vm646_vm15, %vm647_vm13 }
  0xd2   : > { %v1115_v28 = vor.u32 %v1114_v17, %v1111_v15  ;;  %vm660_vm3 = vweird.f32 %v6094_v13  ;;  %vm6140_vm4 = vcmp.eq.f32.partialorder %v664_v60, 8.507059e+37 }
  0xd3   : > { %v1049_v29 = vpack.c.bf16 %v1020_v22, %v1020_v22  ;;  %v5613_v30 = vpack.c.bf16 %v1020_v22, %v1019_v61  ;;  %v644_v31 = vmul.f32 %v5742_v11, %v643_v23  ;;  %v502_v24 = vsub.f32 0.0, %v6102_v27 }
  0xd4   : > { %v1116_v44 = vrot.slane %v1115_v28, 4  ;;  %v666_v61 = vand.u32 2147483648, %v6094_v13 }
  0xd5   : > { %5614 = vst [vmem:[#allocation2] sm:$0xff] %v5613_v30   ;;  %v1118_v35 = vshll.u32 %v1049_v29, 16  ;;  %v1122_v36 = vshrl.u32 %v1049_v29, 16  ;;  %v1483_v37 = vrot.slane %v1049_v29, 5  ;;  %v645_v38 = vadd.f32 %v5742_v11, %v644_v31 }
  0xd6   : > { %v5744_v39 = vpop.eup %5743  ;;  %v536_v42 = vmul.f32 1.442695, %v502_v24  ;;  %v667_v9 = vor.u32 1.1754944e-38, %v666_v61 }
  0xd7   : > { %v1120_v45 = vrot.slane %v1118_v35, 5  ;;  %v1484_v46 = vsel %vm6104_vm12, %v4556_v32, %v1483_v37  ;;  %v5746_v49 = vpop.eup %5745  ;;  %v1124_v50 = vrot.slane %v1122_v36, 4  ;;  %v649_v51 = vsel %vm648_vm1, %v5742_v11, %v645_v38  ;;  %v5448_v38 = vld [vmem:[%s7756_s3 + $0x30] sm:$0xff] }
  0xd8   : > { %1595 = vst [vmem:[#allocation2 + $0xe0] sm:$0xf] %v1484_v46  ;;  %v656_v52 = vmul.f32 %v5744_v39, %v6094_v13  ;;  %5747 = vpow2.f32 %v536_v42  ;;  %v438_v53 = vpop.f32.mrf.mxu0  ;;  %v654_v55 = vsel %vm6116_vm0, %v653_v47, %v649_v51  ;;  %v6129_v56 = vadd.f32 1.0, %v5746_v49  ;;  %v5427_v46 = vld [vmem:[%s6028_s14 + $0x60] sm:$0xff]  ;;  %2014 = vmatpush.bf16.msrb.mxu0 %v5448_v38  ;;  %5702 = vmatpush.bf16.msra.mxu2 %v5448_v38 }
  0xd9   : > { %v1121_v54 = vsel %vm6111_vm14, %v1116_v44, %v1120_v45  ;;  %v1021_v57 = vmul.f32 %v654_v55, %v6063_v33  ;;  %v6133_v59 = vadd.f32 %v6041_v16, %v438_v53  ;;  %v1125_v62 = vor.u32 %v1124_v50, %v1120_v45 }
  0xda   : > { %1421 = vst [vmem:[#allocation2 + $0x70] sm:$0xf] %v1121_v54  ;;  %v657_v58 = vsub.f32 1.0, %v656_v52  ;;  %5749 = vrcp.f32 %v6129_v56  ;;  %v1485_v3 = vrot.slane %v1483_v37, 4  ;;  %vm661_vm2 = vweird.f32 %v5744_v39 }
  0xdb   : > { %477 = vmatmul.bf16.gmra.mxu0 %v5426_v48  ;;  %v1050_v0 = vpack.c.bf16 %v1021_v57, %v1021_v57  ;;  %v503_v2 = vsub.f32 0.0, %v6133_v59  ;;  %v1126_v11 = vrot.slane %v1125_v62, 4  ;;  %vm662_vm5 = vmor %vm660_vm3, %vm661_vm2  ;;  %v678_v13 = vand.u32 2147483647, %v6129_v56 }
  0xdc   : > { %v658_v1 = vmul.f32 %v5744_v39, %v657_v58  ;;  %v680_v25 = vand.u32 2147483648, %v6129_v56  ;;  %vm674_vm6 = vweird.f32 %v6129_v56 }
  0xdd   : > { %v1128_v33 = vshll.u32 %v1050_v0, 16  ;;  %v1132_v5 = vshrl.u32 %v1050_v0, 16  ;;  %v1486_v6 = vrot.slane %v1050_v0, 5  ;;  %v538_v15 = vmul.f32 1.442695, %v503_v2  ;;  %v5447_v0 = vld [vmem:[%s7756_s3 + $0x28] sm:$0xff] }
  0xde   : > { %v5748_v4 = vpop.eup %5747  ;;  %v659_v7 = vadd.f32 %v5744_v39, %v658_v1  ;;  %vm6164_vm7 = vcmp.eq.f32.partialorder %v678_v13, 8.507059e+37  ;;  %2015 = vmatpush.bf16.msrb.mxu0 %v5447_v0  ;;  %5703 = vmatpush.bf16.msra.mxu2 %v5447_v0 }
  0xdf   : > { %v6144_v10 = vadd.f32 1.0, %v5748_v4  ;;  %v1130_v12 = vrot.slane %v1128_v33, 5  ;;  %v1487_v14 = vsel %vm6104_vm12, %v1485_v3, %v1486_v6  ;;  %v1134_v19 = vrot.slane %v1132_v5, 4 }
  0xe0   : > { %v440_v17 = vpop.f32.mrf.mxu0  ;;  %v5750_v18 = vpop.eup %5749  ;;  %1596 = vst [vmem:[#allocation2 + $0xe4] sm:$0xf] %v1487_v14  ;;  %v663_v20 = vsel %vm662_vm5, %v5744_v39, %v659_v7  ;;  %v1488_v41 = vrot.slane %v1486_v6, 4 }
  0xe1   : > { %5751 = vrcp.f32 %v6144_v10  ;;  %v1131_v21 = vsel %vm6111_vm14, %v1126_v11, %v1130_v12  ;;  %v668_v22 = vsel %vm6140_vm4, %v667_v9, %v663_v20  ;;  %v670_v23 = vmul.f32 %v5750_v18, %v6129_v56 }
  0xe2   : > { %1422 = vst [vmem:[#allocation2 + $0x74] sm:$0xf] %v1131_v21  ;;  %v1022_v28 = vmul.f32 %v668_v22, %v6070_v43  ;;  %5753 = vpow2.f32 %v538_v15  ;;  %v6162_v30 = vadd.f32 %v6041_v16, %v440_v17  ;;  %v1135_v31 = vor.u32 %v1134_v19, %v1130_v12 }
  0xe3   : > { %v671_v29 = vsub.f32 1.0, %v670_v23  ;;  %vm675_vm8 = vweird.f32 %v5750_v18  ;;  %v681_v43 = vor.u32 1.1754944e-38, %v680_v25  ;;  %v692_v49 = vand.u32 2147483647, %v6144_v10 }
  0xe4   : > { %v1051_v32 = vpack.c.bf16 %v1022_v28, %v1022_v28  ;;  %v5618_v24 = vpack.c.bf16 %v1022_v28, %v1021_v57  ;;  %v504_v37 = vsub.f32 0.0, %v6162_v30  ;;  %v1136_v52 = vrot.slane %v1135_v31, 4  ;;  %vm676_vm9 = vmor %vm674_vm6, %vm675_vm8 }
  0xe5   : > { %v672_v36 = vmul.f32 %v5750_v18, %v671_v29  ;;  %v694_v2 = vand.u32 2147483648, %v6144_v10  ;;  %vm688_vm11 = vweird.f32 %v6144_v10  ;;  %vm693_vm15 = vcmp.eq.f32.partialorder %v692_v49, 8.507059e+37  ;;  %v5445_v29 = vld [vmem:[%s7756_s3 + $0x18] sm:$0xff] }
  0xe6   : > { %5680 = vst [vmem:[#allocation2 + $0x8] sm:$0xff] %v5618_v24   ;;  %v1138_v42 = vshll.u32 %v1051_v32, 16  ;;  %v1142_v44 = vshrl.u32 %v1051_v32, 16  ;;  %v1489_v45 = vrot.slane %v1051_v32, 5  ;;  %v540_v50 = vmul.f32 1.442695, %v504_v37 }
  0xe7   : > { %v5752_v39 = vpop.eup %5751  ;;  %v673_v47 = vadd.f32 %v5750_v18, %v672_v36  ;;  %v695_v12 = vor.u32 1.1754944e-38, %v694_v2  ;;  %v5443_v2 = vld [vmem:[%s7756_s3 + $0x8] sm:$0xff] }
  0xe8   : > { %v684_v48 = vmul.f32 %v5752_v39, %v6144_v10  ;;  %v443_v51 = vpop.f32.mrf.mxu0  ;;  %v1140_v53 = vrot.slane %v1138_v42, 5  ;;  %v1144_v54 = vrot.slane %v1142_v44, 4  ;;  %v1490_v55 = vsel %vm6104_vm12, %v1488_v41, %v1489_v45  ;;  %v5754_v57 = vpop.eup %5753 }
  0xe9   : > { %1597 = vst [vmem:[#allocation2 + $0xe8] sm:$0xf] %v1490_v55  ;;  %v677_v58 = vsel %vm676_vm9, %v5750_v18, %v673_v47  ;;  %5755 = vpow2.f32 %v540_v50  ;;  %v6181_v61 = vadd.f32 %v6041_v16, %v443_v51  ;;  %v5450_v62 = vld [vmem:[#allocation2 + $0x70] sm:$0xff]  ;;  %v6191_v3 = vadd.f32 1.0, %v5754_v57 }
  0xea   : > { %v685_v60 = vsub.f32 1.0, %v684_v48  ;;  %v1141_v1 = vsel %vm6111_vm14, %v1136_v52, %v1140_v53  ;;  %v682_v56 = vsel %vm6164_vm7, %v681_v43, %v677_v58  ;;  %vm689_vm10 = vweird.f32 %v5752_v39  ;;  %1832 = vmatmul.bf16.vlgmr.msra.gmra.mxu1 %v5450_v62  ;;  %v5444_v47 = vld [vmem:[%s7756_s3 + $0x10] sm:$0xff] }
  0xeb   : > { %482 = vmatmul.bf16.gmra.mxu0 %v5427_v46  ;;  %1423 = vst [vmem:[#allocation2 + $0x78] sm:$0xf] %v1141_v1  ;;  %v1023_v4 = vmul.f32 %v682_v56, %v6085_v63  ;;  %v505_v5 = vsub.f32 0.0, %v6181_v61  ;;  %5757 = vrcp.f32 %v6191_v3  ;;  %v1145_v6 = vor.u32 %v1144_v54, %v1140_v53  ;;  %vm690_vm13 = vmor %vm688_vm11, %vm689_vm10  ;;  %v5446_v63 = vld [vmem:[%s7756_s3 + $0x20] sm:$0xff] }
  0xec   : > { %v686_v33 = vmul.f32 %v5752_v39, %v685_v60  ;;  %v1491_v11 = vrot.slane %v1489_v45, 4  ;;  %2016 = vmatpush.bf16.msrb.mxu0 %v5446_v63  ;;  %5704 = vmatpush.bf16.msra.mxu2 %v5446_v63  ;;  %v708_v37 = vand.u32 2147483648, %v6191_v3  ;;  %vm702_vm1 = vweird.f32 %v6191_v3 }
  0xed   : > { %v1052_v7 = vpack.c.bf16 %v1023_v4, %v1023_v4  ;;  %v542_v9 = vmul.f32 1.442695, %v505_v5  ;;  %v1146_v21 = vrot.slane %v1145_v6, 4 }
  0xee   : > { %v687_v8 = vadd.f32 %v5752_v39, %v686_v33  ;;  %v709_v58 = vor.u32 1.1754944e-38, %v708_v37 }
  0xef   : > { %v5756_v14 = vpop.eup %5755  ;;  %v1148_v15 = vshll.u32 %v1052_v7, 16  ;;  %v1152_v17 = vshrl.u32 %v1052_v7, 16  ;;  %v1492_v18 = vrot.slane %v1052_v7, 5  ;;  %5759 = vpow2.f32 %v542_v9 }
  0xf0   : > { %v691_v10 = vsel %vm690_vm13, %v5752_v39, %v687_v8  ;;  %v445_v19 = vpop.f32.mrf.mxu0  ;;  %v6200_v13 = vadd.f32 1.0, %v5756_v14  ;;  %2017 = vmatpush.bf16.msrb.mxu0 %v5445_v29  ;;  %5705 = vmatpush.bf16.msra.mxu2 %v5445_v29  ;;  %v5428_v39 = vld [vmem:[%s6028_s14 + $0x68] sm:$0xff] }
  0xf1   : > { %v696_v20 = vsel %vm693_vm15, %v695_v12, %v691_v10  ;;  %v1150_v22 = vrot.slane %v1148_v15, 5  ;;  %v1154_v23 = vrot.slane %v1152_v17, 4  ;;  %v1493_v25 = vsel %vm6104_vm12, %v1491_v11, %v1492_v18  ;;  %v5758_v26 = vpop.eup %5757  ;;  %v5442_v15 = vld [vmem:[%s7756_s3] sm:$0xff] }
  0xf2   : > { %1598 = vst [vmem:[#allocation2 + $0xec] sm:$0xf] %v1493_v25  ;;  %v1024_v28 = vmul.f32 %v696_v20, %v6102_v27  ;;  %5761 = vrcp.f32 %v6200_v13  ;;  %v698_v32 = vmul.f32 %v5758_v26, %v6191_v3  ;;  %v706_v27 = vand.u32 2147483647, %v6191_v3 }
  0xf3   : > { %v1151_v31 = vsel %vm6111_vm14, %v1146_v21, %v1150_v22  ;;  %v1155_v24 = vor.u32 %v1154_v23, %v1150_v22  ;;  %v6215_v38 = vadd.f32 %v6041_v16, %v445_v19  ;;  %v1494_v42 = vrot.slane %v1492_v18, 4 }
  0xf4   : > { %1424 = vst [vmem:[#allocation2 + $0x7c] sm:$0xf] %v1151_v31  ;;  %v1053_v35 = vpack.c.bf16 %v1024_v28, %v1024_v28  ;;  %v5623_v36 = vpack.c.bf16 %v1024_v28, %v1023_v4  ;;  %v699_v43 = vsub.f32 1.0, %v698_v32  ;;  %vm703_vm0 = vweird.f32 %v5758_v26  ;;  %2018 = vmatpush.bf16.msrb.mxu0 %v5444_v47  ;;  %5706 = vmatpush.bf16.msra.mxu2 %v5444_v47 }
  0xf5   : > { %v5760_v41 = vpop.eup %5759  ;;  %v506_v50 = vsub.f32 0.0, %v6215_v38  ;;  %v1156_v53 = vrot.slane %v1155_v24, 4  ;;  %vm704_vm2 = vmor %vm702_vm1, %vm703_vm0  ;;  %v720_v1 = vand.u32 2147483647, %v6200_v13  ;;  %v722_v56 = vand.u32 2147483648, %v6200_v13 }
  0xf6   : > { %5681 = vst [vmem:[#allocation2 + $0x10] sm:$0xff] %v5623_v36   ;;  %v1158_v44 = vshll.u32 %v1053_v35, 16  ;;  %v1162_v45 = vshrl.u32 %v1053_v35, 16  ;;  %v1495_v46 = vrot.slane %v1053_v35, 5  ;;  %v700_v48 = vmul.f32 %v5758_v26, %v699_v43 }
  0xf7   : > { %v6221_v49 = vadd.f32 1.0, %v5760_v41  ;;  %vm707_vm3 = vcmp.eq.f32.partialorder %v706_v27, 8.507059e+37  ;;  %v544_v33 = vmul.f32 1.442695, %v506_v50  ;;  %vm716_vm4 = vweird.f32 %v6200_v13  ;;  %v5429_v50 = vld [vmem:[%s6028_s14 + $0x70] sm:$0xff] }
  0xf8   : > { %v448_v51 = vpop.f32.mrf.mxu0  ;;  %v5762_v52 = vpop.eup %5761  ;;  %v1160_v54 = vrot.slane %v1158_v44, 5  ;;  %v1496_v55 = vsel %vm6104_vm12, %v1494_v42, %v1495_v46  ;;  %v701_v57 = vadd.f32 %v5758_v26, %v700_v48  ;;  %v1164_v0 = vrot.slane %v1162_v45, 4  ;;  %2019 = vmatpush.bf16.msrb.mxu0 %v5443_v2  ;;  %5707 = vmatpush.bf16.msra.mxu2 %v5443_v2 }
  0xf9   : > { %1599 = vst [vmem:[#allocation2 + $0xf0] sm:$0xf] %v1496_v55  ;;  %v712_v60 = vmul.f32 %v5762_v52, %v6200_v13  ;;  %5763 = vrcp.f32 %v6221_v49  ;;  %v6239_v6 = vadd.f32 %v6041_v16, %v448_v51  ;;  %vm717_vm5 = vweird.f32 %v5762_v52 }
  0xfa   : > { %v1161_v62 = vsel %vm6111_vm14, %v1156_v53, %v1160_v54  ;;  %v705_v3 = vsel %vm704_vm2, %v5758_v26, %v701_v57  ;;  %5765 = vpow2.f32 %v544_v33  ;;  %v1165_v11 = vor.u32 %v1164_v0, %v1160_v54  ;;  %vm718_vm7 = vmor %vm716_vm4, %vm717_vm5 }
  0xfb   : > { %487 = vmatmul.bf16.gmra.mxu0 %v5428_v39  ;;  %1425 = vst [vmem:[#allocation2 + $0x80] sm:$0xf] %v1161_v62  ;;  %v713_v4 = vsub.f32 1.0, %v712_v60  ;;  %v710_v5 = vsel %vm707_vm3, %v709_v58, %v705_v3  ;;  %v5451_v7 = vld [vmem:[#allocation2 + $0x78] sm:$0xff]  ;;  %vm6242_vm6 = vcmp.eq.f32.partialorder %v720_v1, 8.507059e+37  ;;  %v723_v63 = vor.u32 1.1754944e-38, %v722_v56 }
  0xfc   : > { %v1025_v8 = vmul.f32 %v710_v5, %v6133_v59  ;;  %v507_v14 = vsub.f32 0.0, %v6239_v6  ;;  %1837 = vmatmul.bf16.gmra.mxu1 %v5451_v7  ;;  %v1497_v18 = vrot.slane %v1495_v46, 4  ;;  %v734_v19 = vand.u32 2147483647, %v6221_v49  ;;  %2020 = vmatpush.bf16.msrb.mxu0 %v5442_v15 }
  0xfd   : > { %v714_v9 = vmul.f32 %v5762_v52, %v713_v4  ;;  %v736_v22 = vand.u32 2147483648, %v6221_v49  ;;  %5708 = vmatpush.bf16.msra.mxu2 %v5442_v15  ;;  %v1166_v32 = vrot.slane %v1165_v11, 4  ;;  %vm730_vm9 = vweird.f32 %v6221_v49 }
  0xfe   : > { %v1054_v10 = vpack.c.bf16 %v1025_v8, %v1025_v8  ;;  %v546_v23 = vmul.f32 1.442695, %v507_v14  ;;  %vm735_vm11 = vcmp.eq.f32.partialorder %v734_v19, 8.507059e+37 }
  0xff   : > { %v5764_v17 = vpop.eup %5763  ;;  %v715_v59 = vadd.f32 %v5762_v52, %v714_v9 }
 0x100   : > { %v450_v20 = vpop.f32.mrf.mxu0  ;;  %v726_v21 = vmul.f32 %v5764_v17, %v6221_v49  ;;  %v1168_v26 = vshll.u32 %v1054_v10, 16  ;;  %v1172_v28 = vshrl.u32 %v1054_v10, 16  ;;  %v1498_v29 = vrot.slane %v1054_v10, 5  ;;  %v5766_v35 = vpop.eup %5765 }
 0x101   : > { %v6256_v25 = vadd.f32 %v6041_v16, %v450_v20  ;;  %v719_v31 = vsel %vm718_vm7, %v5762_v52, %v715_v59  ;;  %5767 = vpow2.f32 %v546_v23  ;;  %vm731_vm8 = vweird.f32 %v5764_v17 }
 0x102   : > { %v724_v24 = vsel %vm6242_vm6, %v723_v63, %v719_v31  ;;  %v727_v13 = vsub.f32 1.0, %v726_v21  ;;  %v1170_v36 = vrot.slane %v1168_v26, 5  ;;  %v1174_v43 = vrot.slane %v1172_v28, 4  ;;  %vm732_vm10 = vmor %vm730_vm9, %vm731_vm8 }
 0x103   : > { %v1499_v27 = vsel %vm6104_vm12, %v1497_v18, %v1498_v29  ;;  %v508_v37 = vsub.f32 0.0, %v6256_v25  ;;  %v1026_v39 = vmul.f32 %v724_v24, %v6162_v30  ;;  %v6264_v42 = vadd.f32 1.0, %v5766_v35 }
 0x104   : > { %1600 = vst [vmem:[#allocation2 + $0xf4] sm:$0xf] %v1499_v27  ;;  %v728_v41 = vmul.f32 %v5764_v17, %v727_v13  ;;  %v1171_v44 = vsel %vm6111_vm14, %v1166_v32, %v1170_v36  ;;  %v1175_v45 = vor.u32 %v1174_v43, %v1170_v36  ;;  %v1500_v51 = vrot.slane %v1498_v29, 4 }
 0x105   : > { %1426 = vst [vmem:[#allocation2 + $0x84] sm:$0xf] %v1171_v44  ;;  %v1055_v46 = vpack.c.bf16 %v1026_v39, %v1026_v39  ;;  %v5628_v47 = vpack.c.bf16 %v1026_v39, %v1025_v8  ;;  %5769 = vrcp.f32 %v6264_v42  ;;  %v737_v30 = vor.u32 1.1754944e-38, %v736_v22 }
 0x106   : > { %v729_v48 = vadd.f32 %v5764_v17, %v728_v41  ;;  %v548_v52 = vmul.f32 1.442695, %v508_v37  ;;  %v1176_v0 = vrot.slane %v1175_v45, 4  ;;  %v748_v11 = vand.u32 2147483647, %v6264_v42 }
 0x107   : > { %v5768_v54 = vpop.eup %5767  ;;  %5682 = vst [vmem:[#allocation2 + $0x18] sm:$0xff] %v5628_v47   ;;  %v1178_v55 = vshll.u32 %v1055_v46, 16  ;;  %v1182_v57 = vshrl.u32 %v1055_v46, 16  ;;  %v1501_v58 = vrot.slane %v1055_v46, 5  ;;  %vm744_vm13 = vweird.f32 %v6264_v42 }
 0x108   : > { %v453_v53 = vpop.f32.mrf.mxu0  ;;  %v733_v60 = vsel %vm732_vm10, %v5764_v17, %v729_v48  ;;  %v6271_v62 = vadd.f32 1.0, %v5768_v54  ;;  %v750_v18 = vand.u32 2147483648, %v6264_v42  ;;  %vm6299_vm0 = vcmp.eq.f32.partialorder %v748_v11, 8.507059e+37 }
 0x109   : > { %v738_v49 = vsel %vm735_vm11, %v737_v30, %v733_v60  ;;  %v1180_v1 = vrot.slane %v1178_v55, 5  ;;  %v1184_v56 = vrot.slane %v1182_v57, 4  ;;  %v1502_v2 = vsel %vm6104_vm12, %v1500_v51, %v1501_v58 }
 0x10a   : > { %1601 = vst [vmem:[#allocation2 + $0xf8] sm:$0xf] %v1502_v2  ;;  %v6276_v3 = vmul.f32 %v738_v49, %v6181_v61  ;;  %5771 = vrcp.f32 %v6271_v62  ;;  %v6286_v61 = vadd.f32 %v6041_v16, %v453_v53  ;;  %v1503_v12 = vrot.slane %v1501_v58, 4 }
 0x10b   : > { %492 = vmatmul.bf16.gmra.mxu0 %v5429_v50  ;;  %v5770_v4 = vpop.eup %5769  ;;  %v1181_v33 = vsel %vm6111_vm14, %v1176_v0, %v1180_v1  ;;  %5773 = vpow2.f32 %v548_v52  ;;  %v1185_v5 = vor.u32 %v1184_v56, %v1180_v1  ;;  %v751_v43 = vor.u32 1.1754944e-38, %v750_v18 }
 0x10c   : > { %1427 = vst [vmem:[#allocation2 + $0x88] sm:$0xf] %v1181_v33  ;;  %v1056_v7 = vpack.c.bf16 %v6276_v3, %v6276_v3  ;;  %v740_v8 = vmul.f32 %v5770_v4, %v6264_v42  ;;  %v5452_v9 = vld [vmem:[#allocation2 + $0x80] sm:$0xff]  ;;  %v509_v10 = vsub.f32 0.0, %v6286_v61  ;;  %vm745_vm15 = vweird.f32 %v5770_v4 }
 0x10d   : > { %1842 = vmatmul.bf16.gmra.mxu1 %v5452_v9  ;;  %v1186_v20 = vrot.slane %v1185_v5, 4  ;;  %vm746_vm1 = vmor %vm744_vm13, %vm745_vm15  ;;  %v762_v39 = vand.u32 2147483647, %v6271_v62  ;;  %v764_v41 = vand.u32 2147483648, %v6271_v62  ;;  %vm758_vm3 = vweird.f32 %v6271_v62  ;;  %v5430_v42 = vld [vmem:[#allocation2] sm:$0xff] }
 0x10e   : > { %v1188_v63 = vshll.u32 %v1056_v7, 16  ;;  %v1504_v14 = vrot.slane %v1056_v7, 5  ;;  %v741_v15 = vsub.f32 1.0, %v740_v8  ;;  %v1192_v22 = vshrl.u32 %v1056_v7, 16 }
 0x10f   : > { %v550_v31 = vmul.f32 1.442695, %v509_v10  ;;  %vm763_vm5 = vcmp.eq.f32.partialorder %v762_v39, 8.507059e+37  ;;  %v765_v52 = vor.u32 1.1754944e-38, %v764_v41 }
 0x110   : > { %v455_v17 = vpop.f32.mrf.mxu0  ;;  %v5772_v19 = vpop.eup %5771  ;;  %v1190_v21 = vrot.slane %v1188_v63, 5  ;;  %v1505_v23 = vsel %vm6104_vm12, %v1503_v12, %v1504_v14  ;;  %v742_v28 = vmul.f32 %v5770_v4, %v741_v15  ;;  %v1194_v37 = vrot.slane %v1192_v22, 4 }
 0x111   : > { %v6292_v59 = vadd.f32 %v6041_v16, %v455_v17  ;;  %v5774_v26 = vpop.eup %5773  ;;  %1602 = vst [vmem:[#allocation2 + $0xfc] sm:$0xf] %v1505_v23  ;;  %v754_v29 = vmul.f32 %v5772_v19, %v6271_v62  ;;  %5775 = vpow2.f32 %v550_v31  ;;  %vm759_vm2 = vweird.f32 %v5772_v19 }
 0x112   : > { %v1191_v32 = vsel %vm6111_vm14, %v1186_v20, %v1190_v21  ;;  %v6303_v13 = vadd.f32 1.0, %v5774_v26  ;;  %v743_v36 = vadd.f32 %v5770_v4, %v742_v28  ;;  %v1195_v30 = vor.u32 %v1194_v37, %v1190_v21  ;;  %vm760_vm4 = vmor %vm758_vm3, %vm759_vm2 }
 0x113   : > { %v510_v35 = vsub.f32 0.0, %v6292_v59  ;;  %1428 = vst [vmem:[#allocation2 + $0x8c] sm:$0xf] %v1191_v32  ;;  %v755_v27 = vsub.f32 1.0, %v754_v29 }
 0x114   : > { %5777 = vrcp.f32 %v6303_v13  ;;  %v747_v44 = vsel %vm746_vm1, %v5770_v4, %v743_v36  ;;  %v776_v12 = vand.u32 2147483647, %v6303_v13  ;;  %v778_v63 = vand.u32 2147483648, %v6303_v13 }
 0x115   : > { %v756_v45 = vmul.f32 %v5772_v19, %v755_v27  ;;  %v552_v46 = vmul.f32 1.442695, %v510_v35  ;;  %v752_v47 = vsel %vm6299_vm0, %v751_v43, %v747_v44  ;;  %vm772_vm7 = vweird.f32 %v6303_v13  ;;  %v5509_v43 = vld [vmem:[%s7756_s3 + $0xf8] sm:$0xff]  ;;  %v6362_v44 = vld [vmem:[%s7755_s2] ss:$0 sm:$0xff] }
 0x116   : > { %v1028_v50 = vmul.f32 %v752_v47, %v6215_v38  ;;  %v1506_v38 = vrot.slane %v1504_v14, 4  ;;  %vm777_vm8 = vcmp.eq.f32.partialorder %v776_v12, 8.507059e+37  ;;  %v779_v39 = vor.u32 1.1754944e-38, %v778_v63  ;;  %2497 = vmatpush.bf16.msrb.mxu1 %v5509_v43 }
 0x117   : > { %v757_v51 = vadd.f32 %v5772_v19, %v756_v45  ;;  %5779 = vpow2.f32 %v552_v46  ;;  %v5776_v53 = vpop.eup %5775 }
 0x118   : > { %v458_v48 = vpop.f32.mrf.mxu0  ;;  %v1057_v54 = vpack.c.bf16 %v1028_v50, %v1028_v50  ;;  %v5633_v55 = vpack.c.bf16 %v1028_v50, %v6276_v3  ;;  %v6321_v62 = vadd.f32 1.0, %v5776_v53  ;;  %v1196_v3 = vrot.slane %v1195_v30, 4 }
 0x119   : > { %v761_v57 = vsel %vm760_vm4, %v5772_v19, %v757_v51  ;;  %v6317_v58 = vadd.f32 %v6041_v16, %v458_v48 }
 0x11a   : > { %v6319_v60 = vpop.eup %5777  ;;  %v766_v49 = vsel %vm763_vm5, %v765_v52, %v761_v57  ;;  %v5453_v0 = vld [vmem:[#allocation2 + $0x88] sm:$0xff]  ;;  %5683 = vst [vmem:[#allocation2 + $0x20] sm:$0xff] %v5633_v55   ;;  %v1198_v1 = vshll.u32 %v1057_v54, 16  ;;  %v1202_v56 = vshrl.u32 %v1057_v54, 16  ;;  %v1507_v2 = vrot.slane %v1057_v54, 5  ;;  %v5508_v55 = vld [vmem:[%s7756_s3 + $0xf0] sm:$0xff] }
 0x11b   : > { %2021 = vmatmul.bf16.vlgmr.msrb.gmra.mxu0 %v5430_v42  ;;  %v6324_v4 = vmul.f32 %v766_v49, %v6239_v6  ;;  %v768_v16 = vmul.f32 %v6319_v60, %v6303_v13  ;;  %5781 = vrcp.f32 %v6321_v62  ;;  %v511_v9 = vsub.f32 0.0, %v6317_v58  ;;  %v5431_v54 = vld [vmem:[#allocation2 + $0x8] sm:$0xff]  ;;  %2498 = vmatpush.bf16.msrb.mxu1 %v5508_v55  ;;  %v5432_v55 = vld [vmem:[#allocation2 + $0x10] sm:$0xff] }
 0x11c   : > { %v1200_v5 = vrot.slane %v1198_v1, 5  ;;  %v1204_v7 = vrot.slane %v1202_v56, 4  ;;  %v1508_v8 = vsel %vm6104_vm12, %v1506_v38, %v1507_v2  ;;  %v1509_v18 = vrot.slane %v1507_v2, 4 }
 0x11d   : > { %v5780_v33 = vpop.eup %5779  ;;  %1603 = vst [vmem:[#allocation2 + $0x100] sm:$0xf] %v1508_v8  ;;  %v1058_v11 = vpack.c.bf16 %v6324_v4, %v6324_v4  ;;  %v769_v6 = vsub.f32 1.0, %v768_v16  ;;  %1847 = vmatmul.bf16.gmra.mxu1 %v5453_v0  ;;  %vm773_vm6 = vweird.f32 %v6319_v60  ;;  %v790_v23 = vand.u32 2147483647, %v6321_v62 }
 0x11e   : > { %v1201_v15 = vsel %vm6111_vm14, %v1196_v3, %v1200_v5  ;;  %v1205_v17 = vor.u32 %v1204_v7, %v1200_v5  ;;  %v6338_v10 = vadd.f32 1.0, %v5780_v33  ;;  %v554_v26 = vmul.f32 1.442695, %v511_v9  ;;  %vm774_vm9 = vmor %vm772_vm7, %vm773_vm6  ;;  %v5507_v9 = vld [vmem:[%s7756_s3 + $0xe8] sm:$0xff] }
 0x11f   : > { %1429 = vst [vmem:[#allocation2 + $0x90] sm:$0xf] %v1201_v15  ;;  %v1208_v19 = vshll.u32 %v1058_v11, 16  ;;  %v1212_v20 = vshrl.u32 %v1058_v11, 16  ;;  %v1510_v21 = vrot.slane %v1058_v11, 5  ;;  %v770_v22 = vmul.f32 %v6319_v60, %v769_v6  ;;  %2499 = vmatpush.bf16.msrb.mxu1 %v5507_v9 }
 0x120   : > { %v460_v14 = vpop.f32.mrf.mxu0  ;;  %5783 = vrcp.f32 %v6338_v10  ;;  %v1206_v29 = vrot.slane %v1205_v17, 4  ;;  %v792_v24 = vand.u32 2147483648, %v6321_v62  ;;  %vm786_vm10 = vweird.f32 %v6321_v62 }
 0x121   : > { %v5782_v28 = vpop.eup %5781  ;;  %v1210_v31 = vrot.slane %v1208_v19, 5  ;;  %v1511_v32 = vsel %vm6104_vm12, %v1509_v18, %v1510_v21  ;;  %v771_v35 = vadd.f32 %v6319_v60, %v770_v22  ;;  %v1214_v37 = vrot.slane %v1212_v20, 4 }
 0x122   : > { %1604 = vst [vmem:[#allocation2 + $0x104] sm:$0xf] %v1511_v32  ;;  %v782_v36 = vmul.f32 %v5782_v28, %v6321_v62  ;;  %5785 = vpow2.f32 %v554_v26  ;;  %v6365_v45 = vadd.f32 %v6362_v44, %v460_v14  ;;  %vm787_vm11 = vweird.f32 %v5782_v28 }
 0x123   : > { %v1211_v27 = vsel %vm6111_vm14, %v1206_v29, %v1210_v31  ;;  %v775_v13 = vsel %vm774_vm9, %v6319_v60, %v771_v35  ;;  %vm6367_vm13 = vcmp.eq.f32.partialorder %v790_v23, 8.507059e+37  ;;  %v793_v48 = vor.u32 1.1754944e-38, %v792_v24  ;;  %vm788_vm15 = vmor %vm786_vm10, %vm787_vm11 }
 0x124   : > { %1430 = vst [vmem:[#allocation2 + $0x94] sm:$0xf] %v1211_v27  ;;  %v783_v41 = vsub.f32 1.0, %v782_v36  ;;  %v780_v46 = vsel %vm777_vm8, %v779_v39, %v775_v13  ;;  %v512_v52 = vsub.f32 0.0, %v6365_v45  ;;  %v1215_v57 = vor.u32 %v1214_v37, %v1210_v31  ;;  %v5506_v39 = vld [vmem:[%s7756_s3 + $0xe0] sm:$0xff] }
 0x125   : > { %v1030_v42 = vmul.f32 %v780_v46, %v6256_v25  ;;  %v1512_v60 = vrot.slane %v1510_v21, 4  ;;  %v804_v49 = vand.u32 2147483647, %v6338_v10  ;;  %v806_v3 = vand.u32 2147483648, %v6338_v10  ;;  %2500 = vmatpush.bf16.msrb.mxu1 %v5506_v39 }
 0x126   : > { %v5784_v51 = vpop.eup %5783  ;;  %v784_v30 = vmul.f32 %v5782_v28, %v783_v41  ;;  %v556_v56 = vmul.f32 1.442695, %v512_v52  ;;  %v1216_v63 = vrot.slane %v1215_v57, 4  ;;  %vm800_vm1 = vweird.f32 %v6338_v10 }
 0x127   : > { %v796_v38 = vmul.f32 %v5784_v51, %v6338_v10  ;;  %v1059_v0 = vpack.c.bf16 %v1030_v42, %v1030_v42  ;;  %v5638_v25 = vpack.c.bf16 %v1030_v42, %v6324_v4  ;;  %vm801_vm0 = vweird.f32 %v5784_v51 }
 0x128   : > { %v463_v50 = vpop.f32.mrf.mxu0  ;;  %v785_v1 = vadd.f32 %v5782_v28, %v784_v30  ;;  %v5786_v33 = vpop.eup %5785  ;;  %5787 = vpow2.f32 %v556_v56  ;;  %vm802_vm2 = vmor %vm800_vm1, %vm801_vm0  ;;  %vm805_vm3 = vcmp.eq.f32.partialorder %v804_v49, 8.507059e+37  ;;  %v807_v22 = vor.u32 1.1754944e-38, %v806_v3  ;;  %v5569_v56 = vld [vmem:[%s7756_s3 + $0x1b8] sm:$0xff] }
 0x129   : > { %v6374_v53 = vadd.f32 %v6362_v44, %v463_v50  ;;  %v797_v2 = vsub.f32 1.0, %v796_v38  ;;  %5684 = vst [vmem:[#allocation2 + $0x28] sm:$0xff] %v5638_v25   ;;  %v1218_v5 = vshll.u32 %v1059_v0, 16  ;;  %v1222_v7 = vshrl.u32 %v1059_v0, 16  ;;  %3259 = vmatpush.bf16.msra.mxu0 %v5569_v56 }
 0x12a   : > { %v1513_v8 = vrot.slane %v1059_v0, 5  ;;  %v789_v4 = vsel %vm788_vm15, %v5782_v28, %v785_v1  ;;  %v6392_v6 = vadd.f32 1.0, %v5786_v33 }
 0x12b   : > { %2026 = vmatmul.bf16.gmra.mxu0 %v5431_v54  ;;  %v513_v16 = vsub.f32 0.0, %v6374_v53  ;;  %v794_v62 = vsel %vm6367_vm13, %v793_v48, %v789_v4  ;;  %v798_v11 = vmul.f32 %v5784_v51, %v797_v2  ;;  %v5454_v12 = vld [vmem:[#allocation2 + $0x90] sm:$0xff]  ;;  %v1220_v14 = vrot.slane %v1218_v5, 5 }
 0x12c   : > { %v1224_v15 = vrot.slane %v1222_v7, 4  ;;  %v1514_v17 = vsel %vm6104_vm12, %v1512_v60, %v1513_v8  ;;  %v1031_v18 = vmul.f32 %v794_v62, %v6286_v61  ;;  %5789 = vrcp.f32 %v6392_v6  ;;  %v5505_v7 = vld [vmem:[%s7756_s3 + $0xd8] sm:$0xff] }
 0x12d   : > { %1605 = vst [vmem:[#allocation2 + $0x108] sm:$0xf] %v1514_v17  ;;  %v799_v19 = vadd.f32 %v5784_v51, %v798_v11  ;;  %1852 = vmatmul.bf16.gmra.mxu1 %v5454_v12  ;;  %v1221_v21 = vsel %vm6111_vm14, %v1216_v63, %v1220_v14  ;;  %v558_v29 = vmul.f32 1.442695, %v513_v16  ;;  %v1515_v61 = vrot.slane %v1513_v8, 4  ;;  %v5568_v12 = vld [vmem:[%s7756_s3 + $0x1b0] sm:$0xff] }
 0x12e   : > { %v1225_v23 = vor.u32 %v1224_v15, %v1220_v14  ;;  %1431 = vst [vmem:[#allocation2 + $0x98] sm:$0xf] %v1221_v21  ;;  %v1060_v26 = vpack.c.bf16 %v1031_v18, %v1031_v18  ;;  %v5788_v32 = vpop.eup %5787  ;;  %v818_v25 = vand.u32 2147483647, %v6392_v6  ;;  %v820_v5 = vand.u32 2147483648, %v6392_v6  ;;  %2501 = vmatpush.bf16.msrb.mxu1 %v5505_v7  ;;  %v5504_v63 = vld [vmem:[%s7756_s3 + $0xd0] sm:$0xff]  ;;  %3260 = vmatpush.bf16.msra.mxu0 %v5568_v12 }
 0x12f   : > { %v803_v28 = vsel %vm802_vm2, %v5784_v51, %v799_v19  ;;  %v6406_v37 = vadd.f32 1.0, %v5788_v32  ;;  %5791 = vpow2.f32 %v558_v29  ;;  %vm814_vm5 = vweird.f32 %v6392_v6  ;;  %v5503_v32 = vld [vmem:[%s7756_s3 + $0xc8] sm:$0xff]  ;;  %v5565_v7 = vld [vmem:[%s7756_s3 + $0x198] sm:$0xff] }
 0x130   : > { %v465_v20 = vpop.f32.mrf.mxu0  ;;  %v808_v31 = vsel %vm805_vm3, %v807_v22, %v803_v28  ;;  %v1228_v24 = vshll.u32 %v1060_v26, 16  ;;  %v1232_v35 = vshrl.u32 %v1060_v26, 16  ;;  %v1516_v36 = vrot.slane %v1060_v26, 5  ;;  %v5435_v27 = vld [vmem:[#allocation2 + $0x28] sm:$0xff] }
 0x131   : > { %v6403_v10 = vadd.f32 %v6362_v44, %v465_v20  ;;  %v1032_v43 = vmul.f32 %v808_v31, %v6292_v59  ;;  %v1226_v41 = vrot.slane %v1225_v23, 4  ;;  %2046 = vmatmul.bf16.vlgmr.msra.gmra.mxu2 %v5435_v27  ;;  %5793 = vrcp.f32 %v6406_v37  ;;  %v5567_v31 = vld [vmem:[%s7756_s3 + $0x1a8] sm:$0xff] }
 0x132   : > { %v6411_v13 = vpop.eup %5789  ;;  %v1230_v46 = vrot.slane %v1228_v24, 5  ;;  %v1234_v47 = vrot.slane %v1232_v35, 4  ;;  %v1517_v48 = vsel %vm6104_vm12, %v1515_v61, %v1516_v36  ;;  %v1518_v57 = vrot.slane %v1516_v36, 4  ;;  %2502 = vmatpush.bf16.msrb.mxu1 %v5504_v63  ;;  %3261 = vmatpush.bf16.msra.mxu0 %v5567_v31 }
 0x133   : > { %1606 = vst [vmem:[#allocation2 + $0x10c] sm:$0xf] %v1517_v48  ;;  %v6415_v50 = vpack.c.bf16 %v1032_v43, %v1032_v43  ;;  %v5643_v59 = vpack.c.bf16 %v1032_v43, %v1031_v18  ;;  %v810_v51 = vmul.f32 %v6411_v13, %v6392_v6  ;;  %v514_v52 = vsub.f32 0.0, %v6403_v10 }
 0x134   : > { %v1231_v42 = vsel %vm6111_vm14, %v1226_v41, %v1230_v46  ;;  %v1235_v30 = vor.u32 %v1234_v47, %v1230_v46  ;;  %vm815_vm4 = vweird.f32 %v6411_v13  ;;  %vm819_vm7 = vcmp.eq.f32.partialorder %v818_v25, 8.507059e+37 }
 0x135   : > { %1432 = vst [vmem:[#allocation2 + $0x9c] sm:$0xf] %v1231_v42  ;;  %v1238_v60 = vshll.u32 %v6415_v50, 16  ;;  %v1519_v38 = vrot.slane %v6415_v50, 5  ;;  %v811_v49 = vsub.f32 1.0, %v810_v51  ;;  %v1242_v0 = vshrl.u32 %v6415_v50, 16  ;;  %v5792_v2 = vpop.eup %5791  ;;  %vm816_vm6 = vmor %vm814_vm5, %vm815_vm4 }
 0x136   : > { %5685 = vst [vmem:[#allocation2 + $0x30] sm:$0xff] %v5643_v59   ;;  %v1236_v3 = vrot.slane %v1235_v30, 4  ;;  %v6443_v4 = vadd.f32 1.0, %v5792_v2  ;;  %v560_v62 = vmul.f32 1.442695, %v514_v52  ;;  %v821_v18 = vor.u32 1.1754944e-38, %v820_v5  ;;  %2503 = vmatpush.bf16.msrb.mxu1 %v5503_v32 }
 0x137   : > { %v6433_v16 = vrot.slane %v1238_v60, 5  ;;  %v1520_v33 = vsel %vm6104_vm12, %v1518_v57, %v1519_v38  ;;  %v812_v8 = vmul.f32 %v6411_v13, %v811_v49  ;;  %v6455_v14 = vpop.eup %5793  ;;  %v1244_v15 = vrot.slane %v1242_v0, 4  ;;  %v5566_v51 = vld [vmem:[%s7756_s3 + $0x1a0] sm:$0xff]  ;;  %v5433_v5 = vld [vmem:[#allocation2 + $0x18] sm:$0xff] }
 0x138   : > { %v468_v54 = vpop.f32.mrf.mxu0  ;;  %1607 = vst [vmem:[#allocation2 + $0x110] sm:$0xf] %v1520_v33  ;;  %5795 = vrcp.f32 %v6443_v4  ;;  %v824_v19 = vmul.f32 %v6455_v14, %v6406_v37  ;;  %v832_v20 = vand.u32 2147483647, %v6406_v37  ;;  %v834_v22 = vand.u32 2147483648, %v6406_v37  ;;  %v5502_v42 = vld [vmem:[%s7756_s3 + $0xc0] sm:$0xff]  ;;  %3262 = vmatpush.bf16.msra.mxu0 %v5566_v51 }
 0x139   : > { %v6428_v1 = vadd.f32 %v6362_v44, %v468_v54  ;;  %v1241_v9 = vsel %vm6111_vm14, %v1236_v3, %v6433_v16  ;;  %v813_v17 = vadd.f32 %v6411_v13, %v812_v8  ;;  %5797 = vpow2.f32 %v560_v62 }
 0x13a   : > { %1433 = vst [vmem:[#allocation2 + $0xa0] sm:$0xf] %v1241_v9  ;;  %v825_v29 = vsub.f32 1.0, %v824_v19  ;;  %v1245_v24 = vor.u32 %v1244_v15, %v6433_v16  ;;  %vm828_vm8 = vweird.f32 %v6406_v37  ;;  %vm829_vm9 = vweird.f32 %v6455_v14  ;;  %2504 = vmatpush.bf16.msrb.mxu1 %v5502_v42 }
 0x13b   : > { %2031 = vmatmul.bf16.gmra.mxu0 %v5432_v55  ;;  %v515_v11 = vsub.f32 0.0, %v6428_v1  ;;  %v817_v21 = vsel %vm816_vm6, %v6411_v13, %v813_v17  ;;  %v1521_v13 = vrot.slane %v1519_v38, 4  ;;  %vm6488_vm10 = vcmp.eq.f32.partialorder %v832_v20, 8.507059e+37  ;;  %vm830_vm11 = vmor %vm828_vm8, %vm829_vm9 }
 0x13c   : > { %v5455_v26 = vld [vmem:[#allocation2 + $0x98] sm:$0xff]  ;;  %v822_v28 = vsel %vm819_vm7, %v821_v18, %v817_v21  ;;  %v826_v43 = vmul.f32 %v6455_v14, %v825_v29  ;;  %v835_v46 = vor.u32 1.1754944e-38, %v834_v22  ;;  %v846_v50 = vand.u32 2147483647, %v6443_v4  ;;  %3263 = vmatpush.bf16.msra.mxu0 %v5565_v7 }
 0x13d   : > { %v562_v23 = vmul.f32 1.442695, %v515_v11  ;;  %v6478_v35 = vmul.f32 %v822_v28, %v6317_v58  ;;  %1857 = vmatmul.bf16.gmra.mxu1 %v5455_v26  ;;  %v5436_v36 = vld [vmem:[#allocation2 + $0x30] sm:$0xff]  ;;  %v1246_v52 = vrot.slane %v1245_v24, 4  ;;  %v848_v3 = vand.u32 2147483648, %v6443_v4 }
 0x13e   : > { %v6484_v39 = vpop.eup %5795  ;;  %v827_v47 = vadd.f32 %v6455_v14, %v826_v43  ;;  %vm842_vm15 = vweird.f32 %v6443_v4  ;;  %vm847_vm1 = vcmp.eq.f32.partialorder %v846_v50, 8.507059e+37 }
 0x13f   : > { %5799 = vpow2.f32 %v562_v23  ;;  %v1062_v41 = vpack.c.bf16 %v6478_v35, %v6478_v35  ;;  %v838_v48 = vmul.f32 %v6484_v39, %v6443_v4  ;;  %v5798_v30 = vpop.eup %5797  ;;  %vm843_vm13 = vweird.f32 %v6484_v39  ;;  %v5564_v4 = vld [vmem:[%s7756_s3 + $0x190] sm:$0xff] }
 0x140   : > { %v470_v6 = vpop.f32.mrf.mxu0  ;;  %v831_v60 = vsel %vm830_vm11, %v6455_v14, %v827_v47  ;;  %v6507_v49 = vadd.f32 1.0, %v5798_v30  ;;  %vm844_vm0 = vmor %vm842_vm15, %vm843_vm13  ;;  %v849_v15 = vor.u32 1.1754944e-38, %v848_v3  ;;  %3264 = vmatpush.bf16.msra.mxu0 %v5564_v4 }
 0x141   : > { %v6468_v61 = vadd.f32 %v6362_v44, %v470_v6  ;;  %v1248_v54 = vshll.u32 %v1062_v41, 16  ;;  %v1252_v55 = vshrl.u32 %v1062_v41, 16  ;;  %v1522_v57 = vrot.slane %v1062_v41, 5  ;;  %2051 = vmatmul.bf16.gmra.mxu2 %v5436_v36 }
 0x142   : > { %v839_v38 = vsub.f32 1.0, %v838_v48  ;;  %v836_v37 = vsel %vm6488_vm10, %v835_v46, %v831_v60  ;;  %v860_v6 = vand.u32 2147483647, %v6507_v49  ;;  %v862_v28 = vand.u32 2147483648, %v6507_v49 }
 0x143   : > { %v516_v27 = vsub.f32 0.0, %v6468_v61  ;;  %v1250_v25 = vrot.slane %v1248_v54, 5  ;;  %v1254_v56 = vrot.slane %v1252_v55, 4  ;;  %v1523_v2 = vsel %vm6104_vm12, %v1521_v13, %v1522_v57  ;;  %v5563_v13 = vld [vmem:[%s7756_s3 + $0x188] sm:$0xff] }
 0x144   : > { %1608 = vst [vmem:[#allocation2 + $0x114] sm:$0xf] %v1523_v2  ;;  %v840_v33 = vmul.f32 %v6484_v39, %v839_v38  ;;  %v1034_v9 = vmul.f32 %v836_v37, %v6365_v45  ;;  %v1524_v18 = vrot.slane %v1522_v57, 4  ;;  %vm856_vm2 = vweird.f32 %v6507_v49  ;;  %3265 = vmatpush.bf16.msra.mxu0 %v5563_v13 }
 0x145   : > { %v564_v59 = vmul.f32 1.442695, %v516_v27  ;;  %v5800_v0 = vpop.eup %5799  ;;  %v1251_v8 = vsel %vm6111_vm14, %v1246_v52, %v1250_v25  ;;  %v1255_v12 = vor.u32 %v1254_v56, %v1250_v25  ;;  %vm6566_vm3 = vcmp.eq.f32.partialorder %v860_v6, 8.507059e+37  ;;  %v5562_v25 = vld [vmem:[%s7756_s3 + $0x180] sm:$0xff] }
 0x146   : > { %1434 = vst [vmem:[#allocation2 + $0xa4] sm:$0xf] %v1251_v8  ;;  %v841_v62 = vadd.f32 %v6484_v39, %v840_v33  ;;  %v6525_v11 = vadd.f32 1.0, %v5800_v0  ;;  %v1063_v63 = vpack.c.bf16 %v1034_v9, %v1034_v9  ;;  %v5648_v14 = vpack.c.bf16 %v1034_v9, %v6478_v35 }
 0x147   : > { %5801 = vpow2.f32 %v564_v59  ;;  %v1256_v31 = vrot.slane %v1255_v12, 4  ;;  %v863_v52 = vor.u32 1.1754944e-38, %v862_v28 }
 0x148   : > { %v473_v16 = vpop.f32.mrf.mxu0  ;;  %5803 = vrcp.f32 %v6507_v49  ;;  %v845_v45 = vsel %vm844_vm0, %v6484_v39, %v841_v62  ;;  %5686 = vst [vmem:[#allocation2 + $0x38] sm:$0xff] %v5648_v14   ;;  %v1258_v19 = vshll.u32 %v1063_v63, 16  ;;  %v1262_v20 = vshrl.u32 %v1063_v63, 16  ;;  %3266 = vmatpush.bf16.msra.mxu0 %v5562_v25 }
 0x149   : > { %5805 = vrcp.f32 %v6525_v11  ;;  %v1525_v21 = vrot.slane %v1063_v63, 5  ;;  %v850_v22 = vsel %vm847_vm1, %v849_v15, %v845_v45  ;;  %v874_v27 = vand.u32 2147483647, %v6525_v11 }
 0x14a   : > { %v6538_v26 = vmul.f32 %v850_v22, %v6374_v53  ;;  %v1260_v32 = vrot.slane %v1258_v19, 5  ;;  %v1264_v24 = vrot.slane %v1262_v20, 4  ;;  %v6555_v39 = vadd.f32 %v6362_v44, %v473_v16 }
 0x14b   : > { %2036 = vmatmul.bf16.gmra.mxu0 %v5433_v5  ;;  %v1526_v35 = vsel %vm6104_vm12, %v1524_v18, %v1525_v21  ;;  %v876_v46 = vand.u32 2147483648, %v6525_v11  ;;  %v1527_v50 = vrot.slane %v1525_v21, 4  ;;  %vm870_vm4 = vweird.f32 %v6525_v11 }
 0x14c   : > { %1609 = vst [vmem:[#allocation2 + $0x118] sm:$0xf] %v1526_v35  ;;  %v6549_v53 = vpack.c.bf16 %v6538_v26, %v6538_v26  ;;  %v1261_v41 = vsel %vm6111_vm14, %v1256_v31, %v1260_v32  ;;  %v1265_v58 = vor.u32 %v1264_v24, %v1260_v32  ;;  %vm6582_vm6 = vcmp.eq.f32.partialorder %v874_v27, 8.507059e+37 }
 0x14d   : > { %v5802_v17 = vpop.eup %5801  ;;  %v5456_v47 = vld [vmem:[#allocation2 + $0xa0] sm:$0xff]  ;;  %1435 = vst [vmem:[#allocation2 + $0xa8] sm:$0xf] %v1261_v41  ;;  %v877_v37 = vor.u32 1.1754944e-38, %v876_v46  ;;  %v517_v33 = vsub.f32 0.0, %v6555_v39 }
 0x14e   : > { %v6535_v23 = vpop.eup %5803  ;;  %v6542_v29 = vadd.f32 1.0, %v5802_v17  ;;  %v1268_v59 = vshll.u32 %v6549_v53, 16  ;;  %v1528_v51 = vrot.slane %v6549_v53, 5  ;;  %1862 = vmatmul.bf16.gmra.mxu1 %v5456_v47  ;;  %v1266_v55 = vrot.slane %v1265_v58, 4  ;;  %v5434_v17 = vld [vmem:[#allocation2 + $0x20] sm:$0xff] }
 0x14f   : > { %v852_v43 = vmul.f32 %v6535_v23, %v6507_v49  ;;  %v5806_v48 = vpop.eup %5805  ;;  %v1272_v60 = vshrl.u32 %v6549_v53, 16  ;;  %v5437_v0 = vld [vmem:[#allocation2 + $0x38] sm:$0xff]  ;;  %vm857_vm5 = vweird.f32 %v6535_v23  ;;  %v566_v15 = vmul.f32 1.442695, %v517_v33 }
 0x150   : > { %v475_v36 = vpop.f32.mrf.mxu0  ;;  %5807 = vrcp.f32 %v6542_v29  ;;  %v866_v54 = vmul.f32 %v5806_v48, %v6525_v11  ;;  %v6572_v57 = vrot.slane %v1268_v59, 5  ;;  %v1529_v38 = vsel %vm6104_vm12, %v1527_v50, %v1528_v51  ;;  %vm858_vm9 = vmor %vm856_vm2, %vm857_vm5 }
 0x151   : > { %v853_v42 = vsub.f32 1.0, %v852_v43  ;;  %1610 = vst [vmem:[#allocation2 + $0x11c] sm:$0xf] %v1529_v38  ;;  %2056 = vmatmul.bf16.gmra.mxu2 %v5437_v0  ;;  %v6591_v5 = vadd.f32 %v6362_v44, %v475_v36  ;;  %vm871_vm7 = vweird.f32 %v5806_v48  ;;  %vm884_vm8 = vweird.f32 %v6542_v29 }
 0x152   : > { %v867_v2 = vsub.f32 1.0, %v866_v54  ;;  %v1271_v16 = vsel %vm6111_vm14, %v1266_v55, %v6572_v57  ;;  %v1274_v12 = vrot.slane %v1272_v60, 4  ;;  %v888_v14 = vand.u32 2147483647, %v6542_v29  ;;  %vm872_vm10 = vmor %vm870_vm4, %vm871_vm7  ;;  %v5490_v54 = vld [vmem:[#allocation2 + $0x8] sm:$0xff] }
 0x153   : > { %v854_v56 = vmul.f32 %v6535_v23, %v853_v42  ;;  %1436 = vst [vmem:[#allocation2 + $0xac] sm:$0xf] %v1271_v16  ;;  %v518_v4 = vsub.f32 0.0, %v6591_v5  ;;  %v890_v21 = vand.u32 2147483648, %v6542_v29  ;;  %5809 = vpow2.f32 %v566_v15 }
 0x154   : > { %v868_v9 = vmul.f32 %v5806_v48, %v867_v2  ;;  %v1275_v31 = vor.u32 %v1274_v12, %v6572_v57  ;;  %v1530_v11 = vrot.slane %v1528_v51, 4  ;;  %vm6625_vm13 = vcmp.eq.f32.partialorder %v888_v14, 8.507059e+37 }
 0x155   : > { %v855_v8 = vadd.f32 %v6535_v23, %v854_v56  ;;  %v568_v6 = vmul.f32 1.442695, %v518_v4  ;;  %v891_v51 = vor.u32 1.1754944e-38, %v890_v21  ;;  %v5550_v21 = vld [vmem:[#allocation2 + $0x10] sm:$0xff] }
 0x156   : > { %v6593_v7 = vpop.eup %5807  ;;  %v869_v45 = vadd.f32 %v5806_v48, %v868_v9  ;;  %v1276_v50 = vrot.slane %v1275_v31, 4 }
 0x157   : > { %v880_v63 = vmul.f32 %v6593_v7, %v6542_v29  ;;  %v859_v18 = vsel %vm858_vm9, %v6535_v23, %v855_v8  ;;  %vm885_vm11 = vweird.f32 %v6593_v7  ;;  %5811 = vpow2.f32 %v568_v6 }
 0x158   : > { %v478_v62 = vpop.f32.mrf.mxu0  ;;  %v864_v20 = vsel %vm6566_vm3, %v863_v52, %v859_v18  ;;  %v873_v23 = vsel %vm872_vm10, %v5806_v48, %v869_v45  ;;  %vm6633_vm15 = vmor %vm884_vm8, %vm885_vm11 }
 0x159   : > { %v6607_v19 = vadd.f32 %v6362_v44, %v478_v62  ;;  %v881_v49 = vsub.f32 1.0, %v880_v63  ;;  %v1036_v22 = vmul.f32 %v864_v20, %v6403_v10  ;;  %v878_v32 = vsel %vm6582_vm6, %v877_v37, %v873_v23  ;;  %v5810_v48 = vpop.eup %5809 }
 0x15a   : > { %v1037_v53 = vmul.f32 %v878_v32, %v6428_v1  ;;  %v5457_v13 = vld [vmem:[#allocation2 + $0xa8] sm:$0xff]  ;;  %v6647_v2 = vadd.f32 1.0, %v5810_v48 }
 0x15b   : > { %2041 = vmatmul.bf16.gmra.mxu0 %v5434_v17  ;;  %v519_v28 = vsub.f32 0.0, %v6607_v19  ;;  %v882_v24 = vmul.f32 %v6593_v7, %v881_v49  ;;  %v1065_v35 = vpack.c.bf16 %v1036_v22, %v1036_v22  ;;  %v5653_v36 = vpack.c.bf16 %v1036_v22, %v6538_v26  ;;  %1867 = vmatmul.bf16.vlgmr.msra.gmra.mxu3 %v5457_v13 }
 0x15c   : > { %v1066_v47 = vpack.c.bf16 %v1037_v53, %v1037_v53  ;;  %vm898_vm1 = vweird.f32 %v6647_v2 }
 0x15d   : > { %v883_v10 = vadd.f32 %v6593_v7, %v882_v24  ;;  %v570_v27 = vmul.f32 1.442695, %v519_v28  ;;  %5687 = vst [vmem:[#allocation2 + $0x40] sm:$0xff] %v5653_v36   ;;  %v1278_v41 = vshll.u32 %v1065_v35, 16  ;;  %v1282_v58 = vshrl.u32 %v1065_v35, 16  ;;  %v5812_v3 = vpop.eup %5811  ;;  %v5489_v28 = vld [vmem:[%s7756_s3 + $0xb8] sm:$0xff] }
 0x15e   : > { %v1531_v46 = vrot.slane %v1065_v35, 5  ;;  %v1288_v55 = vshll.u32 %v1066_v47, 16  ;;  %v1292_v57 = vshrl.u32 %v1066_v47, 16  ;;  %v1534_v60 = vrot.slane %v1066_v47, 5  ;;  %2505 = vmatmul.bf16.vlgmr.msrb.gmra.mxu1 %v5490_v54  ;;  %v5528_v35 = vld [vmem:[%s7756_s3 + $0x130] sm:$0xff]  ;;  %2243 = vmatpush.bf16.msrb.mxu3 %v5489_v28 }
 0x15f   : > { %v887_v59 = vsel %vm6633_vm15, %v6593_v7, %v883_v10  ;;  %5813 = vpow2.f32 %v570_v27  ;;  %v1280_v42 = vrot.slane %v1278_v41, 5  ;;  %v1284_v30 = vrot.slane %v1282_v58, 4 }
 0x160   : > { %v480_v26 = vpop.f32.mrf.mxu0  ;;  %v1532_v52 = vsel %vm6104_vm12, %v1530_v11, %v1531_v46  ;;  %v1533_v29 = vrot.slane %v1531_v46, 4  ;;  %v892_v38 = vsel %vm6625_vm13, %v891_v51, %v887_v59  ;;  %v1290_v16 = vrot.slane %v1288_v55, 5  ;;  %v5491_v51 = vld [vmem:[#allocation2 + $0x10] sm:$0xff] }
 0x161   : > { %1611 = vst [vmem:[#allocation2 + $0x120] sm:$0xf] %v1532_v52  ;;  %v1281_v0 = vsel %vm6111_vm14, %v1276_v50, %v1280_v42  ;;  %v1285_v25 = vor.u32 %v1284_v30, %v1280_v42  ;;  %v1038_v56 = vmul.f32 %v892_v38, %v6468_v61  ;;  %v1294_v37 = vrot.slane %v1292_v57, 4  ;;  %v5529_v61 = vld [vmem:[%s7756_s3 + $0x138] sm:$0xff] }
 0x162   : > { %1437 = vst [vmem:[#allocation2 + $0xb0] sm:$0xf] %v1281_v0  ;;  %v1535_v33 = vsel %vm6104_vm12, %v1533_v29, %v1534_v60  ;;  %5815 = vrcp.f32 %v6647_v2  ;;  %v6658_v14 = vadd.f32 %v6362_v44, %v480_v26  ;;  %v1536_v17 = vrot.slane %v1534_v60, 4  ;;  %2751 = vmatpush.bf16.msrb.mxu2 %v5529_v61 }
 0x163   : > { %v1286_v7 = vrot.slane %v1285_v25, 4  ;;  %1612 = vst [vmem:[#allocation2 + $0x124] sm:$0xf] %v1535_v33  ;;  %v6651_v8 = vpack.c.bf16 %v1038_v56, %v1038_v56  ;;  %v5658_v9 = vpack.c.bf16 %v1038_v56, %v1037_v53  ;;  %v1295_v12 = vor.u32 %v1294_v37, %v1290_v16 }
 0x164   : > { %v5438_v63 = vld [vmem:[#allocation2 + $0x40] sm:$0xff]  ;;  %v6664_v20 = vadd.f32 1.0, %v5812_v3  ;;  %v520_v36 = vsub.f32 0.0, %v6658_v14  ;;  %v902_v10 = vand.u32 2147483647, %v6647_v2  ;;  %v904_v27 = vand.u32 2147483648, %v6647_v2 }
 0x165   : > { %v5814_v62 = vpop.eup %5813  ;;  %v1291_v15 = vsel %vm6111_vm14, %v1286_v7, %v1290_v16  ;;  %5688 = vst [vmem:[#allocation2 + $0x48] sm:$0xff] %v5658_v9   ;;  %v1298_v18 = vshll.u32 %v6651_v8, 16  ;;  %v1537_v45 = vrot.slane %v6651_v8, 5  ;;  %2061 = vmatmul.bf16.gmra.mxu2 %v5438_v63  ;;  %v1296_v22 = vrot.slane %v1295_v12, 4  ;;  %v5488_v7 = vld [vmem:[%s7756_s3 + $0xb0] sm:$0xff] }
 0x166   : > { %1438 = vst [vmem:[#allocation2 + $0xb4] sm:$0xf] %v1291_v15  ;;  %5817 = vrcp.f32 %v6664_v20  ;;  %v1302_v24 = vshrl.u32 %v6651_v8, 16  ;;  %v6680_v11 = vadd.f32 1.0, %v5814_v62  ;;  %2752 = vmatpush.bf16.msrb.mxu2 %v5528_v35  ;;  %v572_v13 = vmul.f32 1.442695, %v520_v36  ;;  %2244 = vmatpush.bf16.msrb.mxu3 %v5488_v7 }
 0x167   : > { %v6666_v49 = vpop.f32.mrf.mxu1  ;;  %v6668_v23 = vrot.slane %v1298_v18, 5  ;;  %v1538_v6 = vsel %vm6104_vm12, %v1536_v17, %v1537_v45  ;;  %vm6697_vm2 = vcmp.eq.f32.partialorder %v902_v10, 8.507059e+37  ;;  %v905_v29 = vor.u32 1.1754944e-38, %v904_v27 }
 0x168   : > { %v483_v4 = vpop.f32.mrf.mxu0  ;;  %1613 = vst [vmem:[#allocation2 + $0x128] sm:$0xf] %v1538_v6  ;;  %v5816_v31 = vpop.eup %5815  ;;  %5819 = vrcp.f32 %v6680_v11  ;;  %v1304_v58 = vrot.slane %v1302_v24, 4  ;;  %v916_v54 = vand.u32 2147483647, %v6664_v20  ;;  %v1539_v60 = vrot.slane %v1537_v45, 4 }
 0x169   : > { %v1301_v32 = vsel %vm6111_vm14, %v1296_v22, %v6668_v23  ;;  %v894_v53 = vmul.f32 %v5816_v31, %v6647_v2  ;;  %v6691_v41 = vadd.f32 %v6362_v44, %v483_v4  ;;  %vm899_vm0 = vweird.f32 %v5816_v31  ;;  %v5551_v22 = vld [vmem:[#allocation2 + $0x18] sm:$0xff] }
 0x16a   : > { %1439 = vst [vmem:[#allocation2 + $0xb8] sm:$0xf] %v1301_v32  ;;  %5821 = vpow2.f32 %v572_v13  ;;  %vm900_vm3 = vmor %vm898_vm1, %vm899_vm0  ;;  %v918_v0 = vand.u32 2147483648, %v6664_v20  ;;  %v1305_v56 = vor.u32 %v1304_v58, %v6668_v23  ;;  %vm912_vm5 = vweird.f32 %v6664_v20 }
 0x16b   : > { %3267 = vmatmul.bf16.vlgmr.msra.gmra.mxu0 %v5550_v21  ;;  %v895_v43 = vsub.f32 1.0, %v894_v53  ;;  %v521_v48 = vsub.f32 0.0, %v6691_v41  ;;  %vm6729_vm6 = vcmp.eq.f32.partialorder %v916_v54, 8.507059e+37  ;;  %v930_v17 = vand.u32 2147483647, %v6680_v11  ;;  %v5526_v21 = vld [vmem:[%s7756_s3 + $0x120] sm:$0xff] }
 0x16c   : > { %v6693_v1 = vpop.eup %5817  ;;  %v5439_v16 = vld [vmem:[#allocation2 + $0x48] sm:$0xff]  ;;  %v919_v15 = vor.u32 1.1754944e-38, %v918_v0  ;;  %v1306_v23 = vrot.slane %v1305_v56, 4  ;;  %vm926_vm9 = vweird.f32 %v6680_v11 }
 0x16d   : > { %v5458_v46 = vld [vmem:[#allocation2 + $0xb0] sm:$0xff]  ;;  %v896_v26 = vmul.f32 %v5816_v31, %v895_v43  ;;  %v908_v59 = vmul.f32 %v6693_v1, %v6664_v20  ;;  %v574_v55 = vmul.f32 1.442695, %v521_v48  ;;  %vm913_vm4 = vweird.f32 %v6693_v1 }
 0x16e   : > { %1872 = vmatmul.bf16.gmra.mxu3 %v5458_v46  ;;  %v6709_v57 = vpop.eup %5819  ;;  %2510 = vmatmul.bf16.gmra.mxu1 %v5491_v51  ;;  %vm914_vm7 = vmor %vm912_vm5, %vm913_vm4  ;;  %v932_v20 = vand.u32 2147483648, %v6680_v11  ;;  %vm6754_vm10 = vcmp.eq.f32.partialorder %v930_v17, 8.507059e+37 }
 0x16f   : > { %v6706_v30 = vpop.f32.mrf.mxu1  ;;  %v897_v52 = vadd.f32 %v5816_v31, %v896_v26  ;;  %v909_v38 = vsub.f32 1.0, %v908_v59  ;;  %v922_v3 = vmul.f32 %v6709_v57, %v6680_v11  ;;  %5823 = vpow2.f32 %v574_v55 }
 0x170   : > { %v485_v47 = vpop.f32.mrf.mxu0  ;;  %v5822_v9 = vpop.eup %5821  ;;  %vm927_vm8 = vweird.f32 %v6709_v57  ;;  %v933_v46 = vor.u32 1.1754944e-38, %v932_v20 }
 0x171   : > { %v6704_v42 = vadd.f32 %v6362_v44, %v485_v47  ;;  %v5527_v44 = vld [vmem:[%s7756_s3 + $0x128] sm:$0xff]  ;;  %v901_v2 = vsel %vm900_vm3, %v5816_v31, %v897_v52  ;;  %v910_v33 = vmul.f32 %v6693_v1, %v909_v38  ;;  %v923_v12 = vsub.f32 1.0, %v922_v3  ;;  %vm928_vm11 = vmor %vm926_vm9, %vm927_vm8 }
 0x172   : > { %v906_v37 = vsel %vm6697_vm2, %v905_v29, %v901_v2  ;;  %2753 = vmatpush.bf16.msrb.mxu2 %v5527_v44  ;;  %v6735_v18 = vadd.f32 1.0, %v5822_v9  ;;  %v5487_v44 = vld [vmem:[%s7756_s3 + $0xa8] sm:$0xff] }
 0x173   : > { %v522_v25 = vsub.f32 0.0, %v6704_v42  ;;  %v1039_v61 = vmul.f32 %v906_v37, %v6555_v39  ;;  %v911_v63 = vadd.f32 %v6693_v1, %v910_v33  ;;  %v924_v39 = vmul.f32 %v6709_v57, %v923_v12  ;;  %2245 = vmatpush.bf16.msrb.mxu3 %v5487_v44 }
 0x174   : > { %v946_v7 = vand.u32 2147483648, %v6735_v18  ;;  %v944_v20 = vand.u32 2147483647, %v6735_v18  ;;  %vm940_vm15 = vweird.f32 %v6735_v18 }
 0x175   : > { %v576_v8 = vmul.f32 1.442695, %v522_v25  ;;  %v1068_v4 = vpack.c.bf16 %v1039_v61, %v1039_v61  ;;  %2066 = vmatmul.bf16.gmra.mxu2 %v5439_v16  ;;  %v915_v6 = vsel %vm914_vm7, %v6693_v1, %v911_v63  ;;  %v5824_v35 = vpop.eup %5823  ;;  %v925_v53 = vadd.f32 %v6709_v57, %v924_v39  ;;  %v5524_v25 = vld [vmem:[%s7756_s3 + $0x110] sm:$0xff]  ;;  %v5492_v16 = vld [vmem:[#allocation2 + $0x18] sm:$0xff]  ;;  %v5523_v39 = vld [vmem:[%s7756_s3 + $0x108] sm:$0xff] }
 0x176   : > { %v920_v24 = vsel %vm6729_vm6, %v919_v15, %v915_v6  ;;  %2754 = vmatpush.bf16.msrb.mxu2 %v5526_v21  ;;  %v6772_v52 = vadd.f32 1.0, %v5824_v35  ;;  %v6816_v21 = vld [vmem:[%s7755_s2] ss:$0 sm:$0xff]  ;;  %vm945_vm1 = vcmp.eq.f32.partialorder %v944_v20, 8.507059e+37  ;;  %v5483_v20 = vld [vmem:[%s7756_s3 + $0x88] sm:$0xff] }
 0x177   : > { %5825 = vpow2.f32 %v576_v8  ;;  %v1308_v28 = vshll.u32 %v1068_v4, 16  ;;  %v1312_v31 = vshrl.u32 %v1068_v4, 16  ;;  %v1540_v32 = vrot.slane %v1068_v4, 5 }
 0x178   : > { %v6737_v45 = vpop.f32.mrf.mxu0  ;;  %5827 = vrcp.f32 %v6735_v18  ;;  %v1040_v36 = vmul.f32 %v920_v24, %v6591_v5  ;;  %v5525_v5 = vld [vmem:[%s7756_s3 + $0x118] sm:$0xff]  ;;  %v929_v26 = vsel %vm928_vm11, %v6709_v57, %v925_v53  ;;  %vm954_vm2 = vweird.f32 %v6772_v52 }
 0x179   : > { %v6758_v43 = vpop.f32.mrf.mxu1  ;;  %v1310_v27 = vrot.slane %v1308_v28, 5  ;;  %v1314_v13 = vrot.slane %v1312_v31, 4  ;;  %v1541_v58 = vsel %vm6104_vm12, %v1539_v60, %v1540_v32  ;;  %v1542_v11 = vrot.slane %v1540_v32, 4 }
 0x17a   : > { %1614 = vst [vmem:[#allocation2 + $0x12c] sm:$0xf] %v1541_v58  ;;  %v1069_v47 = vpack.c.bf16 %v1040_v36, %v1040_v36  ;;  %v5663_v1 = vpack.c.bf16 %v1040_v36, %v1039_v61  ;;  %v934_v51 = vsel %vm6754_vm10, %v933_v46, %v929_v26  ;;  %2755 = vmatpush.bf16.msrb.mxu2 %v5525_v5  ;;  %5829 = vrcp.f32 %v6772_v52  ;;  %v5522_v5 = vld [vmem:[%s7756_s3 + $0x100] sm:$0xff]  ;;  %v5485_v26 = vld [vmem:[%s7756_s3 + $0x98] sm:$0xff] }
 0x17b   : > { %3272 = vmatmul.bf16.gmra.mxu0 %v5551_v22  ;;  %v1311_v50 = vsel %vm6111_vm14, %v1306_v23, %v1310_v27  ;;  %v1315_v59 = vor.u32 %v1314_v13, %v1310_v27  ;;  %v6777_v38 = vmul.f32 %v934_v51, %v6607_v19  ;;  %v6820_v22 = vadd.f32 %v6816_v21, %v6737_v45  ;;  %v5486_v23 = vld [vmem:[%s7756_s3 + $0xa0] sm:$0xff] }
 0x17c   : > { %1440 = vst [vmem:[#allocation2 + $0xbc] sm:$0xf] %v1311_v50  ;;  %v1318_v54 = vshll.u32 %v1069_v47, 16  ;;  %v1322_v55 = vshrl.u32 %v1069_v47, 16  ;;  %v1543_v60 = vrot.slane %v1069_v47, 5  ;;  %v947_v45 = vor.u32 1.1754944e-38, %v946_v7  ;;  %2246 = vmatpush.bf16.msrb.mxu3 %v5486_v23 }
 0x17d   : > { %v5826_v48 = vpop.eup %5825  ;;  %5689 = vst [vmem:[#allocation2 + $0x50] sm:$0xff] %v5663_v1   ;;  %v1316_v56 = vrot.slane %v1315_v59, 4  ;;  %v6794_v37 = vpack.c.bf16 %v6777_v38, %v6777_v38  ;;  %v958_v58 = vand.u32 2147483647, %v6772_v52  ;;  %v960_v46 = vand.u32 2147483648, %v6772_v52 }
 0x17e   : > { %v6774_v29 = vpop.eup %5827  ;;  %v1320_v2 = vrot.slane %v1318_v54, 5  ;;  %v1324_v19 = vrot.slane %v1322_v55, 4  ;;  %v1544_v3 = vsel %vm6104_vm12, %v1542_v11, %v1543_v60  ;;  %2756 = vmatpush.bf16.msrb.mxu2 %v5524_v25  ;;  %v1545_v61 = vrot.slane %v1543_v60, 4  ;;  %2515 = vmatmul.bf16.gmra.mxu1 %v5492_v16 }
 0x17f   : > { %v936_v0 = vmul.f32 %v6774_v29, %v6735_v18  ;;  %1615 = vst [vmem:[#allocation2 + $0x130] sm:$0xf] %v1544_v3  ;;  %v6799_v62 = vadd.f32 1.0, %v5826_v48  ;;  %v1328_v63 = vshll.u32 %v6794_v37, 16  ;;  %v1332_v15 = vshrl.u32 %v6794_v37, 16  ;;  %v5552_v18 = vld [vmem:[#allocation2 + $0x20] sm:$0xff] }
 0x180   : > { %v6779_v57 = vpop.f32.mrf.mxu0  ;;  %v1321_v8 = vsel %vm6111_vm14, %v1316_v56, %v1320_v2  ;;  %v1325_v9 = vor.u32 %v1324_v19, %v1320_v2  ;;  %v1546_v17 = vrot.slane %v6794_v37, 5  ;;  %vm941_vm13 = vweird.f32 %v6774_v29  ;;  %v6825_v6 = vpop.eup %5829  ;;  %2247 = vmatpush.bf16.msrb.mxu3 %v5485_v26  ;;  %v5484_v2 = vld [vmem:[%s7756_s3 + $0x90] sm:$0xff] }
 0x181   : > { %v937_v33 = vsub.f32 1.0, %v936_v0  ;;  %v6801_v12 = vpop.f32.mrf.mxu1  ;;  %1441 = vst [vmem:[#allocation2 + $0xc0] sm:$0xf] %v1321_v8  ;;  %5831 = vrcp.f32 %v6799_v62  ;;  %v1330_v31 = vrot.slane %v1328_v63, 5  ;;  %v950_v36 = vmul.f32 %v6825_v6, %v6772_v52  ;;  %vm942_vm0 = vmor %vm940_vm15, %vm941_vm13 }
 0x182   : > { %v1326_v28 = vrot.slane %v1325_v9, 4  ;;  %v1547_v32 = vsel %vm6104_vm12, %v1545_v61, %v1546_v17  ;;  %2757 = vmatpush.bf16.msrb.mxu2 %v5523_v39  ;;  %v1334_v13 = vrot.slane %v1332_v15, 4  ;;  %v523_v1 = vsub.f32 0.0, %v6820_v22  ;;  %v5493_v39 = vld [vmem:[#allocation2 + $0x20] sm:$0xff] }
 0x183   : > { %v938_v4 = vmul.f32 %v6774_v29, %v937_v33  ;;  %v5459_v24 = vld [vmem:[#allocation2 + $0xb8] sm:$0xff]  ;;  %1616 = vst [vmem:[#allocation2 + $0x134] sm:$0xf] %v1547_v32  ;;  %v951_v47 = vsub.f32 1.0, %v950_v36  ;;  %vm955_vm3 = vweird.f32 %v6825_v6  ;;  %vm6853_vm4 = vcmp.eq.f32.partialorder %v958_v58, 8.507059e+37  ;;  %v5482_v58 = vld [vmem:[%s7756_s3 + $0x80] sm:$0xff] }
 0x184   : > { %v5440_v53 = vld [vmem:[#allocation2 + $0x50] sm:$0xff]  ;;  %v1331_v27 = vsel %vm6111_vm14, %v1326_v28, %v1330_v31  ;;  %1877 = vmatmul.bf16.gmra.mxu3 %v5459_v24  ;;  %v1335_v54 = vor.u32 %v1334_v13, %v1330_v31  ;;  %v961_v60 = vor.u32 1.1754944e-38, %v960_v46  ;;  %v1548_v19 = vrot.slane %v1546_v17, 4  ;;  %vm956_vm5 = vmor %vm954_vm2, %vm955_vm3 }
 0x185   : > { %v939_v35 = vadd.f32 %v6774_v29, %v938_v4  ;;  %1442 = vst [vmem:[#allocation2 + $0xc4] sm:$0xf] %v1331_v27  ;;  %2071 = vmatmul.bf16.gmra.mxu2 %v5440_v53  ;;  %v952_v51 = vmul.f32 %v6825_v6, %v951_v47  ;;  %v972_v16 = vand.u32 2147483647, %v6799_v62  ;;  %v974_v37 = vand.u32 2147483648, %v6799_v62  ;;  %2248 = vmatpush.bf16.msrb.mxu3 %v5484_v2 }
 0x186   : > { %2758 = vmatpush.bf16.msrb.mxu2 %v5522_v5  ;;  %v1336_v52 = vrot.slane %v1335_v54, 4  ;;  %vm968_vm7 = vweird.f32 %v6799_v62  ;;  %v6881_v28 = vadd.f32 %v6816_v21, %v6779_v57 }
 0x187   : > { %v943_v11 = vsel %vm942_vm0, %v6774_v29, %v939_v35  ;;  %v5832_v50 = vpop.eup %5831  ;;  %v578_v29 = vmul.f32 1.442695, %v523_v1  ;;  %vm973_vm9 = vcmp.eq.f32.partialorder %v972_v16, 8.507059e+37  ;;  %v975_v24 = vor.u32 1.1754944e-38, %v974_v37 }
 0x188   : > { %v6833_v10 = vpop.f32.mrf.mxu0  ;;  %v948_v48 = vsel %vm945_vm1, %v947_v45, %v943_v11  ;;  %v964_v0 = vmul.f32 %v5832_v50, %v6799_v62  ;;  %vm969_vm6 = vweird.f32 %v5832_v50  ;;  %v524_v13 = vsub.f32 0.0, %v6881_v28 }
 0x189   : > { %v1042_v59 = vmul.f32 %v948_v48, %v6658_v14  ;;  %v953_v14 = vadd.f32 %v6825_v6, %v952_v51  ;;  %5833 = vpow2.f32 %v578_v29  ;;  %vm970_vm8 = vmor %vm968_vm7, %vm969_vm6  ;;  %2249 = vmatpush.bf16.msrb.mxu3 %v5483_v20  ;;  %v5553_v51 = vld [vmem:[#allocation2 + $0x28] sm:$0xff] }
 0x18a   : > { %v6858_v44 = vpop.f32.mrf.mxu1  ;;  %v965_v3 = vsub.f32 1.0, %v964_v0 }
 0x18b   : > { %3277 = vmatmul.bf16.gmra.mxu0 %v5552_v18  ;;  %v1071_v25 = vpack.c.bf16 %v1042_v59, %v1042_v59  ;;  %v5668_v56 = vpack.c.bf16 %v1042_v59, %v6777_v38  ;;  %v957_v8 = vsel %vm956_vm5, %v6825_v6, %v953_v14 }
 0x18c   : > { %v962_v61 = vsel %vm6853_vm4, %v961_v60, %v957_v8  ;;  %v966_v63 = vmul.f32 %v5832_v50, %v965_v3  ;;  %v5460_v62 = vld [vmem:[#allocation2 + $0xc0] sm:$0xff]  ;;  %v580_v60 = vmul.f32 1.442695, %v524_v13 }
 0x18d   : > { %5690 = vst [vmem:[#allocation2 + $0x58] sm:$0xff] %v5668_v56   ;;  %v1338_v33 = vshll.u32 %v1071_v25, 16  ;;  %v1342_v7 = vshrl.u32 %v1071_v25, 16  ;;  %v1549_v38 = vrot.slane %v1071_v25, 5  ;;  %v1043_v23 = vmul.f32 %v962_v61, %v6691_v41  ;;  %2250 = vmatpush.bf16.msrb.mxu3 %v5482_v58  ;;  %v5549_v58 = vld [vmem:[%s7756_s3 + $0x178] sm:$0xff] }
 0x18e   : > { %v967_v6 = vadd.f32 %v5832_v50, %v966_v63  ;;  %2520 = vmatmul.bf16.gmra.mxu1 %v5493_v39 }
 0x18f   : > { %v1340_v15 = vrot.slane %v1338_v33, 5  ;;  %v1344_v17 = vrot.slane %v1342_v7, 4  ;;  %v1550_v4 = vsel %vm6104_vm12, %v1548_v19, %v1549_v38  ;;  %v5834_v31 = vpop.eup %5833  ;;  %v1072_v45 = vpack.c.bf16 %v1043_v23, %v1043_v23 }
 0x190   : > { %v495_v9 = vpop.f32.mrf.mxu0  ;;  %1617 = vst [vmem:[#allocation2 + $0x138] sm:$0xf] %v1550_v4  ;;  %v971_v41 = vsel %vm970_vm8, %v5832_v50, %v967_v6  ;;  %v6885_v36 = vadd.f32 1.0, %v5834_v31  ;;  %v1551_v57 = vrot.slane %v1549_v38, 4 }
 0x191   : > { %v1341_v32 = vsel %vm6111_vm14, %v1336_v52, %v1340_v15  ;;  %v1345_v35 = vor.u32 %v1344_v17, %v1340_v15  ;;  %v976_v27 = vsel %vm973_vm9, %v975_v24, %v971_v41  ;;  %v1348_v46 = vshll.u32 %v1072_v45, 16  ;;  %v5494_v15 = vld [vmem:[#allocation2 + $0x28] sm:$0xff]  ;;  %3005 = vmatpush.bf16.msra.mxu3 %v5549_v58 }
 0x192   : > { %1443 = vst [vmem:[#allocation2 + $0xc8] sm:$0xf] %v1341_v32  ;;  %v6887_v53 = vpop.f32.mrf.mxu1  ;;  %v1352_v18 = vshrl.u32 %v1072_v45, 16  ;;  %v1552_v5 = vrot.slane %v1072_v45, 5  ;;  %v1044_v11 = vmul.f32 %v976_v27, %v6704_v42  ;;  %5835 = vrcp.f32 %v6885_v36 }
 0x193   : > { %v1346_v26 = vrot.slane %v1345_v35, 4  ;;  %v1350_v48 = vrot.slane %v1348_v46, 5  ;;  %5837 = vpow2.f32 %v580_v60  ;;  %vm982_vm10 = vweird.f32 %v6885_v36 }
 0x194   : > { %v5441_v47 = vld [vmem:[#allocation2 + $0x58] sm:$0xff]  ;;  %v1354_v50 = vrot.slane %v1352_v18, 4  ;;  %v1553_v59 = vsel %vm6104_vm12, %v1551_v57, %v1552_v5  ;;  %1882 = vmatmul.bf16.gmra.mxu3 %v5460_v62  ;;  %v6897_v29 = vpack.c.bf16 %v1044_v11, %v1044_v11  ;;  %v5673_v54 = vpack.c.bf16 %v1044_v11, %v1043_v23  ;;  %v5554_v62 = vld [vmem:[#allocation2 + $0x30] sm:$0xff] }
 0x195   : > { %1618 = vst [vmem:[#allocation2 + $0x13c] sm:$0xf] %v1553_v59  ;;  %2076 = vmatmul.bf16.gmra.mxu2 %v5441_v47  ;;  %v1351_v42 = vsel %vm6111_vm14, %v1346_v26, %v1350_v48  ;;  %v1554_v25 = vrot.slane %v1552_v5, 4  ;;  %v988_v7 = vand.u32 2147483648, %v6885_v36  ;;  %v986_v9 = vand.u32 2147483647, %v6885_v36 }
 0x196   : > { %v1355_v55 = vor.u32 %v1354_v50, %v1350_v48  ;;  %1444 = vst [vmem:[#allocation2 + $0xcc] sm:$0xf] %v1351_v42  ;;  %v1358_v56 = vshll.u32 %v6897_v29, 16  ;;  %v1555_v14 = vrot.slane %v6897_v29, 5  ;;  %v1362_v63 = vshrl.u32 %v6897_v29, 16  ;;  %v5589_v47 = vld [vmem:[%s7756_s3 + $0x1f8] sm:$0xff] }
 0x197   : > { %5691 = vst [vmem:[#allocation2 + $0x60] sm:$0xff] %v5673_v54   ;;  %v6922_v52 = vadd.f32 %v6816_v21, %v6833_v10  ;;  %v989_v39 = vor.u32 1.1754944e-38, %v988_v7  ;;  %vm987_vm15 = vcmp.eq.f32.partialorder %v986_v9, 8.507059e+37  ;;  %v5510_v10 = vld [vmem:[#allocation2 + $0x78] sm:$0xff]  ;;  %v5548_v26 = vld [vmem:[%s7756_s3 + $0x170] sm:$0xff]  ;;  %3513 = vmatpush.bf16.msra.mxu1 %v5589_v47 }
 0x198   : > { %v2022_v1 = vpop.f32.mrf.mxu0  ;;  %v5836_v19 = vpop.eup %5835  ;;  %v1356_v3 = vrot.slane %v1355_v55, 4  ;;  %v1360_v16 = vrot.slane %v1358_v56, 5  ;;  %v1556_v37 = vsel %vm6104_vm12, %v1554_v25, %v1555_v14  ;;  %v1364_v32 = vrot.slane %v1362_v63, 4  ;;  %3006 = vmatpush.bf16.msra.mxu3 %v5548_v26  ;;  %v5511_v63 = vld [vmem:[#allocation2 + $0x80] sm:$0xff] }
 0x199   : > { %v6902_v0 = vadd.f32 %v2022_v1, %v6666_v49  ;;  %1619 = vst [vmem:[#allocation2 + $0x140] sm:$0xf] %v1556_v37  ;;  %v978_v49 = vmul.f32 %v5836_v19, %v6885_v36  ;;  %vm983_vm11 = vweird.f32 %v5836_v19  ;;  %v5838_v17 = vpop.eup %5837  ;;  %v525_v23 = vsub.f32 0.0, %v6922_v52 }
 0x19a   : > { %v6906_v2 = vpop.f32.mrf.mxu1  ;;  %v1361_v33 = vsel %vm6111_vm14, %v1356_v3, %v1360_v16  ;;  %vm984_vm13 = vmor %vm982_vm10, %vm983_vm11  ;;  %v611_v20 = vadd.f32 1.0, %v5838_v17  ;;  %v1365_v57 = vor.u32 %v1364_v32, %v1360_v16  ;;  %v1557_v46 = vrot.slane %v1555_v14, 4 }
 0x19b   : > { %3282 = vmatmul.bf16.gmra.mxu0 %v5553_v51  ;;  %1445 = vst [vmem:[#allocation2 + $0xd0] sm:$0xf] %v1361_v33  ;;  %v979_v8 = vsub.f32 1.0, %v978_v49  ;;  %v582_v35 = vmul.f32 1.442695, %v525_v23 }
 0x19c   : > { %5839 = vrcp.f32 %v611_v20  ;;  %v1366_v1 = vrot.slane %v1365_v57, 4  ;;  %vm996_vm0 = vweird.f32 %v611_v20  ;;  %v1000_v51 = vand.u32 2147483647, %v611_v20 }
 0x19d   : > { %v980_v4 = vmul.f32 %v5836_v19, %v979_v8  ;;  %v5461_v31 = vld [vmem:[#allocation2 + $0xc8] sm:$0xff]  ;;  %5841 = vpow2.f32 %v582_v35  ;;  %v1002_v29 = vand.u32 2147483648, %v611_v20 }
 0x19e   : > { %2525 = vmatmul.bf16.gmra.mxu1 %v5494_v15  ;;  %vm1001_vm3 = vcmp.eq.f32.partialorder %v1000_v51, 8.507059e+37 }
 0x19f   : > { %v981_v6 = vadd.f32 %v5836_v19, %v980_v4  ;;  %v1003_v3 = vor.u32 1.1754944e-38, %v1002_v29 }
 0x1a0   : > { %v2024_v38 = vpop.f32.mrf.mxu0 }
 0x1a1   : > { %v6917_v61 = vadd.f32 %v2024_v38, %v6706_v30  ;;  %v985_v24 = vsel %vm984_vm13, %v5836_v19, %v981_v6  ;;  %v5495_v19 = vld [vmem:[#allocation2 + $0x30] sm:$0xff]  ;;  %v5470_v38 = vld [vmem:[#allocation2 + $0xe0] sm:$0xff] }
 0x1a2   : > { %v6925_v30 = vpop.f32.mrf.mxu1  ;;  %v990_v21 = vsel %vm987_vm15, %v989_v39, %v985_v24  ;;  %v5840_v13 = vpop.eup %5839  ;;  %v5608_v24 = vld [vmem:[%s7756_s3 + $0x230] sm:$0xff] }
 0x1a3   : > { %v6928_v41 = vmul.f32 %v990_v21, %v6820_v22  ;;  %v5609_v22 = vld [vmem:[%s7756_s3 + $0x238] sm:$0xff]  ;;  %v992_v5 = vmul.f32 %v5840_v13, %v611_v20  ;;  %v5842_v48 = vpop.eup %5841  ;;  %vm997_vm1 = vweird.f32 %v5840_v13 }
 0x1a4   : > { %1887 = vmatmul.bf16.gmra.mxu3 %v5461_v31  ;;  %3767 = vmatpush.bf16.msra.mxu2 %v5609_v22  ;;  %v612_v55 = vadd.f32 1.0, %v5842_v48  ;;  %vm998_vm2 = vmor %vm996_vm0, %vm997_vm1  ;;  %v5555_v20 = vld [vmem:[#allocation2 + $0x38] sm:$0xff] }
 0x1a5   : > { %2759 = vmatmul.bf16.vlgmr.msrb.gmra.mxu2 %v5510_v10  ;;  %v1074_v27 = vpack.c.bf16 %v6928_v41, %v6928_v41  ;;  %v993_v42 = vsub.f32 1.0, %v992_v5  ;;  %v5496_v48 = vld [vmem:[#allocation2 + $0x38] sm:$0xff] }
 0x1a6   : > { %5843 = vrcp.f32 %v612_v55  ;;  %v1016_v32 = vand.u32 2147483648, %v612_v55  ;;  %vm1010_vm4 = vweird.f32 %v612_v55  ;;  %v1014_v35 = vand.u32 2147483647, %v612_v55 }
 0x1a7   : > { %v1368_v18 = vshll.u32 %v1074_v27, 16  ;;  %v1372_v54 = vshrl.u32 %v1074_v27, 16  ;;  %v994_v14 = vmul.f32 %v5840_v13, %v993_v42 }
 0x1a8   : > { %v2027_v45 = vpop.f32.mrf.mxu0  ;;  %3768 = vmatpush.bf16.msra.mxu2 %v5608_v24  ;;  %vm1015_vm7 = vcmp.eq.f32.partialorder %v1014_v35, 8.507059e+37  ;;  %v5546_v24 = vld [vmem:[%s7756_s3 + $0x160] sm:$0xff] }
 0x1a9   : > { %v6931_v36 = vadd.f32 %v2027_v45, %v6758_v43  ;;  %v1558_v43 = vrot.slane %v1074_v27, 5  ;;  %v1370_v50 = vrot.slane %v1368_v18, 5  ;;  %v1374_v16 = vrot.slane %v1372_v54, 4 }
 0x1aa   : > { %v6941_v11 = vpop.f32.mrf.mxu1  ;;  %v995_v37 = vadd.f32 %v5840_v13, %v994_v14  ;;  %v1017_v27 = vor.u32 1.1754944e-38, %v1016_v32  ;;  %v5512_v14 = vld [vmem:[#allocation2 + $0x88] sm:$0xff] }
 0x1ab   : > { %3287 = vmatmul.bf16.gmra.mxu0 %v5554_v62  ;;  %v1559_v59 = vsel %vm6104_vm12, %v1557_v46, %v1558_v43  ;;  %v1371_v25 = vsel %vm6111_vm14, %v1366_v1, %v1370_v50  ;;  %v1560_v23 = vrot.slane %v1558_v43, 4 }
 0x1ac   : > { %1620 = vst [vmem:[#allocation2 + $0x144] sm:$0xf] %v1559_v59  ;;  %v999_v33 = vsel %vm998_vm2, %v5840_v13, %v995_v37  ;;  %v5844_v8 = vpop.eup %5843 }
 0x1ad   : > { %1446 = vst [vmem:[#allocation2 + $0xd4] sm:$0xf] %v1371_v25  ;;  %v1004_v7 = vsel %vm1001_vm3, %v1003_v3, %v999_v33  ;;  %v1006_v17 = vmul.f32 %v5844_v8, %v612_v55  ;;  %vm1011_vm5 = vweird.f32 %v5844_v8  ;;  %v5556_v33 = vld [vmem:[#allocation2 + $0x40] sm:$0xff] }
 0x1ae   : > { %2530 = vmatmul.bf16.gmra.mxu1 %v5495_v19  ;;  %v1046_v9 = vmul.f32 %v1004_v7, %v6881_v28  ;;  %vm1012_vm6 = vmor %vm1010_vm4, %vm1011_vm5  ;;  %v5547_v7 = vld [vmem:[%s7756_s3 + $0x168] sm:$0xff] }
 0x1af   : > { %v1007_v28 = vsub.f32 1.0, %v1006_v17  ;;  %3007 = vmatpush.bf16.msra.mxu3 %v5547_v7  ;;  %v5472_v17 = vld [vmem:[#allocation2 + $0xf0] sm:$0xff] }
 0x1b0   : > { %v2029_v60 = vpop.f32.mrf.mxu0  ;;  %v1075_v6 = vpack.c.bf16 %v1046_v9, %v1046_v9  ;;  %v5678_v31 = vpack.c.bf16 %v1046_v9, %v6928_v41 }
 0x1b1   : > { %v6954_v56 = vadd.f32 %v2029_v60, %v6801_v12  ;;  %v1375_v12 = vor.u32 %v1374_v16, %v1370_v50  ;;  %v1008_v62 = vmul.f32 %v5844_v8, %v1007_v28  ;;  %v5471_v60 = vld [vmem:[#allocation2 + $0xe8] sm:$0xff] }
 0x1b2   : > { %v6957_v49 = vpop.f32.mrf.mxu1  ;;  %5692 = vst [vmem:[#allocation2 + $0x68] sm:$0xff] %v5678_v31   ;;  %v1382_v10 = vshrl.u32 %v1075_v6, 16  ;;  %v1561_v45 = vrot.slane %v1075_v6, 5 }
 0x1b3   : > { %v1376_v21 = vrot.slane %v1375_v12, 4  ;;  %v1009_v58 = vadd.f32 %v5844_v8, %v1008_v62  ;;  %3008 = vmatpush.bf16.msra.mxu3 %v5546_v24  ;;  %v5473_v62 = vld [vmem:[#allocation2 + $0xf8] sm:$0xff]  ;;  %v5517_v24 = vld [vmem:[#allocation2 + $0xb0] sm:$0xff] }
 0x1b4   : > { %2251 = vmatmul.bf16.vlgmr.msrb.gmra.mxu3 %v5470_v38  ;;  %v2047_v4 = vpop.f32.mrf.mxu2  ;;  %v1562_v41 = vsel %vm6104_vm12, %v1560_v23, %v1561_v45  ;;  %v1384_v13 = vrot.slane %v1382_v10, 4  ;;  %v1563_v51 = vrot.slane %v1561_v45, 4  ;;  %v5588_v38 = vld [vmem:[%s7756_s3 + $0x1f0] sm:$0xff] }
 0x1b5   : > { %2764 = vmatmul.bf16.gmra.mxu2 %v5511_v63  ;;  %1621 = vst [vmem:[#allocation2 + $0x148] sm:$0xf] %v1562_v41  ;;  %v1013_v5 = vsel %vm1012_vm6, %v5844_v8, %v1009_v58  ;;  %3514 = vmatpush.bf16.msra.mxu1 %v5588_v38  ;;  %v5558_v41 = vld [vmem:[#allocation2 + $0x50] sm:$0xff]  ;;  %v5516_v38 = vld [vmem:[#allocation2 + $0xa8] sm:$0xff] }
 0x1b6   : > { %v1018_v26 = vsel %vm1015_vm7, %v1017_v27, %v1013_v5 }
 0x1b7   : > { %v1047_v59 = vmul.f32 %v1018_v26, %v6922_v52  ;;  %v5586_v26 = vld [vmem:[%s7756_s3 + $0x1e0] sm:$0xff] }
 0x1b8   : > { %v2032_v15 = vpop.f32.mrf.mxu0 }
 0x1b9   : > { %v6961_v39 = vadd.f32 %v2032_v15, %v6858_v44  ;;  %v1378_v44 = vshll.u32 %v1075_v6, 16  ;;  %v1104_v29 = vpack.c.bf16 %v1047_v59, %v1047_v59  ;;  %v5497_v15 = vld [vmem:[#allocation2 + $0x40] sm:$0xff]  ;;  %v5557_v6 = vld [vmem:[#allocation2 + $0x48] sm:$0xff] }
 0x1ba   : > { %v1858_v22 = vpop.f32.mrf.mxu1  ;;  %v5515_v59 = vld [vmem:[#allocation2 + $0xa0] sm:$0xff] }
 0x1bb   : > { %3292 = vmatmul.bf16.gmra.mxu0 %v5555_v20  ;;  %v1380_v57 = vrot.slane %v1378_v44, 5  ;;  %v6971_v18 = vadd.f32 %v2047_v4, %v1858_v22  ;;  %v1388_v42 = vshll.u32 %v1104_v29, 16  ;;  %v1564_v55 = vrot.slane %v1104_v29, 5  ;;  %v5513_v4 = vld [vmem:[#allocation2 + $0x90] sm:$0xff]  ;;  %v5498_v44 = vld [vmem:[#allocation2 + $0x48] sm:$0xff]  ;;  %v5545_v29 = vld [vmem:[%s7756_s3 + $0x158] sm:$0xff] }
 0x1bc   : > { %v2049_v47 = vpop.f32.mrf.mxu2  ;;  %3009 = vmatpush.bf16.msra.mxu3 %v5545_v29 }
 0x1bd   : > { %v1381_v46 = vsel %vm6111_vm14, %v1376_v21, %v1380_v57  ;;  %v1385_v50 = vor.u32 %v1384_v13, %v1380_v57  ;;  %v1390_v16 = vrot.slane %v1388_v42, 5  ;;  %v5514_v57 = vld [vmem:[#allocation2 + $0x98] sm:$0xff] }
 0x1be   : > { %1447 = vst [vmem:[#allocation2 + $0xd8] sm:$0xf] %v1381_v46  ;;  %2535 = vmatmul.bf16.gmra.mxu1 %v5496_v48 }
 0x1bf   : > { %v1386_v54 = vrot.slane %v1385_v50, 4  ;;  %v5474_v50 = vld [vmem:[#allocation2 + $0x100] sm:$0xff] }
 0x1c0   : > { %v2034_v43 = vpop.f32.mrf.mxu0 }
 0x1c1   : > { %v6974_v1 = vadd.f32 %v2034_v43, %v6887_v53  ;;  %v1565_v53 = vsel %vm6104_vm12, %v1563_v51, %v1564_v55  ;;  %v1391_v34 = vsel %vm6111_vm14, %v1386_v54, %v1390_v16  ;;  %v5559_v51 = vld [vmem:[#allocation2 + $0x58] sm:$0xff] }
 0x1c2   : > { %v1860_v25 = vpop.f32.mrf.mxu1  ;;  %1622 = vst [vmem:[#allocation2 + $0x14c] sm:$0xf] %v1565_v53  ;;  %v5585_v54 = vld [vmem:[%s7756_s3 + $0x1d8] sm:$0xff] }
 0x1c3   : > { %v6977_v19 = vadd.f32 %v2049_v47, %v1860_v25  ;;  %1448 = vst [vmem:[#allocation2 + $0xdc] sm:$0xf] %v1391_v34  ;;  %v5606_v47 = vld [vmem:[%s7756_s3 + $0x220] sm:$0xff]  ;;  %v5500_v16 = vld [vmem:[#allocation2 + $0x58] sm:$0xff] }
 0x1c4   : > { %2256 = vmatmul.bf16.gmra.mxu3 %v5471_v60  ;;  %v2052_v37 = vpop.f32.mrf.mxu2  ;;  %v5584_v60 = vld [vmem:[%s7756_s3 + $0x1d0] sm:$0xff]  ;;  %v5560_v34 = vld [vmem:[#allocation2 + $0x60] sm:$0xff] }
 0x1c5   : > { %2769 = vmatmul.bf16.gmra.mxu2 %v5512_v14 }
 0x1c8   : > { %v2037_v3 = vpop.f32.mrf.mxu0 }
 0x1c9   : > { %v6982_v52 = vadd.f32 %v2037_v3, %v6906_v2  ;;  %v5583_v3 = vld [vmem:[%s7756_s3 + $0x1c8] sm:$0xff] }
 0x1cb   : > { %3297 = vmatmul.bf16.gmra.mxu0 %v5556_v33  ;;  %v1863_v8 = vpop.f32.mrf.mxu1  ;;  %v5475_v33 = vld [vmem:[#allocation2 + $0x108] sm:$0xff] }
 0x1cc   : > { %v2054_v12 = vpop.f32.mrf.mxu2  ;;  %v6995_v63 = vadd.f32 %v2052_v37, %v1863_v8  ;;  %v5582_v37 = vld [vmem:[%s7756_s3 + $0x1c0] sm:$0xff] }
 0x1ce   : > { %2540 = vmatmul.bf16.gmra.mxu1 %v5497_v15  ;;  %v5605_v15 = vld [vmem:[%s7756_s3 + $0x218] sm:$0xff] }
 0x1d0   : > { %v2039_v2 = vpop.f32.mrf.mxu0 }
 0x1d1   : > { %v6993_v9 = vadd.f32 %v2039_v2, %v6925_v30  ;;  %v5607_v30 = vld [vmem:[%s7756_s3 + $0x228] sm:$0xff] }
 0x1d2   : > { %3769 = vmatpush.bf16.msra.mxu2 %v5607_v30  ;;  %v5476_v30 = vld [vmem:[#allocation2 + $0x110] sm:$0xff] }
 0x1d3   : > { %v1865_v40 = vpop.f32.mrf.mxu1 }
 0x1d4   : > { %2261 = vmatmul.bf16.gmra.mxu3 %v5472_v17  ;;  %v7000_v31 = vadd.f32 %v2054_v12, %v1865_v40  ;;  %v2057_v32 = vpop.f32.mrf.mxu2  ;;  %v5544_v17 = vld [vmem:[%s7756_s3 + $0x150] sm:$0xff] }
 0x1d5   : > { %2774 = vmatmul.bf16.gmra.mxu2 %v5513_v4  ;;  %3010 = vmatpush.bf16.msra.mxu3 %v5544_v17 }
 0x1d6   : > { %3770 = vmatpush.bf16.msra.mxu2 %v5606_v47 }
 0x1d8   : > { %v2042_v20 = vpop.f32.mrf.mxu0 }
 0x1d9   : > { %v6998_v23 = vadd.f32 %v2042_v20, %v6941_v11  ;;  %v5587_v11 = vld [vmem:[%s7756_s3 + $0x1e8] sm:$0xff]  ;;  %v5501_v20 = vld [vmem:[#allocation2 + $0x60] sm:$0xff] }
 0x1da   : > { %3515 = vmatpush.bf16.msra.mxu1 %v5587_v11  ;;  %3771 = vmatpush.bf16.msra.mxu2 %v5605_v15 }
 0x1db   : > { %3302 = vmatmul.bf16.gmra.mxu0 %v5557_v6  ;;  %v7016_v27 = vpop.f32.mrf.mxu1 }
 0x1dc   : > { %v2059_v21 = vpop.f32.mrf.mxu2 }
 0x1de   : > { %2545 = vmatmul.bf16.gmra.mxu1 %v5498_v44  ;;  %v1868_v10 = vpop.f32.mrf.mxu3 }
 0x1df   : > { %v7014_v45 = vadd.f32 %v2057_v32, %v1868_v10  ;;  %3516 = vmatpush.bf16.msra.mxu1 %v5586_v26  ;;  %v5570_v10 = vld [vmem:[#allocation2 + $0x80] sm:$0xff] }
 0x1e0   : > { %v2044_v28 = vpop.f32.mrf.mxu0 }
 0x1e1   : > { %v7012_v35 = vadd.f32 %v2044_v28, %v6957_v49  ;;  %v5499_v49 = vld [vmem:[#allocation2 + $0x50] sm:$0xff] }
 0x1e3   : > { %v7020_v46 = vpop.f32.mrf.mxu1  ;;  %3517 = vmatpush.bf16.msra.mxu1 %v5585_v54 }
 0x1e4   : > { %2266 = vmatmul.bf16.gmra.mxu3 %v5473_v62 }
 0x1e5   : > { %2779 = vmatmul.bf16.gmra.mxu2 %v5514_v57 }
 0x1e6   : > { %v1870_v58 = vpop.f32.mrf.mxu3 }
 0x1e7   : > { %v7018_v22 = vadd.f32 %v2059_v21, %v1870_v58  ;;  %3518 = vmatpush.bf16.msra.mxu1 %v5584_v60  ;;  %v5477_v58 = vld [vmem:[#allocation2 + $0x118] sm:$0xff]  ;;  %v5519_v60 = vld [vmem:[#allocation2 + $0xc0] sm:$0xff] }
 0x1e8   : > { %v2062_v13 = vpop.f32.mrf.mxu2 }
 0x1eb   : > { %3307 = vmatmul.bf16.gmra.mxu0 %v5558_v41  ;;  %v7039_v25 = vpop.f32.mrf.mxu1  ;;  %3519 = vmatpush.bf16.msra.mxu1 %v5583_v3 }
 0x1ee   : > { %2550 = vmatmul.bf16.gmra.mxu1 %v5499_v49  ;;  %v5604_v49 = vld [vmem:[%s7756_s3 + $0x210] sm:$0xff] }
 0x1ef   : > { %3520 = vmatpush.bf16.msra.mxu1 %v5582_v37  ;;  %3772 = vmatpush.bf16.msra.mxu2 %v5604_v49 }
 0x1f0   : > { %v2064_v43 = vpop.f32.mrf.mxu2 }
 0x1f1   : > { %v1873_v5 = vpop.f32.mrf.mxu3 }
 0x1f2   : > { %v7028_v48 = vadd.f32 %v2062_v13, %v1873_v5  ;;  %v5543_v5 = vld [vmem:[%s7756_s3 + $0x148] sm:$0xff] }
 0x1f3   : > { %v7049_v7 = vpop.f32.mrf.mxu1  ;;  %3011 = vmatpush.bf16.msra.mxu3 %v5543_v5  ;;  %v5573_v5 = vld [vmem:[#allocation2 + $0x98] sm:$0xff] }
 0x1f4   : > { %2271 = vmatmul.bf16.gmra.mxu3 %v5474_v50 }
 0x1f5   : > { %2784 = vmatmul.bf16.gmra.mxu2 %v5515_v59 }
 0x1f8   : > { %v2067_v42 = vpop.f32.mrf.mxu2 }
 0x1f9   : > { %v1875_v55 = vpop.f32.mrf.mxu3 }
 0x1fa   : > { %v7041_v14 = vadd.f32 %v2064_v43, %v1875_v55  ;;  %v5518_v43 = vld [vmem:[#allocation2 + $0xb8] sm:$0xff]  ;;  %v5478_v55 = vld [vmem:[#allocation2 + $0x120] sm:$0xff] }
 0x1fb   : > { %3312 = vmatmul.bf16.gmra.mxu0 %v5559_v51  ;;  %v7059_v4 = vpop.f32.mrf.mxu1  ;;  %v5571_v51 = vld [vmem:[#allocation2 + $0x88] sm:$0xff] }
 0x1fe   : > { %2555 = vmatmul.bf16.gmra.mxu1 %v5500_v16 }
 0x200   : > { %v2069_v53 = vpop.f32.mrf.mxu2 }
 0x203   : > { %v7063_v11 = vpop.f32.mrf.mxu1 }
 0x204   : > { %2276 = vmatmul.bf16.gmra.mxu3 %v5475_v33 }
 0x205   : > { %2789 = vmatmul.bf16.gmra.mxu2 %v5516_v38  ;;  %v5603_v38 = vld [vmem:[%s7756_s3 + $0x208] sm:$0xff] }
 0x206   : > { %3773 = vmatpush.bf16.msra.mxu2 %v5603_v38 }
 0x207   : > { %v1878_v2 = vpop.f32.mrf.mxu3 }
 0x208   : > { %v7051_v8 = vadd.f32 %v2067_v42, %v1878_v2  ;;  %v2072_v12 = vpop.f32.mrf.mxu2 }
 0x20b   : > { %3317 = vmatmul.bf16.gmra.mxu0 %v5560_v34  ;;  %v7069_v13 = vpop.f32.mrf.mxu1  ;;  %v5542_v34 = vld [vmem:[%s7756_s3 + $0x140] sm:$0xff] }
 0x20c   : > { %3012 = vmatpush.bf16.msra.mxu3 %v5542_v34 }
 0x20e   : > { %2560 = vmatmul.bf16.gmra.mxu1 %v5501_v20 }
 0x20f   : > { %v1880_v40 = vpop.f32.mrf.mxu3 }
 0x210   : > { %v7061_v6 = vadd.f32 %v2069_v53, %v1880_v40  ;;  %v2074_v32 = vpop.f32.mrf.mxu2  ;;  %v5944_v40 = vld [vmem:[%s7756_s3 + $0x1b0] sm:$0xff] }
 0x213   : > { %v7079_v59 = vpop.f32.mrf.mxu1 }
 0x214   : > { %2281 = vmatmul.bf16.gmra.mxu3 %v5476_v30  ;;  %v5479_v30 = vld [vmem:[#allocation2 + $0x128] sm:$0xff] }
 0x215   : > { %2794 = vmatmul.bf16.gmra.mxu2 %v5517_v24  ;;  %v5520_v24 = vld [vmem:[#allocation2 + $0xc8] sm:$0xff] }
 0x217   : > { %v1883_v28 = vpop.f32.mrf.mxu3 }
 0x218   : > { %v7065_v21 = vadd.f32 %v2072_v12, %v1883_v28  ;;  %v2077_v44 = vpop.f32.mrf.mxu2  ;;  %v5572_v12 = vld [vmem:[#allocation2 + $0x90] sm:$0xff]  ;;  %v5602_v28 = vld [vmem:[%s7756_s3 + $0x200] sm:$0xff] }
 0x219   : > { %3774 = vmatpush.bf16.msra.mxu2 %v5602_v28 }
 0x21b   : > { %v7083_v3 = vpop.f32.mrf.mxu1 }
 0x21e   : > { %3521 = vmatmul.bf16.vlgmr.msra.gmra.mxu1 %v5570_v10 }
 0x21f   : > { %v1885_v62 = vpop.f32.mrf.mxu3 }
 0x220   : > { %v7067_v57 = vadd.f32 %v2074_v32, %v1885_v62  ;;  %v2079_v41 = vpop.f32.mrf.mxu2 }
 0x223   : > { %v7098_v15 = vpop.f32.mrf.mxu1 }
 0x224   : > { %2286 = vmatmul.bf16.gmra.mxu3 %v5477_v58  ;;  %v5946_v58 = vld [vmem:[%s7756_s3 + $0x1a0] sm:$0xff] }
 0x225   : > { %2799 = vmatmul.bf16.gmra.mxu2 %v5518_v43 }
 0x227   : > { %v1888_v47 = vpop.f32.mrf.mxu3 }
 0x228   : > { %v7077_v26 = vadd.f32 %v2077_v44, %v1888_v47  ;;  %v2760_v50 = vpop.f32.mrf.mxu2  ;;  %v5947_v47 = vld [vmem:[%s7756_s3 + $0x198] sm:$0xff] }
 0x22e   : > { %3526 = vmatmul.bf16.gmra.mxu1 %v5571_v51 }
 0x22f   : > { %v1890_v29 = vpop.f32.mrf.mxu3 }
 0x230   : > { %v7081_v54 = vadd.f32 %v2079_v41, %v1890_v29  ;;  %v2762_v42 = vpop.f32.mrf.mxu2  ;;  %v7114_v41 = vpop.f32.mrf.mxu1  ;;  %v5948_v29 = vld [vmem:[%s7756_s3 + $0x190] sm:$0xff] }
 0x234   : > { %2291 = vmatmul.bf16.gmra.mxu3 %v5478_v55 }
 0x235   : > { %2804 = vmatmul.bf16.gmra.mxu2 %v5519_v60  ;;  %v5521_v60 = vld [vmem:[#allocation2 + $0xd0] sm:$0xff] }
 0x237   : > { %v2252_v16 = vpop.f32.mrf.mxu3 }
 0x238   : > { %v2312_v53 = vadd.f32 %v2252_v16, %v6902_v0  ;;  %v2765_v37 = vpop.f32.mrf.mxu2  ;;  %v5943_v0 = vld [vmem:[%s7756_s3 + $0x1b8] sm:$0xff]  ;;  %v7130_v55 = vpop.f32.mrf.mxu1 }
 0x239   : > { %5709 = vmatpush.bf16.msrb.mxu3 %v5943_v0  ;;  %v5574_v0 = vld [vmem:[#allocation2 + $0xa0] sm:$0xff] }
 0x23a   : > { %v2566_v33 = vadd.f32 %v7016_v27, %v2312_v53 }
 0x23c   : > { %v7093_v2 = vadd.f32 %v2760_v50, %v2566_v33 }
 0x23d   : > { %5710 = vmatpush.bf16.msrb.mxu3 %v5944_v40  ;;  %v5481_v40 = vld [vmem:[#allocation2 + $0x138] sm:$0xff] }
 0x23e   : > { %3531 = vmatmul.bf16.gmra.mxu1 %v5572_v12 }
 0x23f   : > { %v2254_v27 = vpop.f32.mrf.mxu3 }
 0x240   : > { %v2313_v17 = vadd.f32 %v2254_v27, %v6917_v61  ;;  %v2767_v20 = vpop.f32.mrf.mxu2  ;;  %v5945_v61 = vld [vmem:[%s7756_s3 + $0x1a8] sm:$0xff]  ;;  %v7144_v12 = vpop.f32.mrf.mxu1 }
 0x241   : > { %5711 = vmatpush.bf16.msrb.mxu3 %v5945_v61 }
 0x242   : > { %v2567_v32 = vadd.f32 %v7020_v46, %v2313_v17 }
 0x244   : > { %2296 = vmatmul.bf16.gmra.mxu3 %v5479_v30  ;;  %v7108_v44 = vadd.f32 %v2762_v42, %v2567_v32  ;;  %v5480_v42 = vld [vmem:[#allocation2 + $0x130] sm:$0xff] }
 0x245   : > { %2809 = vmatmul.bf16.gmra.mxu2 %v5520_v24  ;;  %5712 = vmatpush.bf16.msrb.mxu3 %v5946_v58  ;;  %v5590_v32 = vld [vmem:[#allocation2 + $0xf0] sm:$0xff] }
 0x247   : > { %v2257_v10 = vpop.f32.mrf.mxu3 }
 0x248   : > { %v2314_v62 = vadd.f32 %v2257_v10, %v6931_v36  ;;  %v2770_v46 = vpop.f32.mrf.mxu2  ;;  %v7150_v24 = vpop.f32.mrf.mxu1 }
 0x249   : > { %5713 = vmatpush.bf16.msrb.mxu3 %v5947_v47  ;;  %v5530_v47 = vld [vmem:[#allocation2 + $0xe8] sm:$0xff] }
 0x24a   : > { %v2568_v49 = vadd.f32 %v7039_v25, %v2314_v62 }
 0x24c   : > { %v7120_v43 = vadd.f32 %v2765_v37, %v2568_v49 }
 0x24d   : > { %5714 = vmatpush.bf16.msrb.mxu3 %v5948_v29 }
 0x24e   : > { %3536 = vmatmul.bf16.gmra.mxu1 %v5573_v5 }
 0x24f   : > { %v2259_v50 = vpop.f32.mrf.mxu3 }
 0x250   : > { %v2315_v36 = vadd.f32 %v2259_v50, %v6954_v56  ;;  %v2772_v51 = vpop.f32.mrf.mxu2  ;;  %v5949_v56 = vld [vmem:[%s7756_s3 + $0x188] sm:$0xff]  ;;  %v7157_v49 = vpop.f32.mrf.mxu1  ;;  %v5591_v50 = vld [vmem:[#allocation2 + $0xf8] sm:$0xff] }
 0x251   : > { %5715 = vmatpush.bf16.msrb.mxu3 %v5949_v56 }
 0x252   : > { %v2569_v25 = vadd.f32 %v7049_v7, %v2315_v36  ;;  %v5950_v7 = vld [vmem:[%s7756_s3 + $0x180] sm:$0xff] }
 0x254   : > { %2301 = vmatmul.bf16.gmra.mxu3 %v5480_v42  ;;  %v7132_v16 = vadd.f32 %v2767_v20, %v2569_v25 }
 0x255   : > { %2814 = vmatmul.bf16.gmra.mxu2 %v5521_v60  ;;  %5716 = vmatpush.bf16.msrb.mxu3 %v5950_v7 }
 0x257   : > { %v2262_v53 = vpop.f32.mrf.mxu3 }
 0x258   : > { %v2316_v37 = vadd.f32 %v2262_v53, %v6961_v39  ;;  %v2775_v33 = vpop.f32.mrf.mxu2  ;;  %v2543_v25 = vpop.f32.mrf.mxu1 }
 0x25a   : > { %v2570_v38 = vadd.f32 %v7059_v4, %v2316_v37  ;;  %v5531_v37 = vld [vmem:[#allocation2 + $0xf0] sm:$0xff] }
 0x25c   : > { %v7142_v34 = vadd.f32 %v2770_v46, %v2570_v38 }
 0x25e   : > { %3541 = vmatmul.bf16.gmra.mxu1 %v5574_v0 }
 0x25f   : > { %v2264_v27 = vpop.f32.mrf.mxu3 }
 0x260   : > { %v2317_v17 = vadd.f32 %v2264_v27, %v6974_v1  ;;  %v2777_v20 = vpop.f32.mrf.mxu2  ;;  %v5575_v1 = vld [vmem:[#allocation2 + $0xa8] sm:$0xff] }
 0x262   : > { %v2571_v39 = vadd.f32 %v7063_v11, %v2317_v17 }
 0x264   : > { %2306 = vmatmul.bf16.gmra.mxu3 %v5481_v40  ;;  %v7148_v30 = vadd.f32 %v2772_v51, %v2571_v39 }
 0x265   : > { %3775 = vmatmul.bf16.vlgmr.msra.gmra.mxu2 %v5590_v32 }
 0x267   : > { %v2267_v4 = vpop.f32.mrf.mxu3 }
 0x268   : > { %v2318_v28 = vadd.f32 %v2267_v4, %v6982_v52  ;;  %v2780_v61 = vpop.f32.mrf.mxu2  ;;  %v5532_v4 = vld [vmem:[#allocation2 + $0xf8] sm:$0xff] }
 0x26a   : > { %v2572_v10 = vadd.f32 %v7069_v13, %v2318_v28  ;;  %v5593_v28 = vld [vmem:[#allocation2 + $0x108] sm:$0xff] }
 0x26c   : > { %v7154_v62 = vadd.f32 %v2775_v33, %v2572_v10  ;;  %v5592_v33 = vld [vmem:[#allocation2 + $0x100] sm:$0xff] }
 0x26e   : > { %3546 = vmatmul.bf16.gmra.mxu1 %v5575_v1 }
 0x26f   : > { %v2269_v46 = vpop.f32.mrf.mxu3 }
 0x270   : > { %v2319_v11 = vadd.f32 %v2269_v46, %v6993_v9  ;;  %v2782_v58 = vpop.f32.mrf.mxu2  ;;  %v5576_v9 = vld [vmem:[#allocation2 + $0xb0] sm:$0xff] }
 0x272   : > { %v2573_v5 = vadd.f32 %v7079_v59, %v2319_v11 }
 0x274   : > { %3013 = vmatmul.bf16.vlgmr.msra.gmra.mxu3 %v5530_v47  ;;  %v7160_v36 = vadd.f32 %v2777_v20, %v2573_v5  ;;  %v5577_v20 = vld [vmem:[#allocation2 + $0xb8] sm:$0xff] }
 0x275   : > { %3780 = vmatmul.bf16.gmra.mxu2 %v5591_v50  ;;  %v5533_v50 = vld [vmem:[#allocation2 + $0x100] sm:$0xff] }
 0x277   : > { %v2272_v52 = vpop.f32.mrf.mxu3 }
 0x278   : > { %v2320_v13 = vadd.f32 %v2272_v52, %v6998_v23  ;;  %v2785_v51 = vpop.f32.mrf.mxu2  ;;  %v2546_v23 = vpop.f32.mrf.mxu1 }
 0x27a   : > { %v2574_v29 = vadd.f32 %v7083_v3, %v2320_v13  ;;  %v5594_v13 = vld [vmem:[#allocation2 + $0x110] sm:$0xff] }
 0x27c   : > { %v7164_v42 = vadd.f32 %v2780_v61, %v2574_v29 }
 0x27e   : > { %3551 = vmatmul.bf16.gmra.mxu1 %v5576_v9 }
 0x27f   : > { %v2274_v60 = vpop.f32.mrf.mxu3 }
 0x280   : > { %v2321_v59 = vadd.f32 %v2274_v60, %v7012_v35  ;;  %v2787_v56 = vpop.f32.mrf.mxu2  ;;  %v2548_v35 = vpop.f32.mrf.mxu1 }
 0x282   : > { %v2575_v53 = vadd.f32 %v7098_v15, %v2321_v59 }
 0x284   : > { %3018 = vmatmul.bf16.gmra.mxu3 %v5531_v37  ;;  %v7168_v7 = vadd.f32 %v2782_v58, %v2575_v53  ;;  %v5578_v58 = vld [vmem:[#allocation2 + $0xc0] sm:$0xff] }
 0x285   : > { %3785 = vmatmul.bf16.gmra.mxu2 %v5592_v33  ;;  %v5534_v33 = vld [vmem:[#allocation2 + $0x108] sm:$0xff] }
 0x287   : > { %v2277_v38 = vpop.f32.mrf.mxu3 }
 0x288   : > { %v2322_v3 = vadd.f32 %v2277_v38, %v6971_v18  ;;  %v2790_v0 = vpop.f32.mrf.mxu2  ;;  %v2551_v1 = vpop.f32.mrf.mxu1  ;;  %v5595_v38 = vld [vmem:[#allocation2 + $0x118] sm:$0xff] }
 0x28a   : > { %v2576_v27 = vadd.f32 %v7114_v41, %v2322_v3 }
 0x28c   : > { %v7172_v17 = vadd.f32 %v2785_v51, %v2576_v27 }
 0x28e   : > { %3556 = vmatmul.bf16.gmra.mxu1 %v5577_v20 }
 0x28f   : > { %v2279_v39 = vpop.f32.mrf.mxu3 }
 0x290   : > { %v2323_v15 = vadd.f32 %v2279_v39, %v6977_v19  ;;  %v2792_v40 = vpop.f32.mrf.mxu2  ;;  %v2553_v52 = vpop.f32.mrf.mxu1 }
 0x292   : > { %v2577_v32 = vadd.f32 %v7130_v55, %v2323_v15  ;;  %v5580_v15 = vld [vmem:[#allocation2 + $0xd0] sm:$0xff] }
 0x294   : > { %3023 = vmatmul.bf16.gmra.mxu3 %v5532_v4  ;;  %v7176_v61 = vadd.f32 %v2787_v56, %v2577_v32 }
 0x295   : > { %3790 = vmatmul.bf16.gmra.mxu2 %v5593_v28  ;;  %v5535_v28 = vld [vmem:[#allocation2 + $0x110] sm:$0xff] }
 0x297   : > { %v2282_v18 = vpop.f32.mrf.mxu3 }
 0x298   : > { %v2324_v41 = vadd.f32 %v2282_v18, %v6995_v63  ;;  %v2795_v10 = vpop.f32.mrf.mxu2  ;;  %v2556_v59 = vpop.f32.mrf.mxu1  ;;  %v5596_v18 = vld [vmem:[#allocation2 + $0x120] sm:$0xff] }
 0x29a   : > { %v2578_v46 = vadd.f32 %v7144_v12, %v2324_v41 }
 0x29c   : > { %v7180_v11 = vadd.f32 %v2790_v0, %v2578_v46 }
 0x29e   : > { %3561 = vmatmul.bf16.gmra.mxu1 %v5578_v58 }
 0x29f   : > { %v2284_v19 = vpop.f32.mrf.mxu3 }
 0x2a0   : > { %v2325_v55 = vadd.f32 %v2284_v19, %v7000_v31  ;;  %v2797_v5 = vpop.f32.mrf.mxu2  ;;  %v5579_v31 = vld [vmem:[#allocation2 + $0xc8] sm:$0xff] }
 0x2a2   : > { %v2579_v47 = vadd.f32 %v7150_v24, %v2325_v55  ;;  %v5581_v55 = vld [vmem:[#allocation2 + $0xd8] sm:$0xff] }
 0x2a4   : > { %3028 = vmatmul.bf16.gmra.mxu3 %v5533_v50  ;;  %v7184_v51 = vadd.f32 %v2792_v40, %v2579_v47  ;;  %v3268_v47 = vpop.f32.mrf.mxu0 }
 0x2a5   : > { %3795 = vmatmul.bf16.gmra.mxu2 %v5594_v13  ;;  %v5536_v13 = vld [vmem:[#allocation2 + $0x118] sm:$0xff] }
 0x2a7   : > { %v2287_v63 = vpop.f32.mrf.mxu3 }
 0x2a8   : > { %v2326_v12 = vadd.f32 %v2287_v63, %v7014_v45  ;;  %v2800_v29 = vpop.f32.mrf.mxu2  ;;  %v2558_v45 = vpop.f32.mrf.mxu1  ;;  %v5597_v63 = vld [vmem:[#allocation2 + $0x128] sm:$0xff] }
 0x2aa   : > { %v2580_v9 = vadd.f32 %v7157_v49, %v2326_v12 }
 0x2ac   : > { %v7188_v60 = vadd.f32 %v2795_v10, %v2580_v9 }
 0x2ae   : > { %3566 = vmatmul.bf16.gmra.mxu1 %v5579_v31 }
 0x2af   : > { %v2289_v56 = vpop.f32.mrf.mxu3 }
 0x2b0   : > { %v2327_v24 = vadd.f32 %v2289_v56, %v7018_v22  ;;  %v2802_v53 = vpop.f32.mrf.mxu2  ;;  %v2561_v32 = vpop.f32.mrf.mxu1 }
 0x2b1   : > { %v3270_v56 = vpop.f32.mrf.mxu0 }
 0x2b2   : > { %v2581_v37 = vadd.f32 %v2543_v25, %v2327_v24 }
 0x2b4   : > { %3033 = vmatmul.bf16.gmra.mxu3 %v5534_v33  ;;  %v7191_v3 = vadd.f32 %v2797_v5, %v2581_v37 }
 0x2b5   : > { %3800 = vmatmul.bf16.gmra.mxu2 %v5595_v38  ;;  %v5537_v38 = vld [vmem:[#allocation2 + $0x120] sm:$0xff] }
 0x2b7   : > { %v2292_v0 = vpop.f32.mrf.mxu3 }
 0x2b8   : > { %v2328_v49 = vadd.f32 %v2292_v0, %v7028_v48  ;;  %v2805_v27 = vpop.f32.mrf.mxu2  ;;  %v2563_v58 = vpop.f32.mrf.mxu1  ;;  %v5598_v0 = vld [vmem:[#allocation2 + $0x130] sm:$0xff] }
 0x2ba   : > { %v2582_v20 = vadd.f32 %v2546_v23, %v2328_v49 }
 0x2bc   : > { %v7194_v39 = vadd.f32 %v2800_v29, %v2582_v20 }
 0x2be   : > { %3571 = vmatmul.bf16.gmra.mxu1 %v5580_v15 }
 0x2bf   : > { %v2294_v40 = vpop.f32.mrf.mxu3 }
 0x2c0   : > { %v2329_v22 = vadd.f32 %v2294_v40, %v7041_v14  ;;  %v2807_v25 = vpop.f32.mrf.mxu2  ;;  %v3522_v29 = vpop.f32.mrf.mxu1 }
 0x2c2   : > { %v2583_v4 = vadd.f32 %v2548_v35, %v2329_v22 }
 0x2c4   : > { %3038 = vmatmul.bf16.gmra.mxu3 %v5535_v28  ;;  %v7197_v41 = vadd.f32 %v2802_v53, %v2583_v4 }
 0x2c5   : > { %3805 = vmatmul.bf16.gmra.mxu2 %v5596_v18  ;;  %v5538_v18 = vld [vmem:[#allocation2 + $0x128] sm:$0xff] }
 0x2c7   : > { %v2297_v10 = vpop.f32.mrf.mxu3 }
 0x2c8   : > { %v2330_v48 = vadd.f32 %v2297_v10, %v7051_v8  ;;  %v2810_v23 = vpop.f32.mrf.mxu2  ;;  %v3524_v53 = vpop.f32.mrf.mxu1 }
 0x2ca   : > { %v2584_v46 = vadd.f32 %v2551_v1, %v2330_v48  ;;  %v5599_v48 = vld [vmem:[#allocation2 + $0x138] sm:$0xff] }
 0x2cc   : > { %v7200_v19 = vadd.f32 %v2805_v27, %v2584_v46  ;;  %v3273_v27 = vpop.f32.mrf.mxu0 }
 0x2ce   : > { %3576 = vmatmul.bf16.gmra.mxu1 %v5581_v55 }
 0x2cf   : > { %v2299_v5 = vpop.f32.mrf.mxu3 }
 0x2d0   : > { %v2331_v14 = vadd.f32 %v2299_v5, %v7061_v6  ;;  %v2812_v35 = vpop.f32.mrf.mxu2  ;;  %v3527_v15 = vpop.f32.mrf.mxu1 }
 0x2d2   : > { %v2585_v50 = vadd.f32 %v2553_v52, %v2331_v14 }
 0x2d4   : > { %3043 = vmatmul.bf16.gmra.mxu3 %v5536_v13  ;;  %v7203_v12 = vadd.f32 %v2807_v25, %v2585_v50  ;;  %v3275_v25 = vpop.f32.mrf.mxu0 }
 0x2d5   : > { %3810 = vmatmul.bf16.gmra.mxu2 %v5597_v63 }
 0x2d7   : > { %v2302_v8 = vpop.f32.mrf.mxu3 }
 0x2d8   : > { %v2332_v1 = vadd.f32 %v2302_v8, %v7065_v21  ;;  %v2815_v9 = vpop.f32.mrf.mxu2  ;;  %v3529_v10 = vpop.f32.mrf.mxu1 }
 0x2da   : > { %v2586_v31 = vadd.f32 %v2556_v59, %v2332_v1 }
 0x2dc   : > { %v7206_v24 = vadd.f32 %v2810_v23, %v2586_v31 }
 0x2df   : > { %v2304_v6 = vpop.f32.mrf.mxu3 }
 0x2e0   : > { %v2333_v37 = vadd.f32 %v2304_v6, %v7067_v57  ;;  %v2817_v52 = vpop.f32.mrf.mxu2 }
 0x2e2   : > { %v2587_v33 = vadd.f32 %v2558_v45, %v2333_v37 }
 0x2e4   : > { %3048 = vmatmul.bf16.gmra.mxu3 %v5537_v38  ;;  %v7209_v49 = vadd.f32 %v2812_v35, %v2587_v33 }
 0x2e5   : > { %3815 = vmatmul.bf16.gmra.mxu2 %v5598_v0 }
 0x2e7   : > { %v2307_v20 = vpop.f32.mrf.mxu3 }
 0x2e8   : > { %v2334_v21 = vadd.f32 %v2307_v20, %v7077_v26  ;;  %v3776_v59 = vpop.f32.mrf.mxu2 }
 0x2ea   : > { %v2588_v40 = vadd.f32 %v2561_v32, %v2334_v21  ;;  %v3278_v32 = vpop.f32.mrf.mxu0 }
 0x2ec   : > { %v7212_v22 = vadd.f32 %v2815_v9, %v2588_v40  ;;  %v5600_v9 = vld [vmem:[#allocation2 + $0x140] sm:$0xff] }
 0x2ef   : > { %v2309_v4 = vpop.f32.mrf.mxu3 }
 0x2f0   : > { %v2335_v57 = vadd.f32 %v2309_v4, %v7081_v54  ;;  %v3778_v45 = vpop.f32.mrf.mxu2  ;;  %v7221_v54 = vld [vmem:[%s7757_s4] ss:$0 sm:$0xff] }
 0x2f2   : > { %v2589_v28 = vadd.f32 %v2563_v58, %v2335_v57  ;;  %v7223_v58 = vpop.f32.mrf.mxu1 }
 0x2f4   : > { %3053 = vmatmul.bf16.gmra.mxu3 %v5538_v18  ;;  %v7215_v23 = vadd.f32 %v2817_v52, %v2589_v28 }
 0x2f5   : > { %3820 = vmatmul.bf16.gmra.mxu2 %v5599_v48 }
 0x2f7   : > { %v3014_v46 = vpop.f32.mrf.mxu3 }
 0x2f8   : > { %v3074_v26 = vadd.f32 %v3014_v46, %v7093_v2  ;;  %v3781_v55 = vpop.f32.mrf.mxu2  ;;  %v5540_v46 = vld [vmem:[#allocation2 + $0x138] sm:$0xff] }
 0x2fa   : > { %v3328_v5 = vadd.f32 %v3268_v47, %v3074_v26  ;;  %v5539_v47 = vld [vmem:[#allocation2 + $0x130] sm:$0xff]  ;;  %v7232_v52 = vpop.f32.mrf.mxu1  ;;  %v5601_v26 = vld [vmem:[#allocation2 + $0x148] sm:$0xff] }
 0x2fc   : > { %v3582_v14 = vadd.f32 %v3522_v29, %v3328_v5  ;;  %v7230_v29 = vpop.f32.mrf.mxu0 }
 0x2fe   : > { %v3836_v35 = vadd.f32 %v3776_v59, %v3582_v14 }
 0x2ff   : > { %v3016_v50 = vpop.f32.mrf.mxu3 }
 0x300   : > { %v7226_v13 = vadd.f32 %v7221_v54, %v3836_v35  ;;  %v3075_v63 = vadd.f32 %v3016_v50, %v7108_v44  ;;  %v3783_v8 = vpop.f32.mrf.mxu2 }
 0x302   : > { %v3887_v2 = vsub.f32 0.0, %v7226_v13  ;;  %v3329_v1 = vadd.f32 %v3270_v56, %v3075_v63 }
 0x304   : > { %v3911_v31 = vmul.f32 1.442695, %v3887_v2  ;;  %v3583_v6 = vadd.f32 %v3524_v53, %v3329_v1  ;;  %3058 = vmatmul.bf16.gmra.mxu3 %v5539_v47  ;;  %v7239_v53 = vpop.f32.mrf.mxu0 }
 0x305   : > { %3825 = vmatmul.bf16.gmra.mxu2 %v5600_v9 }
 0x306   : > { %5845 = vpow2.f32 %v3911_v31  ;;  %v3837_v37 = vadd.f32 %v3778_v45, %v3583_v6 }
 0x307   : > { %v3019_v33 = vpop.f32.mrf.mxu3 }
 0x308   : > { %v7235_v38 = vadd.f32 %v7221_v54, %v3837_v37  ;;  %v3076_v44 = vadd.f32 %v3019_v33, %v7120_v43  ;;  %v3786_v0 = vpop.f32.mrf.mxu2 }
 0x30a   : > { %v3888_v56 = vsub.f32 0.0, %v7235_v38  ;;  %v3330_v20 = vadd.f32 %v3273_v27, %v3076_v44  ;;  %v7250_v27 = vpop.f32.mrf.mxu1 }
 0x30c   : > { %v5846_v21 = vpop.eup %5845  ;;  %v3913_v59 = vmul.f32 1.442695, %v3888_v56  ;;  %v3584_v40 = vadd.f32 %v3527_v15, %v3330_v20  ;;  %v7257_v63 = vpop.f32.mrf.mxu0 }
 0x30d   : > { %v7241_v4 = vadd.f32 1.0, %v5846_v21 }
 0x30e   : > { %5847 = vpow2.f32 %v3913_v59  ;;  %v3838_v57 = vadd.f32 %v3781_v55, %v3584_v40 }
 0x30f   : > { %5849 = vrcp.f32 %v7241_v4  ;;  %v3021_v45 = vpop.f32.mrf.mxu3  ;;  %vm3988_vm14 = vweird.f32 %v7241_v4 }
 0x310   : > { %v7245_v28 = vadd.f32 %v7221_v54, %v3838_v57  ;;  %v3077_v43 = vadd.f32 %v3021_v45, %v7132_v16  ;;  %v7248_v18 = vpop.f32.mrf.mxu2 }
 0x312   : > { %v3889_v15 = vsub.f32 0.0, %v7245_v28  ;;  %v3331_v48 = vadd.f32 %v3275_v25, %v3077_v43  ;;  %v7269_v6 = vpop.f32.mrf.mxu1  ;;  %v5541_v43 = vld [vmem:[#allocation2 + $0x140] sm:$0xff] }
 0x314   : > { %v5848_v5 = vpop.eup %5847  ;;  %v3915_v14 = vmul.f32 1.442695, %v3889_v15  ;;  %v3585_v55 = vadd.f32 %v3529_v10, %v3331_v48  ;;  %3063 = vmatmul.bf16.gmra.mxu3 %v5540_v46  ;;  %v7282_v57 = vpop.f32.mrf.mxu0  ;;  %v3992_v15 = vand.u32 2147483647, %v7241_v4 }
 0x315   : > { %v7253_v35 = vpop.eup %5849  ;;  %v7255_v50 = vadd.f32 1.0, %v5848_v5  ;;  %3830 = vmatmul.bf16.gmra.mxu2 %v5601_v26 }
 0x316   : > { %5851 = vpow2.f32 %v3915_v14  ;;  %v3839_v16 = vadd.f32 %v3783_v8, %v3585_v55  ;;  %v3984_v25 = vmul.f32 %v7253_v35, %v7241_v4  ;;  %vm3989_vm12 = vweird.f32 %v7253_v35 }
 0x317   : > { %5853 = vrcp.f32 %v7255_v50  ;;  %v3024_v2 = vpop.f32.mrf.mxu3  ;;  %vm7301_vm8 = vmor %vm3988_vm14, %vm3989_vm12  ;;  %vm7305_vm9 = vcmp.eq.f32.partialorder %v3992_v15, 8.507059e+37  ;;  %vm4002_vm10 = vweird.f32 %v7255_v50 }
 0x318   : > { %v7263_v1 = vadd.f32 %v7221_v54, %v3839_v16  ;;  %v3078_v10 = vadd.f32 %v3024_v2, %v7142_v34  ;;  %v7266_v47 = vpop.f32.mrf.mxu2  ;;  %v3985_v37 = vsub.f32 1.0, %v3984_v25 }
 0x31a   : > { %v3890_v9 = vsub.f32 0.0, %v7263_v1  ;;  %v3332_v31 = vadd.f32 %v3278_v32, %v3078_v10  ;;  %v3986_v21 = vmul.f32 %v7253_v35, %v3985_v37  ;;  %v7293_v55 = vpop.f32.mrf.mxu1 }
 0x31c   : > { %v5852_v8 = vpop.eup %5851  ;;  %v3917_v33 = vmul.f32 1.442695, %v3890_v9  ;;  %v3586_v44 = vadd.f32 %v7223_v58, %v3332_v31  ;;  %v3987_v26 = vadd.f32 %v7253_v35, %v3986_v21 }
 0x31d   : > { %v7272_v56 = vpop.eup %5853  ;;  %v7274_v20 = vadd.f32 1.0, %v5852_v8 }
 0x31e   : > { %5855 = vpow2.f32 %v3917_v33  ;;  %v3998_v32 = vmul.f32 %v7272_v56, %v7255_v50  ;;  %v3840_v59 = vadd.f32 %v3786_v0, %v3586_v44  ;;  %vm4003_vm13 = vweird.f32 %v7272_v56 }
 0x31f   : > { %5857 = vrcp.f32 %v7274_v20  ;;  %v3026_v34 = vpop.f32.mrf.mxu3  ;;  %v4022_v44 = vand.u32 2147483648, %v7274_v20  ;;  %vm4016_vm15 = vweird.f32 %v7274_v20  ;;  %vm7344_vm2 = vmor %vm4002_vm10, %vm4003_vm13 }
 0x320   : > { %v7280_v40 = vpop.f32.mrf.mxu2  ;;  %v3079_v58 = vadd.f32 %v3026_v34, %v7148_v30  ;;  %v7286_v45 = vadd.f32 %v7221_v54, %v3840_v59  ;;  %v3999_v0 = vsub.f32 1.0, %v3998_v32  ;;  %v3994_v30 = vand.u32 2147483648, %v7241_v4 }
 0x321   : > { %v4020_v59 = vand.u32 2147483647, %v7274_v20 }
 0x322   : > { %v3333_v48 = vadd.f32 %v7230_v29, %v3079_v58  ;;  %v3891_v5 = vsub.f32 0.0, %v7286_v45  ;;  %v4000_v4 = vmul.f32 %v7272_v56, %v3999_v0  ;;  %v3995_v33 = vor.u32 1.1754944e-38, %v3994_v30  ;;  %v7338_v10 = vpop.f32.mrf.mxu1 }
 0x323   : > { %v4023_v0 = vor.u32 1.1754944e-38, %v4022_v44  ;;  %vm4021_vm1 = vcmp.eq.f32.partialorder %v4020_v59, 8.507059e+37 }
 0x324   : > { %v5856_v46 = vpop.eup %5855  ;;  %3068 = vmatmul.bf16.gmra.mxu3 %v5541_v43  ;;  %v3587_v2 = vadd.f32 %v7232_v52, %v3333_v48  ;;  %v3919_v25 = vmul.f32 1.442695, %v3891_v5  ;;  %v3991_v52 = vsel %vm7301_vm8, %v7253_v35, %v3987_v26  ;;  %v7321_v35 = vpop.f32.mrf.mxu0  ;;  %v4006_v43 = vand.u32 2147483647, %v7255_v50 }
 0x325   : > { %v5858_v14 = vpop.eup %5857  ;;  %v7296_v16 = vadd.f32 1.0, %v5856_v46  ;;  %v3996_v58 = vsel %vm7305_vm9, %v3995_v33, %v3991_v52  ;;  %v4008_v26 = vand.u32 2147483648, %v7255_v50 }
 0x326   : > { %v4012_v29 = vmul.f32 %v5858_v14, %v7274_v20  ;;  %v3841_v34 = vadd.f32 %v7248_v18, %v3587_v2  ;;  %vm4017_vm11 = vweird.f32 %v5858_v14  ;;  %vm4007_vm4 = vcmp.eq.f32.partialorder %v4006_v43, 8.507059e+37 }
 0x327   : > { %5859 = vrcp.f32 %v7296_v16  ;;  %v3029_v31 = vpop.f32.mrf.mxu3  ;;  %vm4018_vm0 = vmor %vm4016_vm15, %vm4017_vm11  ;;  %v4034_v33 = vand.u32 2147483647, %v7296_v16  ;;  %v4036_v44 = vand.u32 2147483648, %v7296_v16  ;;  %vm4030_vm5 = vweird.f32 %v7296_v16 }
 0x328   : > { %v4013_v8 = vsub.f32 1.0, %v4012_v29  ;;  %5861 = vpow2.f32 %v3919_v25  ;;  %v7314_v37 = vpop.f32.mrf.mxu2  ;;  %v3080_v21 = vadd.f32 %v3029_v31, %v7154_v62  ;;  %v7327_v15 = vadd.f32 %v7221_v54, %v3841_v34 }
 0x329   : > { %v4001_v62 = vadd.f32 %v7272_v56, %v4000_v4  ;;  %v4319_v29 = vmul.f32 %v3996_v58, %v7226_v13  ;;  %vm4035_vm7 = vcmp.eq.f32.partialorder %v4034_v33, 8.507059e+37 }
 0x32a   : > { %v4014_v32 = vmul.f32 %v5858_v14, %v4013_v8  ;;  %v3334_v18 = vadd.f32 %v7239_v53, %v3080_v21  ;;  %v3892_v5 = vsub.f32 0.0, %v7327_v15 }
 0x32b   : > { %v4005_v52 = vsel %vm7344_vm2, %v7272_v56, %v4001_v62  ;;  %v5561_v56 = vld [vmem:[#allocation2 + $0x68] sm:$0xff] }
 0x32c   : > { %v4015_v48 = vadd.f32 %v5858_v14, %v4014_v32  ;;  %v3588_v30 = vadd.f32 %v7250_v27, %v3334_v18  ;;  %v3921_v27 = vmul.f32 1.442695, %v3892_v5  ;;  %v7367_v18 = vpop.f32.mrf.mxu0 }
 0x32d   : > { %v5860_v46 = vpop.eup %5859 }
 0x32e   : > { %v5862_v2 = vpop.eup %5861  ;;  %v4019_v53 = vsel %vm4018_vm0, %v5858_v14, %v4015_v48  ;;  %v4026_v25 = vmul.f32 %v5860_v46, %v7296_v16  ;;  %v3842_v13 = vadd.f32 %v7266_v47, %v3588_v30  ;;  %vm4031_vm3 = vweird.f32 %v5860_v46 }
 0x32f   : > { %v4024_v9 = vsel %vm4021_vm1, %v4023_v0, %v4019_v53  ;;  %v7348_v31 = vadd.f32 1.0, %v5862_v2  ;;  %v3031_v14 = vpop.f32.mrf.mxu3  ;;  %vm4032_vm6 = vmor %vm4030_vm5, %vm4031_vm3  ;;  %v4037_v48 = vor.u32 1.1754944e-38, %v4036_v44 }
 0x330   : > { %v4321_v4 = vmul.f32 %v4024_v9, %v7245_v28  ;;  %v4027_v8 = vsub.f32 1.0, %v4026_v25  ;;  %v3081_v50 = vadd.f32 %v3031_v14, %v7160_v36  ;;  %v7360_v47 = vadd.f32 %v7221_v54, %v3842_v13  ;;  %v7362_v32 = vpop.f32.mrf.mxu2  ;;  %v7376_v25 = vpop.f32.mrf.mxu1 }
 0x331   : > { %5863 = vrcp.f32 %v7348_v31  ;;  %v4009_v28 = vor.u32 1.1754944e-38, %v4008_v26  ;;  %vm4044_vm14 = vweird.f32 %v7348_v31 }
 0x332   : > { %v4343_v34 = vmax.f32 %v4319_v29, %v4321_v4  ;;  %v4028_v21 = vmul.f32 %v5860_v46, %v4027_v8  ;;  %5865 = vpow2.f32 %v3921_v27  ;;  %v3335_v59 = vadd.f32 %v7257_v63, %v3081_v50 }
 0x333   : > { %v3893_v58 = vsub.f32 0.0, %v7360_v47  ;;  %v4010_v62 = vsel %vm4007_vm4, %v4009_v28, %v4005_v52 }
 0x334   : > { %4355 = vst [vmem:[#allocation3] sm:$0xff] %v4343_v34  ;;  %v4029_v36 = vadd.f32 %v5860_v46, %v4028_v21  ;;  %3322 = vmatmul.bf16.vlgmr.msrb.gmra.mxu3 %v5561_v56  ;;  %v3589_v0 = vadd.f32 %v7269_v6, %v3335_v59  ;;  %v4320_v29 = vmul.f32 %v4010_v62, %v7235_v38  ;;  %v7392_v8 = vpop.f32.mrf.mxu0 }
 0x335   : > { %v3923_v26 = vmul.f32 1.442695, %v3893_v58 }
 0x336   : > { %v4033_v5 = vsel %vm4032_vm6, %v5860_v46, %v4029_v36  ;;  %v3843_v30 = vadd.f32 %v7280_v40, %v3589_v0  ;;  %v4048_v36 = vand.u32 2147483647, %v7348_v31 }
 0x337   : > { %v7371_v63 = vpop.eup %5863  ;;  %v4038_v43 = vsel %vm4035_vm7, %v4037_v48, %v4033_v5  ;;  %v3034_v16 = vpop.f32.mrf.mxu3  ;;  %5867 = vpow2.f32 %v3923_v26  ;;  %v4050_v5 = vand.u32 2147483648, %v7348_v31 }
 0x338   : > { %v5866_v2 = vpop.eup %5865  ;;  %v4322_v53 = vmul.f32 %v4038_v43, %v7263_v1  ;;  %v7381_v6 = vadd.f32 %v7221_v54, %v3843_v30  ;;  %v3082_v46 = vadd.f32 %v3034_v16, %v7164_v42  ;;  %v4040_v40 = vmul.f32 %v7371_v63, %v7348_v31  ;;  %v7389_v27 = vpop.f32.mrf.mxu2 }
 0x339   : > { %v7378_v20 = vadd.f32 1.0, %v5866_v2  ;;  %v7403_v21 = vpop.f32.mrf.mxu1  ;;  %vm4045_vm12 = vweird.f32 %v7371_v63  ;;  %vm7433_vm8 = vcmp.eq.f32.partialorder %v4048_v36, 8.507059e+37 }
 0x33a   : > { %v4344_v9 = vmax.f32 %v4320_v29, %v4322_v53  ;;  %v3894_v38 = vsub.f32 0.0, %v7381_v6  ;;  %v3336_v1 = vadd.f32 %v7282_v57, %v3082_v46  ;;  %v4041_v14 = vsub.f32 1.0, %v4040_v40  ;;  %vm7440_vm9 = vmor %vm4044_vm14, %vm4045_vm12 }
 0x33b   : > { %5869 = vrcp.f32 %v7378_v20  ;;  %vm4058_vm11 = vweird.f32 %v7378_v20 }
 0x33c   : > { %4356 = vst [vmem:[#allocation3 + $0x8] sm:$0xff] %v4344_v9  ;;  %v3925_v52 = vmul.f32 1.442695, %v3894_v38  ;;  %v3590_v4 = vadd.f32 %v7293_v55, %v3336_v1  ;;  %v4042_v57 = vmul.f32 %v7371_v63, %v4041_v14  ;;  %v7430_v46 = vpop.f32.mrf.mxu0 }
 0x33d   : > { %v5868_v13 = vpop.eup %5867 }
 0x33e   : > { %v7395_v42 = vadd.f32 1.0, %v5868_v13  ;;  %5871 = vpow2.f32 %v3925_v52  ;;  %v3844_v33 = vadd.f32 %v7314_v37, %v3590_v4  ;;  %v4043_v0 = vadd.f32 %v7371_v63, %v4042_v57 }
 0x33f   : > { %v3036_v50 = vpop.f32.mrf.mxu3 }
 0x340   : > { %v3083_v44 = vadd.f32 %v3036_v50, %v7168_v7  ;;  %5873 = vrcp.f32 %v7395_v42  ;;  %v7413_v7 = vadd.f32 %v7221_v54, %v3844_v33  ;;  %v7423_v26 = vpop.f32.mrf.mxu2  ;;  %v4047_v31 = vsel %vm7440_vm9, %v7371_v63, %v4043_v0 }
 0x341   : > { %v7399_v34 = vpop.eup %5869  ;;  %v4078_v13 = vand.u32 2147483648, %v7395_v42  ;;  %v4076_v4 = vand.u32 2147483647, %v7395_v42  ;;  %v7455_v33 = vpop.f32.mrf.mxu1  ;;  %v4064_v63 = vand.u32 2147483648, %v7378_v20  ;;  %vm4072_vm13 = vweird.f32 %v7395_v42 }
 0x342   : > { %v4054_v37 = vmul.f32 %v7399_v34, %v7378_v20  ;;  %v3337_v28 = vadd.f32 %v7321_v35, %v3083_v44  ;;  %v3895_v58 = vsub.f32 0.0, %v7413_v7  ;;  %v4062_v44 = vand.u32 2147483647, %v7378_v20 }
 0x343   : > { %v4367_v55 = vld [vmem:[#allocation3] ss:$2 sm:$0xff]  ;;  %v4379_v56 = vld [vmem:[#allocation3 + $0x1] ss:$2 sm:$0xff]  ;;  %vm4059_vm15 = vweird.f32 %v7399_v34  ;;  %vm4077_vm1 = vcmp.eq.f32.partialorder %v4076_v4, 8.507059e+37 }
 0x344   : > { %v4390_v59 = vmax.f32 %v4367_v55, %v4379_v56  ;;  %v3591_v62 = vadd.f32 %v7338_v10, %v3337_v28  ;;  %v5872_v48 = vpop.eup %5871  ;;  %v4055_v30 = vsub.f32 1.0, %v4054_v37  ;;  %v3927_v16 = vmul.f32 1.442695, %v3895_v58  ;;  %vm7480_vm2 = vmor %vm4058_vm11, %vm4059_vm15 }
 0x345   : > { %v7425_v35 = vadd.f32 1.0, %v5872_v48  ;;  %vm4063_vm4 = vcmp.eq.f32.partialorder %v4062_v44, 8.507059e+37 }
 0x346   : > { %4396 = vst [vmem:[%s7408_s19] sm:$0xff] %v4390_v59  ;;  %v5874_v43 = vpop.eup %5873  ;;  %v3845_v2 = vadd.f32 %v7362_v32, %v3591_v62  ;;  %v4051_v32 = vor.u32 1.1754944e-38, %v4050_v5  ;;  %v4056_v1 = vmul.f32 %v7399_v34, %v4055_v30  ;;  %v4079_v59 = vor.u32 1.1754944e-38, %v4078_v13 }
 0x347   : > { %v3039_v29 = vpop.f32.mrf.mxu3  ;;  %v4068_v10 = vmul.f32 %v5874_v43, %v7395_v42  ;;  %5875 = vrcp.f32 %v7425_v35  ;;  %vm4073_vm10 = vweird.f32 %v5874_v43  ;;  %vm4086_vm5 = vweird.f32 %v7425_v35 }
 0x348   : > { %v3084_v53 = vadd.f32 %v3039_v29, %v7172_v17  ;;  %5877 = vpow2.f32 %v3927_v16  ;;  %v7445_v17 = vadd.f32 %v7221_v54, %v3845_v2  ;;  %v4052_v55 = vsel %vm7433_vm8, %v4051_v32, %v4047_v31  ;;  %vm4074_vm0 = vmor %vm4072_vm13, %vm4073_vm10  ;;  %v3806_v0 = vpop.f32.mrf.mxu2 }
 0x349   : > { %v4069_v38 = vsub.f32 1.0, %v4068_v10  ;;  %v4057_v28 = vadd.f32 %v7399_v34, %v4056_v1  ;;  %v4323_v2 = vmul.f32 %v4052_v55, %v7286_v45  ;;  %v4090_v10 = vand.u32 2147483647, %v7425_v35  ;;  %v3554_v13 = vpop.f32.mrf.mxu1 }
 0x34a   : > { %v3338_v14 = vadd.f32 %v7367_v18, %v3084_v53  ;;  %v3896_v50 = vsub.f32 0.0, %v7445_v17  ;;  %v3300_v53 = vpop.f32.mrf.mxu0  ;;  %v4092_v45 = vand.u32 2147483648, %v7425_v35 }
 0x34b   : > { %v4070_v52 = vmul.f32 %v5874_v43, %v4069_v38  ;;  %vm4091_vm7 = vcmp.eq.f32.partialorder %v4090_v10, 8.507059e+37 }
 0x34c   : > { %v3592_v57 = vadd.f32 %v7376_v25, %v3338_v14  ;;  %v3929_v56 = vmul.f32 1.442695, %v3896_v50 }
 0x34d   : > { %v4071_v18 = vadd.f32 %v5874_v43, %v4070_v52  ;;  %v5876_v37 = vpop.eup %5875  ;;  %v4093_v52 = vor.u32 1.1754944e-38, %v4092_v45 }
 0x34e   : > { %v3846_v36 = vadd.f32 %v7389_v27, %v3592_v57  ;;  %v5878_v62 = vpop.eup %5877  ;;  %v4082_v48 = vmul.f32 %v5876_v37, %v7425_v35  ;;  %5879 = vpow2.f32 %v3929_v56  ;;  %vm4087_vm3 = vweird.f32 %v5876_v37 }
 0x34f   : > { %v3041_v58 = vpop.f32.mrf.mxu3  ;;  %v4075_v25 = vsel %vm4074_vm0, %v5874_v43, %v4071_v18  ;;  %v7469_v5 = vadd.f32 1.0, %v5878_v62  ;;  %vm4088_vm6 = vmor %vm4086_vm5, %vm4087_vm3 }
 0x350   : > { %v4080_v42 = vsel %vm4077_vm1, %v4079_v59, %v4075_v25  ;;  %v7472_v30 = vadd.f32 %v7221_v54, %v3846_v36  ;;  %v3085_v16 = vadd.f32 %v3041_v58, %v7176_v61  ;;  %v4083_v29 = vsub.f32 1.0, %v4082_v48  ;;  %v3808_v18 = vpop.f32.mrf.mxu2 }
 0x351   : > { %v4325_v43 = vmul.f32 %v4080_v42, %v7360_v47  ;;  %v4061_v61 = vsel %vm7480_vm2, %v7399_v34, %v4057_v28  ;;  %5881 = vrcp.f32 %v7469_v5  ;;  %v4065_v47 = vor.u32 1.1754944e-38, %v4064_v63 }
 0x352   : > { %v4084_v9 = vmul.f32 %v5876_v37, %v4083_v29  ;;  %v3897_v40 = vsub.f32 0.0, %v7472_v30  ;;  %v3339_v32 = vadd.f32 %v7392_v8, %v3085_v16  ;;  %v3557_v16 = vpop.f32.mrf.mxu1  ;;  %vm4100_vm14 = vweird.f32 %v7469_v5 }
 0x353   : > { %v4345_v20 = vmax.f32 %v4323_v2, %v4325_v43  ;;  %v4066_v14 = vsel %vm4063_vm4, %v4065_v47, %v4061_v61 }
 0x354   : > { %v5880_v38 = vpop.eup %5879  ;;  %v4085_v31 = vadd.f32 %v5876_v37, %v4084_v9  ;;  %v3931_v1 = vmul.f32 1.442695, %v3897_v40  ;;  %v3593_v34 = vadd.f32 %v7403_v21, %v3339_v32  ;;  %v4324_v21 = vmul.f32 %v4066_v14, %v7327_v15 }
 0x355   : > { %4357 = vst [vmem:[#allocation3 + $0x10] sm:$0xff] %v4345_v20  ;;  %v7500_v35 = vadd.f32 1.0, %v5880_v38 }
 0x356   : > { %v4089_v50 = vsel %vm4088_vm6, %v5876_v37, %v4085_v31  ;;  %5883 = vpow2.f32 %v3931_v1  ;;  %v3847_v8 = vadd.f32 %v7423_v26, %v3593_v34  ;;  %v4104_v31 = vand.u32 2147483647, %v7469_v5 }
 0x357   : > { %v3044_v4 = vpop.f32.mrf.mxu3  ;;  %v7498_v63 = vpop.eup %5881  ;;  %v4094_v57 = vsel %vm4091_vm7, %v4093_v52, %v4089_v50  ;;  %5885 = vrcp.f32 %v7500_v35  ;;  %v4106_v34 = vand.u32 2147483648, %v7469_v5  ;;  %vm4114_vm1 = vweird.f32 %v7500_v35 }
 0x358   : > { %v3086_v44 = vadd.f32 %v3044_v4, %v7180_v11  ;;  %v4326_v55 = vmul.f32 %v4094_v57, %v7381_v6  ;;  %v4096_v56 = vmul.f32 %v7498_v63, %v7469_v5  ;;  %v7507_v37 = vadd.f32 %v7221_v54, %v3847_v8  ;;  %v3303_v11 = vpop.f32.mrf.mxu0  ;;  %v3811_v29 = vpop.f32.mrf.mxu2 }
 0x359   : > { %vm4101_vm12 = vweird.f32 %v7498_v63  ;;  %vm4105_vm10 = vcmp.eq.f32.partialorder %v4104_v31, 8.507059e+37 }
 0x35a   : > { %v3340_v26 = vadd.f32 %v7430_v46, %v3086_v44  ;;  %v4346_v28 = vmax.f32 %v4324_v21, %v4326_v55  ;;  %v3898_v59 = vsub.f32 0.0, %v7507_v37  ;;  %v4097_v6 = vsub.f32 1.0, %v4096_v56  ;;  %vm7535_vm8 = vmor %vm4100_vm14, %vm4101_vm12  ;;  %v3559_v44 = vpop.f32.mrf.mxu1 }
 0x35b   : > { %v4107_v56 = vor.u32 1.1754944e-38, %v4106_v34 }
 0x35c   : > { %v3594_v36 = vadd.f32 %v7455_v33, %v3340_v26  ;;  %v5884_v15 = vpop.eup %5883  ;;  %4358 = vst [vmem:[#allocation3 + $0x18] sm:$0xff] %v4346_v28  ;;  %v3933_v62 = vmul.f32 1.442695, %v3898_v59  ;;  %v4098_v27 = vmul.f32 %v7498_v63, %v4097_v6 }
 0x35d   : > { %v3969_v58 = vadd.f32 1.0, %v5884_v15  ;;  %v7517_v2 = vpop.eup %5885 }
 0x35e   : > { %v3848_v25 = vadd.f32 %v3806_v0, %v3594_v36  ;;  %v4099_v32 = vadd.f32 %v7498_v63, %v4098_v27  ;;  %vm4115_vm0 = vweird.f32 %v7517_v2 }
 0x35f   : > { %v3046_v48 = vpop.f32.mrf.mxu3  ;;  %5887 = vrcp.f32 %v3969_v58  ;;  %v4132_v21 = vand.u32 2147483647, %v3969_v58  ;;  %v4134_v5 = vand.u32 2147483648, %v3969_v58  ;;  %vm4128_vm11 = vweird.f32 %v3969_v58  ;;  %vm7562_vm2 = vmor %vm4114_vm1, %vm4115_vm0 }
 0x360   : > { %v3087_v42 = vadd.f32 %v3046_v48, %v7184_v51  ;;  %5889 = vpow2.f32 %v3933_v62  ;;  %v7515_v46 = vadd.f32 %v7221_v54, %v3848_v25  ;;  %v4110_v51 = vmul.f32 %v7517_v2, %v7500_v35  ;;  %v3305_v40 = vpop.f32.mrf.mxu0  ;;  %v3813_v15 = vpop.f32.mrf.mxu2 }
 0x361   : > { %v4103_v57 = vsel %vm7535_vm8, %v7498_v63, %v4099_v32  ;;  %vm4133_vm15 = vcmp.eq.f32.partialorder %v4132_v21, 8.507059e+37  ;;  %v4135_v62 = vor.u32 1.1754944e-38, %v4134_v5 }
 0x362   : > { %v3341_v33 = vadd.f32 %v3300_v53, %v3087_v42  ;;  %v3899_v43 = vsub.f32 0.0, %v7515_v46  ;;  %v4111_v50 = vsub.f32 1.0, %v4110_v51  ;;  %v4108_v63 = vsel %vm4105_vm10, %v4107_v56, %v4103_v57  ;;  %v3562_v32 = vpop.f32.mrf.mxu1 }
 0x363   : > { %v4369_v10 = vld [vmem:[#allocation3 + $0x10] ss:$2 sm:$0xff]  ;;  %v4381_v0 = vld [vmem:[#allocation3 + $0x11] ss:$2 sm:$0xff] }
 0x364   : > { %v3595_v61 = vadd.f32 %v3554_v13, %v3341_v33  ;;  %v4391_v45 = vmax.f32 %v4369_v10, %v4381_v0  ;;  %v3935_v20 = vmul.f32 1.442695, %v3899_v43  ;;  %v4112_v28 = vmul.f32 %v7517_v2, %v4111_v50 }
 0x365   : > { %v5888_v9 = vpop.eup %5887  ;;  %v4118_v43 = vand.u32 2147483647, %v7500_v35 }
 0x366   : > { %v3849_v47 = vadd.f32 %v3808_v18, %v3595_v61  ;;  %v5890_v38 = vpop.eup %5889  ;;  %4397 = vst [vmem:[%s7408_s19 + $0x8] sm:$0xff] %v4391_v45  ;;  %v4124_v1 = vmul.f32 %v5888_v9, %v3969_v58  ;;  %5891 = vpow2.f32 %v3935_v20  ;;  %vm4129_vm9 = vweird.f32 %v5888_v9 }
 0x367   : > { %v3049_v53 = vpop.f32.mrf.mxu3  ;;  %v7529_v13 = vadd.f32 1.0, %v5890_v38  ;;  %vm4130_vm13 = vmor %vm4128_vm11, %vm4129_vm9  ;;  %v4113_v0 = vadd.f32 %v7517_v2, %v4112_v28  ;;  %vm7566_vm3 = vcmp.eq.f32.partialorder %v4118_v43, 8.507059e+37 }
 0x368   : > { %v7532_v14 = vadd.f32 %v7221_v54, %v3849_v47  ;;  %v3088_v52 = vadd.f32 %v3049_v53, %v7188_v60  ;;  %v4125_v8 = vsub.f32 1.0, %v4124_v1  ;;  %v3308_v33 = vpop.f32.mrf.mxu0 }
 0x369   : > { %5893 = vrcp.f32 %v7529_v13  ;;  %v4148_v47 = vand.u32 2147483648, %v7529_v13  ;;  %v4146_v1 = vand.u32 2147483647, %v7529_v13  ;;  %vm4142_vm5 = vweird.f32 %v7529_v13 }
 0x36a   : > { %v4126_v55 = vmul.f32 %v5888_v9, %v4125_v8  ;;  %v3900_v18 = vsub.f32 0.0, %v7532_v14  ;;  %v3342_v60 = vadd.f32 %v3303_v11, %v3088_v52 }
 0x36b   : > { %vm4147_vm7 = vcmp.eq.f32.partialorder %v4146_v1, 8.507059e+37 }
 0x36c   : > { %v5892_v26 = vpop.eup %5891  ;;  %v4127_v59 = vadd.f32 %v5888_v9, %v4126_v55  ;;  %v3937_v36 = vmul.f32 1.442695, %v3900_v18  ;;  %v3596_v6 = vadd.f32 %v3557_v16, %v3342_v60  ;;  %v4327_v16 = vmul.f32 %v4108_v63, %v7413_v7 }
 0x36d   : > { %v7545_v25 = vadd.f32 1.0, %v5892_v26  ;;  %v4149_v18 = vor.u32 1.1754944e-38, %v4148_v47 }
 0x36e   : > { %v4131_v42 = vsel %vm4130_vm13, %v5888_v9, %v4127_v59  ;;  %5895 = vpow2.f32 %v3937_v36  ;;  %v3850_v11 = vadd.f32 %v3811_v29, %v3596_v6  ;;  %v4120_v29 = vand.u32 2147483648, %v7500_v35 }
 0x36f   : > { %v3051_v48 = vpop.f32.mrf.mxu3  ;;  %v5894_v58 = vpop.eup %5893  ;;  %v4136_v10 = vsel %vm4133_vm15, %v4135_v62, %v4131_v42  ;;  %5897 = vrcp.f32 %v7545_v25  ;;  %v4117_v35 = vsel %vm7562_vm2, %v7517_v2, %v4113_v0  ;;  %vm4156_vm14 = vweird.f32 %v7545_v25 }
 0x370   : > { %v3089_v27 = vadd.f32 %v3051_v48, %v7191_v3  ;;  %v4329_v61 = vmul.f32 %v4136_v10, %v7472_v30  ;;  %v4138_v45 = vmul.f32 %v5894_v58, %v7529_v13  ;;  %v7557_v3 = vadd.f32 %v7221_v54, %v3850_v11  ;;  %v3816_v2 = vpop.f32.mrf.mxu2  ;;  %v3310_v13 = vpop.f32.mrf.mxu0 }
 0x371   : > { %vm4143_vm4 = vweird.f32 %v5894_v58  ;;  %v4121_v52 = vor.u32 1.1754944e-38, %v4120_v29  ;;  %v3564_v42 = vpop.f32.mrf.mxu1 }
 0x372   : > { %v3343_v51 = vadd.f32 %v3305_v40, %v3089_v27  ;;  %v4347_v20 = vmax.f32 %v4327_v16, %v4329_v61  ;;  %v4139_v9 = vsub.f32 1.0, %v4138_v45  ;;  %v3901_v53 = vsub.f32 0.0, %v7557_v3  ;;  %vm4144_vm6 = vmor %vm4142_vm5, %vm4143_vm4 }
 0x373   : > { %v4122_v55 = vsel %vm7566_vm3, %v4121_v52, %v4117_v35 }
 0x374   : > { %v3597_v40 = vadd.f32 %v3559_v44, %v3343_v51  ;;  %v5896_v38 = vpop.eup %5895  ;;  %4359 = vst [vmem:[#allocation3 + $0x20] sm:$0xff] %v4347_v20  ;;  %v4140_v31 = vmul.f32 %v5894_v58, %v4139_v9  ;;  %v3939_v50 = vmul.f32 1.442695, %v3901_v53  ;;  %v4328_v59 = vmul.f32 %v4122_v55, %v7445_v17 }
 0x375   : > { %v7576_v34 = vpop.eup %5897  ;;  %v7578_v4 = vadd.f32 1.0, %v5896_v38  ;;  %v4160_v9 = vand.u32 2147483647, %v7545_v25 }
 0x376   : > { %v3851_v8 = vadd.f32 %v3813_v15, %v3597_v40  ;;  %v4141_v21 = vadd.f32 %v5894_v58, %v4140_v31  ;;  %v4152_v44 = vmul.f32 %v7576_v34, %v7545_v25  ;;  %vm4157_vm12 = vweird.f32 %v7576_v34 }
 0x377   : > { %v3054_v57 = vpop.f32.mrf.mxu3  ;;  %5899 = vrcp.f32 %v7578_v4  ;;  %vm7613_vm8 = vmor %vm4156_vm14, %vm4157_vm12  ;;  %vm4161_vm9 = vcmp.eq.f32.partialorder %v4160_v9, 8.507059e+37  ;;  %vm4170_vm10 = vweird.f32 %v7578_v4 }
 0x378   : > { %v3090_v5 = vadd.f32 %v3054_v57, %v7194_v39  ;;  %v4145_v60 = vsel %vm4144_vm6, %v5894_v58, %v4141_v21  ;;  %5901 = vpow2.f32 %v3939_v50  ;;  %v7588_v56 = vadd.f32 %v7221_v54, %v3851_v8  ;;  %v3818_v16 = vpop.f32.mrf.mxu2  ;;  %v3313_v45 = vpop.f32.mrf.mxu0 }
 0x379   : > { %v4150_v26 = vsel %vm4147_vm7, %v4149_v18, %v4145_v60  ;;  %v4153_v36 = vsub.f32 1.0, %v4152_v44  ;;  %v3567_v52 = vpop.f32.mrf.mxu1 }
 0x37a   : > { %v3344_v28 = vadd.f32 %v3308_v33, %v3090_v5  ;;  %v4330_v39 = vmul.f32 %v4150_v26, %v7507_v37  ;;  %v3902_v15 = vsub.f32 0.0, %v7588_v56 }
 0x37b   : > { %v4154_v43 = vmul.f32 %v7576_v34, %v4153_v36 }
 0x37c   : > { %v3598_v6 = vadd.f32 %v3562_v32, %v3344_v28  ;;  %v4348_v63 = vmax.f32 %v4328_v59, %v4330_v39  ;;  %v3941_v62 = vmul.f32 1.442695, %v3902_v15  ;;  %v4162_v32 = vand.u32 2147483648, %v7545_v25 }
 0x37d   : > { %v7593_v48 = vpop.eup %5899  ;;  %v4155_v29 = vadd.f32 %v7576_v34, %v4154_v43  ;;  %v4176_v59 = vand.u32 2147483648, %v7578_v4 }
 0x37e   : > { %v3852_v11 = vadd.f32 %v3816_v2, %v3598_v6  ;;  %v5902_v58 = vpop.eup %5901  ;;  %4360 = vst [vmem:[#allocation3 + $0x28] sm:$0xff] %v4348_v63  ;;  %5903 = vpow2.f32 %v3941_v62  ;;  %v4166_v17 = vmul.f32 %v7593_v48, %v7578_v4  ;;  %v4163_v25 = vor.u32 1.1754944e-38, %v4162_v32 }
 0x37f   : > { %v3056_v27 = vpop.f32.mrf.mxu3  ;;  %v7598_v37 = vadd.f32 1.0, %v5902_v58  ;;  %v4159_v50 = vsel %vm7613_vm8, %v7576_v34, %v4155_v29  ;;  %vm4171_vm11 = vweird.f32 %v7593_v48  ;;  %v4177_v9 = vor.u32 1.1754944e-38, %v4176_v59 }
 0x380   : > { %v7601_v33 = vadd.f32 %v7221_v54, %v3852_v11  ;;  %v3091_v10 = vadd.f32 %v3056_v27, %v7197_v41  ;;  %v4167_v51 = vsub.f32 1.0, %v4166_v17  ;;  %v4164_v2 = vsel %vm4161_vm9, %v4163_v25, %v4159_v50  ;;  %v3821_v55 = vpop.f32.mrf.mxu2  ;;  %v3315_v36 = vpop.f32.mrf.mxu0  ;;  %vm7643_vm15 = vmor %vm4170_vm10, %vm4171_vm11 }
 0x381   : > { %5905 = vrcp.f32 %v7598_v37  ;;  %v4188_v5 = vand.u32 2147483647, %v7598_v37  ;;  %v4190_v60 = vand.u32 2147483648, %v7598_v37  ;;  %v4331_v15 = vmul.f32 %v4164_v2, %v7515_v46 }
 0x382   : > { %v3903_v0 = vsub.f32 0.0, %v7601_v33  ;;  %v3345_v61 = vadd.f32 %v3310_v13, %v3091_v10  ;;  %v4168_v8 = vmul.f32 %v7593_v48, %v4167_v51  ;;  %vm4184_vm0 = vweird.f32 %v7598_v37 }
 0x383   : > { %vm4189_vm2 = vcmp.eq.f32.partialorder %v4188_v5, 8.507059e+37  ;;  %v4191_v17 = vor.u32 1.1754944e-38, %v4190_v60 }
 0x384   : > { %v5904_v20 = vpop.eup %5903  ;;  %v3943_v7 = vmul.f32 1.442695, %v3903_v0  ;;  %v3599_v41 = vadd.f32 %v3564_v42, %v3345_v61  ;;  %v4169_v18 = vadd.f32 %v7593_v48, %v4168_v8  ;;  %v3569_v0 = vpop.f32.mrf.mxu1 }
 0x385   : > { %v4371_v30 = vld [vmem:[#allocation3 + $0x20] ss:$2 sm:$0xff]  ;;  %v4383_v47 = vld [vmem:[#allocation3 + $0x21] ss:$2 sm:$0xff]  ;;  %v7611_v53 = vadd.f32 1.0, %v5904_v20 }
 0x386   : > { %v4392_v38 = vmax.f32 %v4371_v30, %v4383_v47  ;;  %5907 = vpow2.f32 %v3943_v7  ;;  %v3853_v31 = vadd.f32 %v3818_v16, %v3599_v41  ;;  %v4173_v43 = vsel %vm7643_vm15, %v7593_v48, %v4169_v18  ;;  %v7660_v48 = vld [vmem:[%s7757_s4] ss:$0 sm:$0xff] }
 0x387   : > { %v3059_v40 = vpop.f32.mrf.mxu3  ;;  %v5906_v1 = vpop.eup %5905  ;;  %5909 = vrcp.f32 %v7611_v53  ;;  %vm4198_vm5 = vweird.f32 %v7611_v53 }
 0x388   : > { %4398 = vst [vmem:[%s7408_s19 + $0x10] sm:$0xff] %v4392_v38  ;;  %v4180_v57 = vmul.f32 %v5906_v1, %v7598_v37  ;;  %v7626_v21 = vadd.f32 %v7221_v54, %v3853_v31  ;;  %v3092_v44 = vadd.f32 %v3059_v40, %v7200_v19  ;;  %v4174_v54 = vand.u32 2147483647, %v7578_v4  ;;  %v3823_v30 = vpop.f32.mrf.mxu2  ;;  %v3318_v8 = vpop.f32.mrf.mxu0 }
 0x389   : > { %vm4185_vm13 = vweird.f32 %v5906_v1  ;;  %v4202_v37 = vand.u32 2147483647, %v7611_v53 }
 0x38a   : > { %v4181_v34 = vsub.f32 1.0, %v4180_v57  ;;  %v3904_v13 = vsub.f32 0.0, %v7626_v21  ;;  %v3346_v26 = vadd.f32 %v3313_v45, %v3092_v44  ;;  %vm4186_vm1 = vmor %vm4184_vm0, %vm4185_vm13  ;;  %v4204_v45 = vand.u32 2147483648, %v7611_v53 }
 0x38b   : > { %vm4175_vm4 = vcmp.eq.f32.partialorder %v4174_v54, 8.507059e+37  ;;  %vm4203_vm7 = vcmp.eq.f32.partialorder %v4202_v37, 8.507059e+37 }
 0x38c   : > { %v5908_v28 = vpop.eup %5907  ;;  %v4182_v19 = vmul.f32 %v5906_v1, %v4181_v34  ;;  %v3945_v63 = vmul.f32 1.442695, %v3904_v13  ;;  %v3600_v62 = vadd.f32 %v3567_v52, %v3346_v26  ;;  %v4178_v40 = vsel %vm4175_vm4, %v4177_v9, %v4173_v43  ;;  %v3572_v13 = vpop.f32.mrf.mxu1 }
 0x38d   : > { %v5910_v39 = vpop.eup %5909  ;;  %v7637_v6 = vadd.f32 1.0, %v5908_v28  ;;  %v4205_v38 = vor.u32 1.1754944e-38, %v4204_v45  ;;  %v4332_v2 = vmul.f32 %v4178_v40, %v7532_v14 }
 0x38e   : > { %v4183_v27 = vadd.f32 %v5906_v1, %v4182_v19  ;;  %v4194_v58 = vmul.f32 %v5910_v39, %v7611_v53  ;;  %v3854_v16 = vadd.f32 %v3821_v55, %v3600_v62  ;;  %vm4199_vm3 = vweird.f32 %v5910_v39 }
 0x38f   : > { %v3061_v42 = vpop.f32.mrf.mxu3  ;;  %5911 = vrcp.f32 %v7637_v6  ;;  %vm4200_vm6 = vmor %vm4198_vm5, %vm4199_vm3  ;;  %vm4212_vm14 = vweird.f32 %v7637_v6 }
 0x390   : > { %v3093_v46 = vadd.f32 %v3061_v42, %v7203_v12  ;;  %v4187_v4 = vsel %vm4186_vm1, %v5906_v1, %v4183_v27  ;;  %v4195_v10 = vsub.f32 1.0, %v4194_v58  ;;  %5913 = vpow2.f32 %v3945_v63  ;;  %v3320_v63 = vpop.f32.mrf.mxu0 }
 0x391   : > { %v4192_v61 = vsel %vm4189_vm2, %v4191_v17, %v4187_v4  ;;  %v7663_v20 = vadd.f32 %v7660_v48, %v3854_v16  ;;  %v4218_v4 = vand.u32 2147483648, %v7637_v6 }
 0x392   : > { %v3347_v12 = vadd.f32 %v3315_v36, %v3093_v46  ;;  %v4333_v29 = vmul.f32 %v4192_v61, %v7557_v3  ;;  %v4196_v51 = vmul.f32 %v5910_v39, %v4195_v10  ;;  %v4216_v61 = vand.u32 2147483647, %v7637_v6 }
 0x393   : > { %v3905_v3 = vsub.f32 0.0, %v7663_v20  ;;  %v4219_v9 = vor.u32 1.1754944e-38, %v4218_v4 }
 0x394   : > { %v3601_v32 = vadd.f32 %v3569_v0, %v3347_v12  ;;  %v4349_v7 = vmax.f32 %v4331_v15, %v4333_v29  ;;  %v4197_v41 = vadd.f32 %v5910_v39, %v4196_v51  ;;  %v3574_v17 = vpop.f32.mrf.mxu1  ;;  %vm4217_vm9 = vcmp.eq.f32.partialorder %v4216_v61, 8.507059e+37 }
 0x395   : > { %v7667_v47 = vpop.eup %5911  ;;  %v3947_v50 = vmul.f32 1.442695, %v3905_v3 }
 0x396   : > { %v3855_v35 = vadd.f32 %v3823_v30, %v3601_v32  ;;  %v5914_v1 = vpop.eup %5913  ;;  %4361 = vst [vmem:[#allocation3 + $0x30] sm:$0xff] %v4349_v7  ;;  %v4201_v52 = vsel %vm4200_vm6, %v5910_v39, %v4197_v41  ;;  %v4208_v5 = vmul.f32 %v7667_v47, %v7637_v6  ;;  %v3826_v39 = vpop.f32.mrf.mxu2  ;;  %vm4213_vm12 = vweird.f32 %v7667_v47 }
 0x397   : > { %v3064_v31 = vpop.f32.mrf.mxu3  ;;  %v4206_v25 = vsel %vm4203_vm7, %v4205_v38, %v4201_v52  ;;  %v7669_v57 = vadd.f32 1.0, %v5914_v1  ;;  %5915 = vpow2.f32 %v3947_v50  ;;  %vm4214_vm8 = vmor %vm4212_vm14, %vm4213_vm12 }
 0x398   : > { %v7672_v53 = vadd.f32 %v7660_v48, %v3855_v35  ;;  %v3094_v44 = vadd.f32 %v3064_v31, %v7206_v24  ;;  %v4334_v34 = vmul.f32 %v4206_v25, %v7588_v56  ;;  %v4209_v26 = vsub.f32 1.0, %v4208_v5 }
 0x399   : > { %5917 = vrcp.f32 %v7669_v57  ;;  %vm4226_vm11 = vweird.f32 %v7669_v57 }
 0x39a   : > { %v4350_v55 = vmax.f32 %v4332_v2, %v4334_v34  ;;  %v3906_v18 = vsub.f32 0.0, %v7672_v53  ;;  %v3348_v60 = vadd.f32 %v3318_v8, %v3094_v44  ;;  %v4210_v36 = vmul.f32 %v7667_v47, %v4209_v26 }
 0x39b   : > { %v4230_v44 = vand.u32 2147483647, %v7669_v57  ;;  %v4232_v2 = vand.u32 2147483648, %v7669_v57 }
 0x39c   : > { %4362 = vst [vmem:[#allocation3 + $0x38] sm:$0xff] %v4350_v55  ;;  %v3949_v28 = vmul.f32 1.442695, %v3906_v18  ;;  %v3602_v54 = vadd.f32 %v3572_v13, %v3348_v60 }
 0x39d   : > { %v5916_v59 = vpop.eup %5915  ;;  %vm4231_vm4 = vcmp.eq.f32.partialorder %v4230_v44, 8.507059e+37 }
 0x39e   : > { %5919 = vpow2.f32 %v3949_v28  ;;  %v3977_v19 = vadd.f32 1.0, %v5916_v59  ;;  %v3856_v15 = vadd.f32 %v3826_v39, %v3602_v54  ;;  %v3828_v7 = vpop.f32.mrf.mxu2 }
 0x39f   : > { %v3066_v24 = vpop.f32.mrf.mxu3  ;;  %v7682_v56 = vpop.eup %5917 }
 0x3a0   : > { %v3095_v14 = vadd.f32 %v3066_v24, %v7209_v49  ;;  %v4222_v62 = vmul.f32 %v7682_v56, %v7669_v57  ;;  %5921 = vrcp.f32 %v3977_v19  ;;  %v4211_v49 = vadd.f32 %v7667_v47, %v4210_v36 }
 0x3a1   : > { %v7690_v43 = vadd.f32 %v7660_v48, %v3856_v15  ;;  %v4246_v40 = vand.u32 2147483648, %v3977_v19  ;;  %v4244_v38 = vand.u32 2147483647, %v3977_v19  ;;  %vm4227_vm13 = vweird.f32 %v7682_v56 }
 0x3a2   : > { %v3349_v42 = vadd.f32 %v3320_v63, %v3095_v14  ;;  %v4223_v10 = vsub.f32 1.0, %v4222_v62  ;;  %v4215_v12 = vsel %vm4214_vm8, %v7667_v47, %v4211_v49  ;;  %vm4240_vm15 = vweird.f32 %v3977_v19  ;;  %vm7713_vm1 = vmor %vm4226_vm11, %vm4227_vm13  ;;  %v3577_v63 = vpop.f32.mrf.mxu1 }
 0x3a3   : > { %v4373_v11 = vld [vmem:[#allocation3 + $0x30] ss:$2 sm:$0xff]  ;;  %v4385_v27 = vld [vmem:[#allocation3 + $0x31] ss:$2 sm:$0xff]  ;;  %v3907_v51 = vsub.f32 0.0, %v7690_v43  ;;  %v4220_v3 = vsel %vm4217_vm9, %v4219_v9, %v4215_v12  ;;  %v4247_v34 = vor.u32 1.1754944e-38, %v4246_v40 }
 0x3a4   : > { %v5920_v58 = vpop.eup %5919  ;;  %v4393_v46 = vmax.f32 %v4373_v11, %v4385_v27  ;;  %v3603_v37 = vadd.f32 %v3574_v17, %v3349_v42  ;;  %v4224_v32 = vmul.f32 %v7682_v56, %v4223_v10  ;;  %v4335_v25 = vmul.f32 %v4220_v3, %v7601_v33 }
 0x3a5   : > { %v7693_v16 = vadd.f32 1.0, %v5920_v58  ;;  %v3951_v35 = vmul.f32 1.442695, %v3907_v51  ;;  %vm4245_vm2 = vcmp.eq.f32.partialorder %v4244_v38, 8.507059e+37  ;;  %v4233_v24 = vor.u32 1.1754944e-38, %v4232_v2 }
 0x3a6   : > { %4399 = vst [vmem:[%s7408_s19 + $0x18] sm:$0xff] %v4393_v46  ;;  %v5922_v45 = vpop.eup %5921  ;;  %v3857_v30 = vadd.f32 %v3828_v7, %v3603_v37  ;;  %v4225_v1 = vadd.f32 %v7682_v56, %v4224_v32  ;;  %v3831_v46 = vpop.f32.mrf.mxu2 }
 0x3a7   : > { %v3069_v0 = vpop.f32.mrf.mxu3  ;;  %5923 = vrcp.f32 %v7693_v16  ;;  %v4236_v29 = vmul.f32 %v5922_v45, %v3977_v19  ;;  %vm4241_vm10 = vweird.f32 %v5922_v45  ;;  %v4258_v13 = vand.u32 2147483647, %v7693_v16 }
 0x3a8   : > { %v7707_v8 = vadd.f32 %v7660_v48, %v3857_v30  ;;  %vm4242_vm0 = vmor %vm4240_vm15, %vm4241_vm10  ;;  %5925 = vpow2.f32 %v3951_v35  ;;  %v4229_v60 = vsel %vm7713_vm1, %v7682_v56, %v4225_v1  ;;  %v4260_v57 = vand.u32 2147483648, %v7693_v16 }
 0x3a9   : > { %v4237_v41 = vsub.f32 1.0, %v4236_v29  ;;  %vm4254_vm5 = vweird.f32 %v7693_v16  ;;  %v3096_v19 = vadd.f32 %v3069_v0, %v7212_v22  ;;  %v4234_v56 = vsel %vm4231_vm4, %v4233_v24, %v4229_v60 }
 0x3aa   : > { %v3908_v54 = vsub.f32 0.0, %v7707_v8  ;;  %v4261_v39 = vor.u32 1.1754944e-38, %v4260_v57  ;;  %vm4259_vm7 = vcmp.eq.f32.partialorder %v4258_v13, 8.507059e+37  ;;  %v4336_v27 = vmul.f32 %v4234_v56, %v7626_v21 }
 0x3ab   : > { %v4238_v6 = vmul.f32 %v5922_v45, %v4237_v41 }
 0x3ac   : > { %v3953_v62 = vmul.f32 1.442695, %v3908_v54 }
 0x3ad   : > { %v5924_v31 = vpop.eup %5923  ;;  %v4239_v52 = vadd.f32 %v5922_v45, %v4238_v6 }
 0x3ae   : > { %v4250_v50 = vmul.f32 %v5924_v31, %v7693_v16  ;;  %vm4255_vm3 = vweird.f32 %v5924_v31  ;;  %v5926_v15 = vpop.eup %5925  ;;  %5927 = vpow2.f32 %v3953_v62  ;;  %v3833_v29 = vpop.f32.mrf.mxu2 }
 0x3af   : > { %v3071_v47 = vpop.f32.mrf.mxu3  ;;  %v4243_v55 = vsel %vm4242_vm0, %v5922_v45, %v4239_v52  ;;  %vm4256_vm6 = vmor %vm4254_vm5, %vm4255_vm3  ;;  %v3979_v17 = vadd.f32 1.0, %v5926_v15 }
 0x3b0   : > { %v4251_v18 = vsub.f32 1.0, %v4250_v50  ;;  %v4248_v33 = vsel %vm4245_vm2, %v4247_v34, %v4243_v55  ;;  %v3097_v16 = vadd.f32 %v3071_v47, %v7215_v23 }
 0x3b1   : > { %v4337_v26 = vmul.f32 %v4248_v33, %v7663_v20  ;;  %5929 = vrcp.f32 %v3979_v17  ;;  %v4274_v2 = vand.u32 2147483648, %v3979_v17  ;;  %vm4268_vm14 = vweird.f32 %v3979_v17 }
 0x3b2   : > { %v4252_v28 = vmul.f32 %v5924_v31, %v4251_v18  ;;  %v4272_v5 = vand.u32 2147483647, %v3979_v17 }
 0x3b3   : > { %v4351_v59 = vmax.f32 %v4335_v25, %v4337_v26  ;;  %v4275_v26 = vor.u32 1.1754944e-38, %v4274_v2 }
 0x3b4   : > { %v4253_v14 = vadd.f32 %v5924_v31, %v4252_v28  ;;  %v5928_v37 = vpop.eup %5927  ;;  %vm4273_vm10 = vcmp.eq.f32.partialorder %v4272_v5, 8.507059e+37 }
 0x3b5   : > { %4363 = vst [vmem:[#allocation3 + $0x40] sm:$0xff] %v4351_v59  ;;  %v7733_v7 = vadd.f32 1.0, %v5928_v37 }
 0x3b6   : > { %v4257_v20 = vsel %vm4256_vm6, %v5924_v31, %v4253_v14 }
 0x3b7   : > { %v3323_v36 = vpop.f32.mrf.mxu3  ;;  %v4262_v11 = vsel %vm4259_vm7, %v4261_v39, %v4257_v20  ;;  %v5930_v51 = vpop.eup %5929  ;;  %v4288_v20 = vand.u32 2147483648, %v7733_v7  ;;  %vm4282_vm1 = vweird.f32 %v7733_v7  ;;  %v4286_v62 = vand.u32 2147483647, %v7733_v7 }
 0x3b8   : > { %v3350_v42 = vadd.f32 %v3323_v36, %v3096_v19  ;;  %v4338_v58 = vmul.f32 %v4262_v11, %v7672_v53  ;;  %v3579_v53 = vpop.f32.mrf.mxu1  ;;  %v4264_v3 = vmul.f32 %v5930_v51, %v3979_v17  ;;  %vm4269_vm12 = vweird.f32 %v5930_v51 }
 0x3b9   : > { %vm4270_vm8 = vmor %vm4268_vm14, %vm4269_vm12  ;;  %vm4287_vm4 = vcmp.eq.f32.partialorder %v4286_v62, 8.507059e+37 }
 0x3ba   : > { %v3604_v49 = vadd.f32 %v3577_v63, %v3350_v42  ;;  %v4352_v22 = vmax.f32 %v4336_v27, %v4338_v58  ;;  %v4265_v31 = vsub.f32 1.0, %v4264_v3 }
 0x3bc   : > { %v3858_v4 = vadd.f32 %v3831_v46, %v3604_v49  ;;  %4364 = vst [vmem:[#allocation3 + $0x48] sm:$0xff] %v4352_v22  ;;  %v4266_v47 = vmul.f32 %v5930_v51, %v4265_v31 }
 0x3be   : > { %v7729_v10 = vadd.f32 %v7660_v48, %v3858_v4 }
 0x3bf   : > { %v3325_v0 = vpop.f32.mrf.mxu3 }
 0x3c0   : > { %v3909_v61 = vsub.f32 0.0, %v7729_v10  ;;  %v3351_v21 = vadd.f32 %v3325_v0, %v3097_v16 }
 0x3c2   : > { %v3955_v45 = vmul.f32 1.442695, %v3909_v61  ;;  %v3605_v12 = vadd.f32 %v3579_v53, %v3351_v21 }
 0x3c3   : > { %v4375_v9 = vld [vmem:[#allocation3 + $0x40] ss:$2 sm:$0xff]  ;;  %v4387_v32 = vld [vmem:[#allocation3 + $0x41] ss:$2 sm:$0xff] }
 0x3c4   : > { %5931 = vpow2.f32 %v3955_v45  ;;  %v3859_v41 = vadd.f32 %v3833_v29, %v3605_v12  ;;  %v4394_v30 = vmax.f32 %v4375_v9, %v4387_v32 }
 0x3c5   : > { %5933 = vrcp.f32 %v7733_v7 }
 0x3c6   : > { %v7736_v23 = vadd.f32 %v7660_v48, %v3859_v41  ;;  %4400 = vst [vmem:[%s7408_s19 + $0x20] sm:$0xff] %v4394_v30  ;;  %v4267_v48 = vadd.f32 %v5930_v51, %v4266_v47 }
 0x3c8   : > { %v3910_v40 = vsub.f32 0.0, %v7736_v23  ;;  %v4271_v33 = vsel %vm4270_vm8, %v5930_v51, %v4267_v48 }
 0x3c9   : > { %v4276_v24 = vsel %vm4273_vm10, %v4275_v26, %v4271_v33 }
 0x3ca   : > { %v5932_v6 = vpop.eup %5931  ;;  %v3957_v35 = vmul.f32 1.442695, %v3910_v40  ;;  %v4339_v39 = vmul.f32 %v4276_v24, %v7690_v43  ;;  %v4289_v43 = vor.u32 1.1754944e-38, %v4288_v20 }
 0x3cb   : > { %v3981_v38 = vadd.f32 1.0, %v5932_v6  ;;  %v5934_v1 = vpop.eup %5933 }
 0x3cc   : > { %v4278_v52 = vmul.f32 %v5934_v1, %v7733_v7  ;;  %vm4283_vm0 = vweird.f32 %v5934_v1 }
 0x3cd   : > { %5935 = vrcp.f32 %v3981_v38  ;;  %v4302_v60 = vand.u32 2147483648, %v3981_v38  ;;  %v4300_v57 = vand.u32 2147483647, %v3981_v38  ;;  %vm4296_vm11 = vweird.f32 %v3981_v38  ;;  %vm4284_vm2 = vmor %vm4282_vm1, %vm4283_vm0 }
 0x3ce   : > { %5937 = vpow2.f32 %v3957_v35  ;;  %v4279_v55 = vsub.f32 1.0, %v4278_v52 }
 0x3cf   : > { %v4303_v59 = vor.u32 1.1754944e-38, %v4302_v60  ;;  %vm4301_vm15 = vcmp.eq.f32.partialorder %v4300_v57, 8.507059e+37 }
 0x3d0   : > { %v4280_v28 = vmul.f32 %v5934_v1, %v4279_v55 }
 0x3d2   : > { %v4281_v36 = vadd.f32 %v5934_v1, %v4280_v28 }
 0x3d3   : > { %v5936_v50 = vpop.eup %5935 }
 0x3d4   : > { %v5938_v25 = vpop.eup %5937  ;;  %v4292_v44 = vmul.f32 %v5936_v50, %v3981_v38  ;;  %vm4297_vm9 = vweird.f32 %v5936_v50  ;;  %v4285_v58 = vsel %vm4284_vm2, %v5934_v1, %v4281_v36 }
 0x3d5   : > { %v3982_v34 = vadd.f32 1.0, %v5938_v25  ;;  %vm4298_vm13 = vmor %vm4296_vm11, %vm4297_vm9  ;;  %v4290_v22 = vsel %vm4287_vm4, %v4289_v43, %v4285_v58 }
 0x3d6   : > { %v4293_v18 = vsub.f32 1.0, %v4292_v44  ;;  %v4340_v0 = vmul.f32 %v4290_v22, %v7707_v8 }
 0x3d7   : > { %5939 = vrcp.f32 %v3982_v34  ;;  %v4316_v27 = vand.u32 2147483648, %v3982_v34  ;;  %v4314_v49 = vand.u32 2147483647, %v3982_v34  ;;  %vm4310_vm5 = vweird.f32 %v3982_v34 }
 0x3d8   : > { %v4294_v13 = vmul.f32 %v5936_v50, %v4293_v18 }
 0x3d9   : > { %v4317_v4 = vor.u32 1.1754944e-38, %v4316_v27  ;;  %vm4315_vm7 = vcmp.eq.f32.partialorder %v4314_v49, 8.507059e+37 }
 0x3da   : > { %v4295_v54 = vadd.f32 %v5936_v50, %v4294_v13 }
 0x3dc   : > { %v4299_v14 = vsel %vm4298_vm13, %v5936_v50, %v4295_v54 }
 0x3dd   : > { %v5940_v19 = vpop.eup %5939  ;;  %v4304_v56 = vsel %vm4301_vm15, %v4303_v59, %v4299_v14 }
 0x3de   : > { %v4341_v15 = vmul.f32 %v4304_v56, %v7729_v10  ;;  %v4306_v63 = vmul.f32 %v5940_v19, %v3982_v34  ;;  %vm4311_vm3 = vweird.f32 %v5940_v19 }
 0x3df   : > { %vm4312_vm6 = vmor %vm4310_vm5, %vm4311_vm3 }
 0x3e0   : > { %v4353_v42 = vmax.f32 %v4339_v39, %v4341_v15  ;;  %v4307_v11 = vsub.f32 1.0, %v4306_v63 }
 0x3e2   : > { %4365 = vst [vmem:[#allocation3 + $0x50] sm:$0xff] %v4353_v42  ;;  %v4308_v46 = vmul.f32 %v5940_v19, %v4307_v11 }
 0x3e4   : > { %v4309_v17 = vadd.f32 %v5940_v19, %v4308_v46 }
 0x3e6   : > { %v4313_v10 = vsel %vm4312_vm6, %v5940_v19, %v4309_v17 }
 0x3e7   : > { %v4318_v16 = vsel %vm4315_vm7, %v4317_v4, %v4313_v10 }
 0x3e8   : > { %v4342_v61 = vmul.f32 %v4318_v16, %v7736_v23 }
 0x3ea   : > { %v4354_v21 = vmax.f32 %v4340_v0, %v4342_v61 }
 0x3ec   : > { %4366 = vst [vmem:[#allocation3 + $0x58] sm:$0xff] %v4354_v21 }
 0x3f3   : > { %v4377_v37 = vld [vmem:[#allocation3 + $0x50] ss:$2 sm:$0xff]  ;;  %v4389_v53 = vld [vmem:[#allocation3 + $0x51] ss:$2 sm:$0xff] }
 0x3f4   : > { %v4395_v45 = vmax.f32 %v4377_v37, %v4389_v53 }
 0x3f6   : > { %4401 = vst [vmem:[%s7408_s19 + $0x28] sm:$0xff] %v4395_v45 }
 0x3f7 PF: > { %s15_s18 = sadd.s32 1, %s5958_s18  }
 0x3f8   : > { %p12_p4 = scmp.ge.s32.totalorder %s15_s18, 4  }
 0x3fa   :  { %14 = sbr.rel (!%p12_p4) target bundleno = 1 (0x1), region = 91 }

// kernel: conv_classifier_forward.3
= control target key start
LH: loop header
LB: loop body
LE: loop exit
PB: predicated region body
PF: predicated region fallthrough
CT: control target
= control target key end

     0   :  { %s7000_s0 = inlined_call_operand.vmem [shape: bf16[2,6144], index: 0, kind: input, shape index: {}]   ;;  %s7001_s1 = inlined_call_operand.vmem [shape: bf16[6144,128], index: 1, kind: input, shape index: {}]   ;;  %s7002_s2 = inlined_call_operand.vmem [shape: f32[1,128], index: 2, kind: input, shape index: {}]   ;;  %s7003_s3 = inlined_call_operand.hbm [shape: f32[2,128], index: 3, kind: output, shape index: {}]  }
   0x1   :  { %v5389_v0 = vld [vmem:[%s7001_s1 + $0x38] sm:$0xff]  ;;  %v5388_v4 = vld [vmem:[%s7001_s1 + $0x30] sm:$0xff]  ;;  %v5387_v8 = vld [vmem:[%s7001_s1 + $0x28] sm:$0xff] }
   0x2   :  { %v5397_v1 = vld [vmem:[%s7001_s1 + $0x78] sm:$0xff]  ;;  %3205 = vmatpush.bf16.msra.mxu0 %v5389_v0  ;;  %v5396_v5 = vld [vmem:[%s7001_s1 + $0x70] sm:$0xff]  ;;  %v5395_v9 = vld [vmem:[%s7001_s1 + $0x68] sm:$0xff] }
   0x3   :  { %v5405_v2 = vld [vmem:[%s7001_s1 + $0xb8] sm:$0xff]  ;;  %3218 = vmatpush.bf16.msra.mxu1 %v5397_v1  ;;  %v5404_v6 = vld [vmem:[%s7001_s1 + $0xb0] sm:$0xff]  ;;  %v5403_v10 = vld [vmem:[%s7001_s1 + $0xa8] sm:$0xff] }
   0x4   :  { %v5413_v3 = vld [vmem:[%s7001_s1 + $0xf8] sm:$0xff]  ;;  %3231 = vmatpush.bf16.msra.mxu2 %v5405_v2  ;;  %v5412_v7 = vld [vmem:[%s7001_s1 + $0xf0] sm:$0xff]  ;;  %v5411_v11 = vld [vmem:[%s7001_s1 + $0xe8] sm:$0xff] }
   0x5   :  { %3244 = vmatpush.bf16.msra.mxu3 %v5413_v3  ;;  %v5386_v12 = vld [vmem:[%s7001_s1 + $0x20] sm:$0xff]  ;;  %v5385_v16 = vld [vmem:[%s7001_s1 + $0x18] sm:$0xff]  ;;  %v5384_v20 = vld [vmem:[%s7001_s1 + $0x10] sm:$0xff] }
   0x6   :  { %3206 = vmatpush.bf16.msra.mxu0 %v5388_v4  ;;  %v5394_v13 = vld [vmem:[%s7001_s1 + $0x60] sm:$0xff]  ;;  %v5393_v17 = vld [vmem:[%s7001_s1 + $0x58] sm:$0xff]  ;;  %v5392_v21 = vld [vmem:[%s7001_s1 + $0x50] sm:$0xff] }
   0x7   :  { %3219 = vmatpush.bf16.msra.mxu1 %v5396_v5  ;;  %v5402_v14 = vld [vmem:[%s7001_s1 + $0xa0] sm:$0xff]  ;;  %v5401_v18 = vld [vmem:[%s7001_s1 + $0x98] sm:$0xff] }
   0x8   :  { %3232 = vmatpush.bf16.msra.mxu2 %v5404_v6  ;;  %v5410_v15 = vld [vmem:[%s7001_s1 + $0xe0] sm:$0xff]  ;;  %v5409_v19 = vld [vmem:[%s7001_s1 + $0xd8] sm:$0xff] }
   0x9   :  { %3245 = vmatpush.bf16.msra.mxu3 %v5412_v7  ;;  %v15_v22 = vld [vmem:[%s7000_s0] sm:$0xff] }
   0xa   :  { %3207 = vmatpush.bf16.msra.mxu0 %v5387_v8  ;;  %794 = vst [vmem:[#allocation1] ss:$9 sm:$0xff] %v15_v22 }
   0xb   :  { %3220 = vmatpush.bf16.msra.mxu1 %v5395_v9 }
   0xc   :  { %3233 = vmatpush.bf16.msra.mxu2 %v5403_v10 }
   0xd   :  { %3246 = vmatpush.bf16.msra.mxu3 %v5411_v11 }
   0xe   :  { %3208 = vmatpush.bf16.msra.mxu0 %v5386_v12 }
   0xf   :  { %3221 = vmatpush.bf16.msra.mxu1 %v5394_v13 }
  0x10   :  { %3234 = vmatpush.bf16.msra.mxu2 %v5402_v14 }
  0x11   :  { %3247 = vmatpush.bf16.msra.mxu3 %v5410_v15 }
  0x12   :  { %3209 = vmatpush.bf16.msra.mxu0 %v5385_v16 }
  0x13   :  { %3222 = vmatpush.bf16.msra.mxu1 %v5393_v17 }
  0x14   :  { %8 = vsyncpa [#allocation3], 0  ;;  %3235 = vmatpush.bf16.msra.mxu2 %v5401_v18  ;;  %v5400_v23 = vld [vmem:[%s7001_s1 + $0x90] sm:$0xff]  ;;  %v5383_v25 = vld [vmem:[%s7001_s1 + $0x8] sm:$0xff]  ;;  %s3837_s20 = sshll.u32 %s7003_s3, 4  ;;  %s3838_s20 = int_to_ptr.hbm [resolvable:$true] %s3837_s20 }
  0x15   :  { %3248 = vmatpush.bf16.msra.mxu3 %v5409_v19  ;;  %v5408_v24 = vld [vmem:[%s7001_s1 + $0xd0] sm:$0xff]  ;;  %v5391_v26 = vld [vmem:[%s7001_s1 + $0x48] sm:$0xff]  ;;  %v5382_v29 = vld [vmem:[%s7001_s1] sm:$0xff] }
  0x16   :  { %3210 = vmatpush.bf16.msra.mxu0 %v5384_v20  ;;  %v5399_v27 = vld [vmem:[%s7001_s1 + $0x88] sm:$0xff]  ;;  %v5390_v30 = vld [vmem:[%s7001_s1 + $0x40] sm:$0xff]  ;;  %v5421_v33 = vld [vmem:[%s7001_s1 + $0x138] sm:$0xff] }
  0x17   :  { %3223 = vmatpush.bf16.msra.mxu1 %v5392_v21  ;;  %v5407_v28 = vld [vmem:[%s7001_s1 + $0xc8] sm:$0xff]  ;;  %v5398_v31 = vld [vmem:[%s7001_s1 + $0x80] sm:$0xff]  ;;  %v5429_v34 = vld [vmem:[%s7001_s1 + $0x178] sm:$0xff] }
  0x18   :  { %3236 = vmatpush.bf16.msra.mxu2 %v5400_v23  ;;  %v5406_v32 = vld [vmem:[%s7001_s1 + $0xc0] sm:$0xff]  ;;  %v5437_v35 = vld [vmem:[%s7001_s1 + $0x1b8] sm:$0xff]  ;;  %v5420_v37 = vld [vmem:[%s7001_s1 + $0x130] sm:$0xff] }
  0x19   :  { %3249 = vmatpush.bf16.msra.mxu3 %v5408_v24  ;;  %v5445_v36 = vld [vmem:[%s7001_s1 + $0x1f8] sm:$0xff]  ;;  %v795_v39 = vld [vmem:[#allocation1] sm:$0xff]  ;;  %v5428_v40 = vld [vmem:[%s7001_s1 + $0x170] sm:$0xff] }
  0x1a   :  { %3211 = vmatpush.bf16.msra.mxu0 %v5383_v25  ;;  %v797_v38 = vld [vmem:[#allocation1 + $0x12] sm:$0xff]  ;;  %v798_v41 = vld [vmem:[#allocation1 + $0x1b] sm:$0xff]  ;;  %v796_v42 = vld [vmem:[#allocation1 + $0x9] sm:$0xff] }
  0x1b   :  { %3224 = vmatpush.bf16.msra.mxu1 %v5391_v26  ;;  %v5436_v43 = vld [vmem:[%s7001_s1 + $0x1b0] sm:$0xff]  ;;  %v5419_v45 = vld [vmem:[%s7001_s1 + $0x128] sm:$0xff]  ;;  %v802_v51 = vld [vmem:[#allocation1 + $0x3f] sm:$0xff] }
  0x1c   :  { %3237 = vmatpush.bf16.msra.mxu2 %v5399_v27  ;;  %v5444_v44 = vld [vmem:[%s7001_s1 + $0x1f0] sm:$0xff]  ;;  %v5427_v46 = vld [vmem:[%s7001_s1 + $0x168] sm:$0xff]  ;;  %v5418_v54 = vld [vmem:[%s7001_s1 + $0x120] sm:$0xff] }
  0x1d   :  { %3250 = vmatpush.bf16.msra.mxu3 %v5407_v28  ;;  %v5435_v47 = vld [vmem:[%s7001_s1 + $0x1a8] sm:$0xff]  ;;  %v801_v49 = vld [vmem:[#allocation1 + $0x36] sm:$0xff]  ;;  %v5426_v55 = vld [vmem:[%s7001_s1 + $0x160] sm:$0xff] }
  0x1e   :  { %3212 = vmatpush.bf16.msra.mxu0 %v5382_v29  ;;  %v5443_v48 = vld [vmem:[%s7001_s1 + $0x1e8] sm:$0xff]  ;;  %v5434_v56 = vld [vmem:[%s7001_s1 + $0x1a0] sm:$0xff]  ;;  %v5417_v58 = vld [vmem:[%s7001_s1 + $0x118] sm:$0xff] }
  0x1f   :  { %3225 = vmatpush.bf16.msra.mxu1 %v5390_v30  ;;  %v799_v50 = vld [vmem:[#allocation1 + $0x24] sm:$0xff]  ;;  %v800_v53 = vld [vmem:[#allocation1 + $0x2d] sm:$0xff]  ;;  %v5425_v59 = vld [vmem:[%s7001_s1 + $0x158] sm:$0xff] }
  0x20   :  { %3238 = vmatpush.bf16.msra.mxu2 %v5398_v31  ;;  %v16_v52 = vld [vmem:[%s7000_s0 + $0x8] sm:$0xff]  ;;  %v5442_v57 = vld [vmem:[%s7001_s1 + $0x1e0] sm:$0xff]  ;;  %v5433_v60 = vld [vmem:[%s7001_s1 + $0x198] sm:$0xff] }
  0x21   :  { %3251 = vmatpush.bf16.msra.mxu3 %v5406_v32  ;;  %3213 = vmatmul.bf16.vlgmr.msra.gmra.mxu0 %v795_v39  ;;  %804 = vst [vmem:[#allocation1] ss:$9 sm:$0xff] %v16_v52  ;;  %v5441_v61 = vld [vmem:[%s7001_s1 + $0x1d8] sm:$0xff]  ;;  %v5416_v62 = vld [vmem:[%s7001_s1 + $0x110] sm:$0xff]  ;;  %v5415_v2 = vld [vmem:[%s7001_s1 + $0x108] sm:$0xff] }
  0x22   :  { %3257 = vmatpush.bf16.msrb.mxu0 %v5421_v33  ;;  %3226 = vmatmul.bf16.vlgmr.msra.gmra.mxu1 %v796_v42  ;;  %v5424_v63 = vld [vmem:[%s7001_s1 + $0x150] sm:$0xff]  ;;  %v5423_v3 = vld [vmem:[%s7001_s1 + $0x148] sm:$0xff]  ;;  %v5414_v6 = vld [vmem:[%s7001_s1 + $0x100] sm:$0xff] }
  0x23   :  { %3270 = vmatpush.bf16.msrb.mxu1 %v5429_v34  ;;  %3239 = vmatmul.bf16.vlgmr.msra.gmra.mxu2 %v797_v38  ;;  %v5432_v0 = vld [vmem:[%s7001_s1 + $0x190] sm:$0xff]  ;;  %v5431_v4 = vld [vmem:[%s7001_s1 + $0x188] sm:$0xff]  ;;  %v5422_v7 = vld [vmem:[%s7001_s1 + $0x140] sm:$0xff] }
  0x24   :  { %3283 = vmatpush.bf16.msrb.mxu2 %v5437_v35  ;;  %3252 = vmatmul.bf16.vlgmr.msra.gmra.mxu3 %v798_v41  ;;  %v5440_v1 = vld [vmem:[%s7001_s1 + $0x1d0] sm:$0xff]  ;;  %v5439_v5 = vld [vmem:[%s7001_s1 + $0x1c8] sm:$0xff]  ;;  %v5430_v8 = vld [vmem:[%s7001_s1 + $0x180] sm:$0xff] }
  0x25   :  { %3296 = vmatpush.bf16.msrb.mxu3 %v5445_v36  ;;  %v5438_v9 = vld [vmem:[%s7001_s1 + $0x1c0] sm:$0xff]  ;;  %v5453_v10 = vld [vmem:[%s7001_s1 + $0x238] sm:$0xff]  ;;  %v5452_v14 = vld [vmem:[%s7001_s1 + $0x230] sm:$0xff] }
  0x26   :  { %3258 = vmatpush.bf16.msrb.mxu0 %v5420_v37  ;;  %v5461_v11 = vld [vmem:[%s7001_s1 + $0x278] sm:$0xff]  ;;  %v5460_v15 = vld [vmem:[%s7001_s1 + $0x270] sm:$0xff]  ;;  %v5451_v18 = vld [vmem:[%s7001_s1 + $0x228] sm:$0xff] }
  0x27   :  { %3271 = vmatpush.bf16.msrb.mxu1 %v5428_v40  ;;  %v5469_v12 = vld [vmem:[%s7001_s1 + $0x2b8] sm:$0xff]  ;;  %v5468_v16 = vld [vmem:[%s7001_s1 + $0x2b0] sm:$0xff]  ;;  %v5459_v19 = vld [vmem:[%s7001_s1 + $0x268] sm:$0xff] }
  0x28   :  { %3284 = vmatpush.bf16.msrb.mxu2 %v5436_v43  ;;  %v5477_v13 = vld [vmem:[%s7001_s1 + $0x2f8] sm:$0xff]  ;;  %v5476_v17 = vld [vmem:[%s7001_s1 + $0x2f0] sm:$0xff]  ;;  %v5467_v20 = vld [vmem:[%s7001_s1 + $0x2a8] sm:$0xff] }
  0x29   :  { %3297 = vmatpush.bf16.msrb.mxu3 %v5444_v44  ;;  %v5475_v21 = vld [vmem:[%s7001_s1 + $0x2e8] sm:$0xff]  ;;  %v5450_v22 = vld [vmem:[%s7001_s1 + $0x220] sm:$0xff]  ;;  %v5449_v26 = vld [vmem:[%s7001_s1 + $0x218] sm:$0xff] }
  0x2a   :  { %3259 = vmatpush.bf16.msrb.mxu0 %v5419_v45  ;;  %v5458_v23 = vld [vmem:[%s7001_s1 + $0x260] sm:$0xff]  ;;  %v5457_v27 = vld [vmem:[%s7001_s1 + $0x258] sm:$0xff]  ;;  %v5448_v30 = vld [vmem:[%s7001_s1 + $0x210] sm:$0xff] }
  0x2b   :  { %3272 = vmatpush.bf16.msrb.mxu1 %v5427_v46  ;;  %v5466_v24 = vld [vmem:[%s7001_s1 + $0x2a0] sm:$0xff]  ;;  %v5465_v28 = vld [vmem:[%s7001_s1 + $0x298] sm:$0xff]  ;;  %v5456_v31 = vld [vmem:[%s7001_s1 + $0x250] sm:$0xff] }
  0x2c   :  { %3285 = vmatpush.bf16.msrb.mxu2 %v5435_v47  ;;  %v5474_v25 = vld [vmem:[%s7001_s1 + $0x2e0] sm:$0xff]  ;;  %v5473_v29 = vld [vmem:[%s7001_s1 + $0x2d8] sm:$0xff]  ;;  %v5464_v32 = vld [vmem:[%s7001_s1 + $0x290] sm:$0xff] }
  0x2d   :  { %3298 = vmatpush.bf16.msrb.mxu3 %v5443_v48  ;;  %v5472_v33 = vld [vmem:[%s7001_s1 + $0x2d0] sm:$0xff]  ;;  %v5447_v34 = vld [vmem:[%s7001_s1 + $0x208] sm:$0xff]  ;;  %v5446_v38 = vld [vmem:[%s7001_s1 + $0x200] sm:$0xff] }
  0x2e   :  { %3260 = vmatpush.bf16.msrb.mxu0 %v5418_v54  ;;  %v5455_v35 = vld [vmem:[%s7001_s1 + $0x248] sm:$0xff]  ;;  %v5454_v39 = vld [vmem:[%s7001_s1 + $0x240] sm:$0xff]  ;;  %v5485_v42 = vld [vmem:[%s7001_s1 + $0x338] sm:$0xff] }
  0x2f   :  { %3273 = vmatpush.bf16.msrb.mxu1 %v5426_v55  ;;  %v5463_v36 = vld [vmem:[%s7001_s1 + $0x288] sm:$0xff]  ;;  %v5462_v40 = vld [vmem:[%s7001_s1 + $0x280] sm:$0xff]  ;;  %v5493_v43 = vld [vmem:[%s7001_s1 + $0x378] sm:$0xff] }
  0x30   :  { %3286 = vmatpush.bf16.msrb.mxu2 %v5434_v56  ;;  %v5471_v37 = vld [vmem:[%s7001_s1 + $0x2c8] sm:$0xff]  ;;  %v5470_v41 = vld [vmem:[%s7001_s1 + $0x2c0] sm:$0xff]  ;;  %v5501_v44 = vld [vmem:[%s7001_s1 + $0x3b8] sm:$0xff] }
  0x31   :  { %3299 = vmatpush.bf16.msrb.mxu3 %v5442_v57  ;;  %v5509_v45 = vld [vmem:[%s7001_s1 + $0x3f8] sm:$0xff]  ;;  %v805_v46 = vld [vmem:[#allocation1] sm:$0xff]  ;;  %v806_v48 = vld [vmem:[#allocation1 + $0x9] sm:$0xff] }
  0x32   :  { %3261 = vmatpush.bf16.msrb.mxu0 %v5417_v58  ;;  %v807_v47 = vld [vmem:[#allocation1 + $0x12] sm:$0xff]  ;;  %v5483_v54 = vld [vmem:[%s7001_s1 + $0x328] sm:$0xff]  ;;  %v5482_v58 = vld [vmem:[%s7001_s1 + $0x320] sm:$0xff] }
  0x33   :  { %3274 = vmatpush.bf16.msrb.mxu1 %v5425_v59  ;;  %v5500_v52 = vld [vmem:[%s7001_s1 + $0x3b0] sm:$0xff]  ;;  %v5491_v55 = vld [vmem:[%s7001_s1 + $0x368] sm:$0xff]  ;;  %v5490_v59 = vld [vmem:[%s7001_s1 + $0x360] sm:$0xff] }
  0x34   :  { %3287 = vmatpush.bf16.msrb.mxu2 %v5433_v60  ;;  %v5499_v56 = vld [vmem:[%s7001_s1 + $0x3a8] sm:$0xff]  ;;  %v5498_v60 = vld [vmem:[%s7001_s1 + $0x3a0] sm:$0xff] }
  0x35   :  { %3300 = vmatpush.bf16.msrb.mxu3 %v5441_v61  ;;  %v5507_v57 = vld [vmem:[%s7001_s1 + $0x3e8] sm:$0xff]  ;;  %v5506_v61 = vld [vmem:[%s7001_s1 + $0x3e0] sm:$0xff] }
  0x36   :  { %3262 = vmatpush.bf16.msrb.mxu0 %v5416_v62  ;;  %v5481_v62 = vld [vmem:[%s7001_s1 + $0x318] sm:$0xff] }
  0x37   :  { %3275 = vmatpush.bf16.msrb.mxu1 %v5424_v63  ;;  %v5489_v63 = vld [vmem:[%s7001_s1 + $0x358] sm:$0xff] }
  0x38   :  { %3288 = vmatpush.bf16.msrb.mxu2 %v5432_v0  ;;  %v5497_v0 = vld [vmem:[%s7001_s1 + $0x398] sm:$0xff] }
  0x39   :  { %3301 = vmatpush.bf16.msrb.mxu3 %v5440_v1  ;;  %v5505_v1 = vld [vmem:[%s7001_s1 + $0x3d8] sm:$0xff] }
  0x3a   :  { %3263 = vmatpush.bf16.msrb.mxu0 %v5415_v2  ;;  %v5480_v2 = vld [vmem:[%s7001_s1 + $0x310] sm:$0xff] }
  0x3b   :  { %3276 = vmatpush.bf16.msrb.mxu1 %v5423_v3  ;;  %v5488_v3 = vld [vmem:[%s7001_s1 + $0x350] sm:$0xff] }
  0x3c   :  { %3289 = vmatpush.bf16.msrb.mxu2 %v5431_v4  ;;  %v5496_v4 = vld [vmem:[%s7001_s1 + $0x390] sm:$0xff] }
  0x3d   :  { %3302 = vmatpush.bf16.msrb.mxu3 %v5439_v5  ;;  %v5504_v5 = vld [vmem:[%s7001_s1 + $0x3d0] sm:$0xff] }
  0x3e   :  { %3264 = vmatpush.bf16.msrb.mxu0 %v5414_v6  ;;  %v5479_v6 = vld [vmem:[%s7001_s1 + $0x308] sm:$0xff] }
  0x3f   :  { %3277 = vmatpush.bf16.msrb.mxu1 %v5422_v7  ;;  %v5487_v7 = vld [vmem:[%s7001_s1 + $0x348] sm:$0xff] }
  0x40   :  { %3290 = vmatpush.bf16.msrb.mxu2 %v5430_v8  ;;  %v5495_v8 = vld [vmem:[%s7001_s1 + $0x388] sm:$0xff] }
  0x41   :  { %3303 = vmatpush.bf16.msrb.mxu3 %v5438_v9  ;;  %3265 = vmatmul.bf16.vlgmr.msrb.gmra.mxu0 %v799_v50  ;;  %v5484_v50 = vld [vmem:[%s7001_s1 + $0x330] sm:$0xff]  ;;  %v5503_v9 = vld [vmem:[%s7001_s1 + $0x3c8] sm:$0xff] }
  0x42   :  { %3309 = vmatpush.bf16.msra.mxu0 %v5453_v10  ;;  %3278 = vmatmul.bf16.vlgmr.msrb.gmra.mxu1 %v800_v53  ;;  %v5508_v53 = vld [vmem:[%s7001_s1 + $0x3f0] sm:$0xff]  ;;  %v809_v10 = vld [vmem:[#allocation1 + $0x24] sm:$0xff] }
  0x43   :  { %3322 = vmatpush.bf16.msra.mxu1 %v5461_v11  ;;  %3291 = vmatmul.bf16.vlgmr.msrb.gmra.mxu2 %v801_v49  ;;  %v808_v49 = vld [vmem:[#allocation1 + $0x1b] sm:$0xff] }
  0x44   :  { %3335 = vmatpush.bf16.msra.mxu2 %v5469_v12  ;;  %3304 = vmatmul.bf16.vlgmr.msrb.gmra.mxu3 %v802_v51  ;;  %v5492_v51 = vld [vmem:[%s7001_s1 + $0x370] sm:$0xff] }
  0x45   :  { %3348 = vmatpush.bf16.msra.mxu3 %v5477_v13  ;;  %v811_v11 = vld [vmem:[#allocation1 + $0x36] sm:$0xff]  ;;  %v810_v12 = vld [vmem:[#allocation1 + $0x2d] sm:$0xff]  ;;  %v812_v13 = vld [vmem:[#allocation1 + $0x3f] sm:$0xff] }
  0x46   :  { %3310 = vmatpush.bf16.msra.mxu0 %v5452_v14  ;;  %v17_v14 = vld [vmem:[%s7000_s0 + $0x10] sm:$0xff] }
  0x47   :  { %3323 = vmatpush.bf16.msra.mxu1 %v5460_v15  ;;  %814 = vst [vmem:[#allocation1] ss:$9 sm:$0xff] %v17_v14  ;;  %v5478_v15 = vld [vmem:[%s7001_s1 + $0x300] sm:$0xff]  ;;  %v5561_v14 = vld [vmem:[%s7001_s1 + $0x598] sm:$0xff] }
  0x48   :  { %3336 = vmatpush.bf16.msra.mxu2 %v5468_v16  ;;  %v5486_v16 = vld [vmem:[%s7001_s1 + $0x340] sm:$0xff] }
  0x49   :  { %3349 = vmatpush.bf16.msra.mxu3 %v5476_v17  ;;  %v5494_v17 = vld [vmem:[%s7001_s1 + $0x380] sm:$0xff] }
  0x4a   :  { %3311 = vmatpush.bf16.msra.mxu0 %v5451_v18  ;;  %v5502_v18 = vld [vmem:[%s7001_s1 + $0x3c0] sm:$0xff] }
  0x4b   :  { %3324 = vmatpush.bf16.msra.mxu1 %v5459_v19  ;;  %v5517_v19 = vld [vmem:[%s7001_s1 + $0x438] sm:$0xff] }
  0x4c   :  { %3337 = vmatpush.bf16.msra.mxu2 %v5467_v20  ;;  %v5525_v20 = vld [vmem:[%s7001_s1 + $0x478] sm:$0xff] }
  0x4d   :  { %3350 = vmatpush.bf16.msra.mxu3 %v5475_v21  ;;  %v5533_v21 = vld [vmem:[%s7001_s1 + $0x4b8] sm:$0xff] }
  0x4e   :  { %3312 = vmatpush.bf16.msra.mxu0 %v5450_v22  ;;  %v5541_v22 = vld [vmem:[%s7001_s1 + $0x4f8] sm:$0xff] }
  0x4f   :  { %3325 = vmatpush.bf16.msra.mxu1 %v5458_v23  ;;  %v5516_v23 = vld [vmem:[%s7001_s1 + $0x430] sm:$0xff] }
  0x50   :  { %3338 = vmatpush.bf16.msra.mxu2 %v5466_v24  ;;  %v5524_v24 = vld [vmem:[%s7001_s1 + $0x470] sm:$0xff] }
  0x51   :  { %3351 = vmatpush.bf16.msra.mxu3 %v5474_v25  ;;  %v5532_v25 = vld [vmem:[%s7001_s1 + $0x4b0] sm:$0xff] }
  0x52   :  { %3313 = vmatpush.bf16.msra.mxu0 %v5449_v26  ;;  %v5540_v26 = vld [vmem:[%s7001_s1 + $0x4f0] sm:$0xff] }
  0x53   :  { %3326 = vmatpush.bf16.msra.mxu1 %v5457_v27  ;;  %v5515_v27 = vld [vmem:[%s7001_s1 + $0x428] sm:$0xff] }
  0x54   :  { %3339 = vmatpush.bf16.msra.mxu2 %v5465_v28  ;;  %v5523_v28 = vld [vmem:[%s7001_s1 + $0x468] sm:$0xff] }
  0x55   :  { %3352 = vmatpush.bf16.msra.mxu3 %v5473_v29  ;;  %v5531_v29 = vld [vmem:[%s7001_s1 + $0x4a8] sm:$0xff] }
  0x56   :  { %3314 = vmatpush.bf16.msra.mxu0 %v5448_v30  ;;  %v5539_v30 = vld [vmem:[%s7001_s1 + $0x4e8] sm:$0xff] }
  0x57   :  { %3327 = vmatpush.bf16.msra.mxu1 %v5456_v31  ;;  %v5514_v31 = vld [vmem:[%s7001_s1 + $0x420] sm:$0xff] }
  0x58   :  { %3340 = vmatpush.bf16.msra.mxu2 %v5464_v32  ;;  %v5522_v32 = vld [vmem:[%s7001_s1 + $0x460] sm:$0xff] }
  0x59   :  { %3353 = vmatpush.bf16.msra.mxu3 %v5472_v33  ;;  %v5530_v33 = vld [vmem:[%s7001_s1 + $0x4a0] sm:$0xff] }
  0x5a   :  { %3315 = vmatpush.bf16.msra.mxu0 %v5447_v34  ;;  %v5538_v34 = vld [vmem:[%s7001_s1 + $0x4e0] sm:$0xff] }
  0x5b   :  { %3328 = vmatpush.bf16.msra.mxu1 %v5455_v35  ;;  %v5513_v35 = vld [vmem:[%s7001_s1 + $0x418] sm:$0xff] }
  0x5c   :  { %3341 = vmatpush.bf16.msra.mxu2 %v5463_v36  ;;  %v5521_v36 = vld [vmem:[%s7001_s1 + $0x458] sm:$0xff] }
  0x5d   :  { %3354 = vmatpush.bf16.msra.mxu3 %v5471_v37  ;;  %v5529_v37 = vld [vmem:[%s7001_s1 + $0x498] sm:$0xff] }
  0x5e   :  { %3316 = vmatpush.bf16.msra.mxu0 %v5446_v38  ;;  %v5537_v38 = vld [vmem:[%s7001_s1 + $0x4d8] sm:$0xff] }
  0x5f   :  { %3329 = vmatpush.bf16.msra.mxu1 %v5454_v39  ;;  %v5512_v39 = vld [vmem:[%s7001_s1 + $0x410] sm:$0xff] }
  0x60   :  { %3342 = vmatpush.bf16.msra.mxu2 %v5462_v40  ;;  %v5520_v40 = vld [vmem:[%s7001_s1 + $0x450] sm:$0xff] }
  0x61   :  { %3355 = vmatpush.bf16.msra.mxu3 %v5470_v41  ;;  %3317 = vmatmul.bf16.vlgmr.msra.gmra.mxu0 %v805_v46  ;;  %v5528_v41 = vld [vmem:[%s7001_s1 + $0x490] sm:$0xff]  ;;  %v5535_v46 = vld [vmem:[%s7001_s1 + $0x4c8] sm:$0xff] }
  0x62   :  { %3361 = vmatpush.bf16.msrb.mxu0 %v5485_v42  ;;  %3330 = vmatmul.bf16.vlgmr.msra.gmra.mxu1 %v806_v48  ;;  %v5536_v42 = vld [vmem:[%s7001_s1 + $0x4d0] sm:$0xff]  ;;  %v5518_v48 = vld [vmem:[%s7001_s1 + $0x440] sm:$0xff] }
  0x63   :  { %3374 = vmatpush.bf16.msrb.mxu1 %v5493_v43  ;;  %3343 = vmatmul.bf16.vlgmr.msra.gmra.mxu2 %v807_v47  ;;  %v5511_v43 = vld [vmem:[%s7001_s1 + $0x408] sm:$0xff]  ;;  %v5510_v47 = vld [vmem:[%s7001_s1 + $0x400] sm:$0xff] }
  0x64   :  { %3387 = vmatpush.bf16.msrb.mxu2 %v5501_v44  ;;  %3356 = vmatmul.bf16.vlgmr.msra.gmra.mxu3 %v808_v49  ;;  %v5519_v44 = vld [vmem:[%s7001_s1 + $0x448] sm:$0xff]  ;;  %v5526_v49 = vld [vmem:[%s7001_s1 + $0x480] sm:$0xff] }
  0x65   :  { %3400 = vmatpush.bf16.msrb.mxu3 %v5509_v45  ;;  %v5527_v45 = vld [vmem:[%s7001_s1 + $0x488] sm:$0xff] }
  0x66   :  { %3362 = vmatpush.bf16.msrb.mxu0 %v5484_v50  ;;  %v5534_v50 = vld [vmem:[%s7001_s1 + $0x4c0] sm:$0xff] }
  0x67   :  { %3375 = vmatpush.bf16.msrb.mxu1 %v5492_v51  ;;  %v5549_v51 = vld [vmem:[%s7001_s1 + $0x538] sm:$0xff] }
  0x68   :  { %3388 = vmatpush.bf16.msrb.mxu2 %v5500_v52  ;;  %v5557_v52 = vld [vmem:[%s7001_s1 + $0x578] sm:$0xff] }
  0x69   :  { %3401 = vmatpush.bf16.msrb.mxu3 %v5508_v53  ;;  %v5565_v53 = vld [vmem:[%s7001_s1 + $0x5b8] sm:$0xff] }
  0x6a   :  { %3363 = vmatpush.bf16.msrb.mxu0 %v5483_v54  ;;  %v5573_v54 = vld [vmem:[%s7001_s1 + $0x5f8] sm:$0xff] }
  0x6b   :  { %3376 = vmatpush.bf16.msrb.mxu1 %v5491_v55  ;;  %v815_v55 = vld [vmem:[#allocation1] sm:$0xff] }
  0x6c   :  { %3389 = vmatpush.bf16.msrb.mxu2 %v5499_v56  ;;  %v817_v56 = vld [vmem:[#allocation1 + $0x12] sm:$0xff] }
  0x6d   :  { %3402 = vmatpush.bf16.msrb.mxu3 %v5507_v57  ;;  %v816_v57 = vld [vmem:[#allocation1 + $0x9] sm:$0xff] }
  0x6e   :  { %3364 = vmatpush.bf16.msrb.mxu0 %v5482_v58  ;;  %v818_v58 = vld [vmem:[#allocation1 + $0x1b] sm:$0xff] }
  0x6f   :  { %3377 = vmatpush.bf16.msrb.mxu1 %v5490_v59  ;;  %v5548_v59 = vld [vmem:[%s7001_s1 + $0x530] sm:$0xff] }
  0x70   :  { %3390 = vmatpush.bf16.msrb.mxu2 %v5498_v60  ;;  %v5556_v60 = vld [vmem:[%s7001_s1 + $0x570] sm:$0xff] }
  0x71   :  { %3403 = vmatpush.bf16.msrb.mxu3 %v5506_v61  ;;  %v5564_v61 = vld [vmem:[%s7001_s1 + $0x5b0] sm:$0xff] }
  0x72   :  { %3365 = vmatpush.bf16.msrb.mxu0 %v5481_v62  ;;  %v5572_v62 = vld [vmem:[%s7001_s1 + $0x5f0] sm:$0xff] }
  0x73   :  { %3378 = vmatpush.bf16.msrb.mxu1 %v5489_v63  ;;  %v5547_v63 = vld [vmem:[%s7001_s1 + $0x528] sm:$0xff] }
  0x74   :  { %3391 = vmatpush.bf16.msrb.mxu2 %v5497_v0  ;;  %v5555_v0 = vld [vmem:[%s7001_s1 + $0x568] sm:$0xff] }
  0x75   :  { %3404 = vmatpush.bf16.msrb.mxu3 %v5505_v1  ;;  %v5767_v1 = vld [vmem:[%s7002_s2] ss:$0 sm:$0xff] }
  0x76   :  { %3366 = vmatpush.bf16.msrb.mxu0 %v5480_v2  ;;  %v5563_v2 = vld [vmem:[%s7001_s1 + $0x5a8] sm:$0xff] }
  0x77   :  { %3379 = vmatpush.bf16.msrb.mxu1 %v5488_v3  ;;  %v5571_v3 = vld [vmem:[%s7001_s1 + $0x5e8] sm:$0xff] }
  0x78   :  { %3392 = vmatpush.bf16.msrb.mxu2 %v5496_v4 }
  0x79   :  { %3405 = vmatpush.bf16.msrb.mxu3 %v5504_v5  ;;  %v5546_v5 = vld [vmem:[%s7001_s1 + $0x520] sm:$0xff] }
  0x7a   :  { %3367 = vmatpush.bf16.msrb.mxu0 %v5479_v6  ;;  %v5554_v6 = vld [vmem:[%s7001_s1 + $0x560] sm:$0xff] }
  0x7b   :  { %3380 = vmatpush.bf16.msrb.mxu1 %v5487_v7 }
  0x7c   :  { %3393 = vmatpush.bf16.msrb.mxu2 %v5495_v8 }
  0x7d   :  { %3406 = vmatpush.bf16.msrb.mxu3 %v5503_v9  ;;  %v5562_v9 = vld [vmem:[%s7001_s1 + $0x5a0] sm:$0xff] }
  0x7e   :  { %3368 = vmatpush.bf16.msrb.mxu0 %v5478_v15  ;;  %v5569_v15 = vld [vmem:[%s7001_s1 + $0x5d8] sm:$0xff] }
  0x7f   :  { %3381 = vmatpush.bf16.msrb.mxu1 %v5486_v16 }
  0x80   :  { %3394 = vmatpush.bf16.msrb.mxu2 %v5494_v17 }
  0x81   :  { %3407 = vmatpush.bf16.msrb.mxu3 %v5502_v18  ;;  %3369 = vmatmul.bf16.vlgmr.msrb.gmra.mxu0 %v809_v10  ;;  %v5570_v10 = vld [vmem:[%s7001_s1 + $0x5e0] sm:$0xff] }
  0x82   :  { %3413 = vmatpush.bf16.msra.mxu0 %v5517_v19  ;;  %3382 = vmatmul.bf16.vlgmr.msrb.gmra.mxu1 %v810_v12  ;;  %v5545_v12 = vld [vmem:[%s7001_s1 + $0x518] sm:$0xff] }
  0x83   :  { %3426 = vmatpush.bf16.msra.mxu1 %v5525_v20  ;;  %3395 = vmatmul.bf16.vlgmr.msrb.gmra.mxu2 %v811_v11  ;;  %v5544_v20 = vld [vmem:[%s7001_s1 + $0x510] sm:$0xff] }
  0x84   :  { %3439 = vmatpush.bf16.msra.mxu2 %v5533_v21  ;;  %3408 = vmatmul.bf16.vlgmr.msrb.gmra.mxu3 %v812_v13  ;;  %v5553_v13 = vld [vmem:[%s7001_s1 + $0x558] sm:$0xff]  ;;  %v5552_v21 = vld [vmem:[%s7001_s1 + $0x550] sm:$0xff] }
  0x85   :  { %3452 = vmatpush.bf16.msra.mxu3 %v5541_v22 }
  0x86   :  { %3414 = vmatpush.bf16.msra.mxu0 %v5516_v23 }
  0x87   :  { %3427 = vmatpush.bf16.msra.mxu1 %v5524_v24  ;;  %v5560_v24 = vld [vmem:[%s7001_s1 + $0x590] sm:$0xff] }
  0x88   :  { %3440 = vmatpush.bf16.msra.mxu2 %v5532_v25  ;;  %v5568_v25 = vld [vmem:[%s7001_s1 + $0x5d0] sm:$0xff] }
  0x89   :  { %3453 = vmatpush.bf16.msra.mxu3 %v5540_v26  ;;  %v5543_v26 = vld [vmem:[%s7001_s1 + $0x508] sm:$0xff] }
  0x8a   :  { %3415 = vmatpush.bf16.msra.mxu0 %v5515_v27  ;;  %v5551_v27 = vld [vmem:[%s7001_s1 + $0x548] sm:$0xff] }
  0x8b   :  { %3428 = vmatpush.bf16.msra.mxu1 %v5523_v28  ;;  %v5559_v28 = vld [vmem:[%s7001_s1 + $0x588] sm:$0xff] }
  0x8c   :  { %3441 = vmatpush.bf16.msra.mxu2 %v5531_v29  ;;  %v5567_v29 = vld [vmem:[%s7001_s1 + $0x5c8] sm:$0xff] }
  0x8d   :  { %3454 = vmatpush.bf16.msra.mxu3 %v5539_v30  ;;  %v819_v30 = vld [vmem:[#allocation1 + $0x24] sm:$0xff] }
  0x8e   :  { %3416 = vmatpush.bf16.msra.mxu0 %v5514_v31  ;;  %v821_v31 = vld [vmem:[#allocation1 + $0x36] sm:$0xff] }
  0x8f   :  { %3429 = vmatpush.bf16.msra.mxu1 %v5522_v32 }
  0x90   :  { %3442 = vmatpush.bf16.msra.mxu2 %v5530_v33  ;;  %v820_v33 = vld [vmem:[#allocation1 + $0x2d] sm:$0xff] }
  0x91   :  { %3455 = vmatpush.bf16.msra.mxu3 %v5538_v34  ;;  %v822_v34 = vld [vmem:[#allocation1 + $0x3f] sm:$0xff] }
  0x92   :  { %3417 = vmatpush.bf16.msra.mxu0 %v5513_v35 }
  0x93   :  { %3430 = vmatpush.bf16.msra.mxu1 %v5521_v36  ;;  %v18_v36 = vld [vmem:[%s7000_s0 + $0x18] sm:$0xff] }
  0x94   :  { %3443 = vmatpush.bf16.msra.mxu2 %v5529_v37  ;;  %824 = vst [vmem:[#allocation1] ss:$9 sm:$0xff] %v18_v36  ;;  %v5542_v37 = vld [vmem:[%s7001_s1 + $0x500] sm:$0xff]  ;;  %v5635_v36 = vld [vmem:[%s7001_s1 + $0x7e8] sm:$0xff] }
  0x95   :  { %3456 = vmatpush.bf16.msra.mxu3 %v5537_v38  ;;  %v5550_v38 = vld [vmem:[%s7001_s1 + $0x540] sm:$0xff] }
  0x96   :  { %3418 = vmatpush.bf16.msra.mxu0 %v5512_v39  ;;  %v5558_v39 = vld [vmem:[%s7001_s1 + $0x580] sm:$0xff] }
  0x97   :  { %3431 = vmatpush.bf16.msra.mxu1 %v5520_v40  ;;  %v5566_v40 = vld [vmem:[%s7001_s1 + $0x5c0] sm:$0xff] }
  0x98   :  { %3444 = vmatpush.bf16.msra.mxu2 %v5528_v41  ;;  %v5581_v41 = vld [vmem:[%s7001_s1 + $0x638] sm:$0xff] }
  0x99   :  { %3457 = vmatpush.bf16.msra.mxu3 %v5536_v42  ;;  %v5589_v42 = vld [vmem:[%s7001_s1 + $0x678] sm:$0xff] }
  0x9a   :  { %3419 = vmatpush.bf16.msra.mxu0 %v5511_v43  ;;  %v5597_v43 = vld [vmem:[%s7001_s1 + $0x6b8] sm:$0xff] }
  0x9b   :  { %3432 = vmatpush.bf16.msra.mxu1 %v5519_v44  ;;  %v5605_v44 = vld [vmem:[%s7001_s1 + $0x6f8] sm:$0xff] }
  0x9c   :  { %3445 = vmatpush.bf16.msra.mxu2 %v5527_v45  ;;  %v5580_v45 = vld [vmem:[%s7001_s1 + $0x630] sm:$0xff] }
  0x9d   :  { %3458 = vmatpush.bf16.msra.mxu3 %v5535_v46  ;;  %v5588_v46 = vld [vmem:[%s7001_s1 + $0x670] sm:$0xff] }
  0x9e   :  { %3420 = vmatpush.bf16.msra.mxu0 %v5510_v47  ;;  %v3214_v4 = vpop.f32.mrf.mxu0  ;;  %v5596_v47 = vld [vmem:[%s7001_s1 + $0x6b0] sm:$0xff] }
  0x9f   :  { %3433 = vmatpush.bf16.msra.mxu1 %v5518_v48  ;;  %v3215_v7 = vadd.f32 %v5767_v1, %v3214_v4  ;;  %v3227_v8 = vpop.f32.mrf.mxu1  ;;  %v5604_v48 = vld [vmem:[%s7001_s1 + $0x6f0] sm:$0xff] }
  0xa0   :  { %3446 = vmatpush.bf16.msra.mxu2 %v5526_v49  ;;  %v5579_v49 = vld [vmem:[%s7001_s1 + $0x628] sm:$0xff] }
  0xa1   :  { %3459 = vmatpush.bf16.msra.mxu3 %v5534_v50  ;;  %3421 = vmatmul.bf16.vlgmr.msra.gmra.mxu0 %v815_v55  ;;  %v3228_v11 = vadd.f32 %v3227_v8, %v3215_v7  ;;  %v5587_v50 = vld [vmem:[%s7001_s1 + $0x668] sm:$0xff]  ;;  %v5586_v55 = vld [vmem:[%s7001_s1 + $0x660] sm:$0xff] }
  0xa2   :  { %3465 = vmatpush.bf16.msrb.mxu0 %v5549_v51  ;;  %3434 = vmatmul.bf16.vlgmr.msra.gmra.mxu1 %v816_v57  ;;  %v5595_v51 = vld [vmem:[%s7001_s1 + $0x6a8] sm:$0xff] }
  0xa3   :  { %3478 = vmatpush.bf16.msrb.mxu1 %v5557_v52  ;;  %3447 = vmatmul.bf16.vlgmr.msra.gmra.mxu2 %v817_v56  ;;  %v5603_v52 = vld [vmem:[%s7001_s1 + $0x6e8] sm:$0xff] }
  0xa4   :  { %3491 = vmatpush.bf16.msrb.mxu2 %v5565_v53  ;;  %3460 = vmatmul.bf16.vlgmr.msra.gmra.mxu3 %v818_v58  ;;  %v5594_v58 = vld [vmem:[%s7001_s1 + $0x6a0] sm:$0xff] }
  0xa5   :  { %3504 = vmatpush.bf16.msrb.mxu3 %v5573_v54  ;;  %v5578_v54 = vld [vmem:[%s7001_s1 + $0x620] sm:$0xff] }
  0xa6   :  { %3466 = vmatpush.bf16.msrb.mxu0 %v5548_v59  ;;  %v3240_v16 = vpop.f32.mrf.mxu2  ;;  %v3216_v19 = vpop.f32.mrf.mxu0  ;;  %v5602_v59 = vld [vmem:[%s7001_s1 + $0x6e0] sm:$0xff] }
  0xa7   :  { %3479 = vmatpush.bf16.msrb.mxu1 %v5556_v60  ;;  %v3241_v17 = vadd.f32 %v3240_v16, %v3228_v11  ;;  %v3253_v18 = vpop.f32.mrf.mxu3  ;;  %v3229_v23 = vpop.f32.mrf.mxu1  ;;  %v5575_v11 = vld [vmem:[%s7001_s1 + $0x608] sm:$0xff]  ;;  %v5590_v19 = vld [vmem:[%s7001_s1 + $0x680] sm:$0xff] }
  0xa8   :  { %3492 = vmatpush.bf16.msrb.mxu2 %v5564_v61  ;;  %v5577_v61 = vld [vmem:[%s7001_s1 + $0x618] sm:$0xff] }
  0xa9   :  { %3505 = vmatpush.bf16.msrb.mxu3 %v5572_v62  ;;  %v6373_v22 = vadd.f32 %v3253_v18, %v3241_v17  ;;  %v5585_v62 = vld [vmem:[%s7001_s1 + $0x658] sm:$0xff]  ;;  %v5574_v17 = vld [vmem:[%s7001_s1 + $0x600] sm:$0xff] }
  0xaa   :  { %3467 = vmatpush.bf16.msrb.mxu0 %v5547_v63  ;;  %v5593_v63 = vld [vmem:[%s7001_s1 + $0x698] sm:$0xff]  ;;  %v5582_v18 = vld [vmem:[%s7001_s1 + $0x640] sm:$0xff] }
  0xab   :  { %3480 = vmatpush.bf16.msrb.mxu1 %v5555_v0  ;;  %v5601_v0 = vld [vmem:[%s7001_s1 + $0x6d8] sm:$0xff] }
  0xac   :  { %3493 = vmatpush.bf16.msrb.mxu2 %v5563_v2  ;;  %v5629_v23 = vld [vmem:[%s7001_s1 + $0x7b8] sm:$0xff] }
  0xad   :  { %3506 = vmatpush.bf16.msrb.mxu3 %v5571_v3 }
  0xae   :  { %3468 = vmatpush.bf16.msrb.mxu0 %v5546_v5  ;;  %v3242_v32 = vpop.f32.mrf.mxu2  ;;  %v5576_v5 = vld [vmem:[%s7001_s1 + $0x610] sm:$0xff] }
  0xaf   :  { %3481 = vmatpush.bf16.msrb.mxu1 %v5554_v6  ;;  %v3255_v35 = vpop.f32.mrf.mxu3  ;;  %v5584_v6 = vld [vmem:[%s7001_s1 + $0x650] sm:$0xff] }
  0xb0   :  { %3494 = vmatpush.bf16.msrb.mxu2 %v5562_v9  ;;  %v5592_v9 = vld [vmem:[%s7001_s1 + $0x690] sm:$0xff]  ;;  %v5627_v35 = vld [vmem:[%s7001_s1 + $0x7a8] sm:$0xff] }
  0xb1   :  { %3507 = vmatpush.bf16.msrb.mxu3 %v5570_v10  ;;  %v5600_v10 = vld [vmem:[%s7001_s1 + $0x6d0] sm:$0xff] }
  0xb2   :  { %3469 = vmatpush.bf16.msrb.mxu0 %v5545_v12  ;;  %v5583_v12 = vld [vmem:[%s7001_s1 + $0x648] sm:$0xff]  ;;  %v5636_v32 = vld [vmem:[%s7001_s1 + $0x7f0] sm:$0xff] }
  0xb3   :  { %3482 = vmatpush.bf16.msrb.mxu1 %v5553_v13  ;;  %v5591_v13 = vld [vmem:[%s7001_s1 + $0x688] sm:$0xff] }
  0xb4   :  { %3495 = vmatpush.bf16.msrb.mxu2 %v5561_v14  ;;  %v5599_v14 = vld [vmem:[%s7001_s1 + $0x6c8] sm:$0xff] }
  0xb5   :  { %3508 = vmatpush.bf16.msrb.mxu3 %v5569_v15 }
  0xb6   :  { %3470 = vmatpush.bf16.msrb.mxu0 %v5544_v20  ;;  %v5598_v20 = vld [vmem:[%s7001_s1 + $0x6c0] sm:$0xff] }
  0xb7   :  { %3483 = vmatpush.bf16.msrb.mxu1 %v5552_v21  ;;  %v5613_v21 = vld [vmem:[%s7001_s1 + $0x738] sm:$0xff] }
  0xb8   :  { %3496 = vmatpush.bf16.msrb.mxu2 %v5560_v24  ;;  %v5637_v24 = vld [vmem:[%s7001_s1 + $0x7f8] sm:$0xff] }
  0xb9   :  { %3509 = vmatpush.bf16.msrb.mxu3 %v5568_v25  ;;  %v825_v25 = vld [vmem:[#allocation1] sm:$0xff] }
  0xba   :  { %3471 = vmatpush.bf16.msrb.mxu0 %v5543_v26  ;;  %v827_v26 = vld [vmem:[#allocation1 + $0x12] sm:$0xff] }
  0xbb   :  { %3484 = vmatpush.bf16.msrb.mxu1 %v5551_v27  ;;  %v826_v27 = vld [vmem:[#allocation1 + $0x9] sm:$0xff] }
  0xbc   :  { %3497 = vmatpush.bf16.msrb.mxu2 %v5559_v28  ;;  %v828_v28 = vld [vmem:[#allocation1 + $0x1b] sm:$0xff] }
  0xbd   :  { %3510 = vmatpush.bf16.msrb.mxu3 %v5567_v29  ;;  %v5612_v29 = vld [vmem:[%s7001_s1 + $0x730] sm:$0xff] }
  0xbe   :  { %3472 = vmatpush.bf16.msrb.mxu0 %v5542_v37  ;;  %v3266_v53 = vpop.f32.mrf.mxu0 }
  0xbf   :  { %3485 = vmatpush.bf16.msrb.mxu1 %v5550_v38  ;;  %v3267_v56 = vadd.f32 %v3266_v53, %v6373_v22  ;;  %v3279_v57 = vpop.f32.mrf.mxu1  ;;  %v5621_v22 = vld [vmem:[%s7001_s1 + $0x778] sm:$0xff] }
  0xc0   :  { %3498 = vmatpush.bf16.msrb.mxu2 %v5558_v39  ;;  %v5610_v39 = vld [vmem:[%s7001_s1 + $0x720] sm:$0xff] }
  0xc1   :  { %3511 = vmatpush.bf16.msrb.mxu3 %v5566_v40  ;;  %3473 = vmatmul.bf16.vlgmr.msrb.gmra.mxu0 %v819_v30  ;;  %v3280_v60 = vadd.f32 %v3279_v57, %v3267_v56  ;;  %v5620_v30 = vld [vmem:[%s7001_s1 + $0x770] sm:$0xff]  ;;  %v5618_v40 = vld [vmem:[%s7001_s1 + $0x760] sm:$0xff] }
  0xc2   :  { %3517 = vmatpush.bf16.msra.mxu0 %v5581_v41  ;;  %3486 = vmatmul.bf16.vlgmr.msrb.gmra.mxu1 %v820_v33  ;;  %v5611_v33 = vld [vmem:[%s7001_s1 + $0x728] sm:$0xff]  ;;  %v5624_v57 = vld [vmem:[%s7001_s1 + $0x790] sm:$0xff] }
  0xc3   :  { %3530 = vmatpush.bf16.msra.mxu1 %v5589_v42  ;;  %3499 = vmatmul.bf16.vlgmr.msrb.gmra.mxu2 %v821_v31  ;;  %v5628_v31 = vld [vmem:[%s7001_s1 + $0x7b0] sm:$0xff]  ;;  %v5626_v42 = vld [vmem:[%s7001_s1 + $0x7a0] sm:$0xff] }
  0xc4   :  { %3543 = vmatpush.bf16.msra.mxu2 %v5597_v43  ;;  %3512 = vmatmul.bf16.vlgmr.msrb.gmra.mxu3 %v822_v34  ;;  %v5619_v34 = vld [vmem:[%s7001_s1 + $0x768] sm:$0xff]  ;;  %v5634_v43 = vld [vmem:[%s7001_s1 + $0x7e0] sm:$0xff] }
  0xc5   :  { %3556 = vmatpush.bf16.msra.mxu3 %v5605_v44 }
  0xc6   :  { %3518 = vmatpush.bf16.msra.mxu0 %v5580_v45  ;;  %v3292_v1 = vpop.f32.mrf.mxu2  ;;  %v3268_v4 = vpop.f32.mrf.mxu0  ;;  %v5609_v45 = vld [vmem:[%s7001_s1 + $0x718] sm:$0xff] }
  0xc7   :  { %3531 = vmatpush.bf16.msra.mxu1 %v5588_v46  ;;  %v3293_v2 = vadd.f32 %v3292_v1, %v3280_v60  ;;  %v3305_v3 = vpop.f32.mrf.mxu3  ;;  %v3281_v8 = vpop.f32.mrf.mxu1  ;;  %v5617_v46 = vld [vmem:[%s7001_s1 + $0x758] sm:$0xff]  ;;  %v5615_v60 = vld [vmem:[%s7001_s1 + $0x748] sm:$0xff] }
  0xc8   :  { %3544 = vmatpush.bf16.msra.mxu2 %v5596_v47  ;;  %v5625_v47 = vld [vmem:[%s7001_s1 + $0x798] sm:$0xff]  ;;  %v5622_v8 = vld [vmem:[%s7001_s1 + $0x780] sm:$0xff] }
  0xc9   :  { %3557 = vmatpush.bf16.msra.mxu3 %v5604_v48  ;;  %v3306_v7 = vadd.f32 %v3305_v3, %v3293_v2  ;;  %v5633_v48 = vld [vmem:[%s7001_s1 + $0x7d8] sm:$0xff]  ;;  %v830_v2 = vld [vmem:[#allocation1 + $0x2d] sm:$0xff] }
  0xca   :  { %3519 = vmatpush.bf16.msra.mxu0 %v5579_v49  ;;  %v832_v3 = vld [vmem:[#allocation1 + $0x3f] sm:$0xff] }
  0xcb   :  { %3532 = vmatpush.bf16.msra.mxu1 %v5587_v50 }
  0xcc   :  { %3545 = vmatpush.bf16.msra.mxu2 %v5595_v51 }
  0xcd   :  { %3558 = vmatpush.bf16.msra.mxu3 %v5603_v52 }
  0xce   :  { %3520 = vmatpush.bf16.msra.mxu0 %v5578_v54  ;;  %v3294_v15 = vpop.f32.mrf.mxu2  ;;  %v5608_v54 = vld [vmem:[%s7001_s1 + $0x710] sm:$0xff] }
  0xcf   :  { %3533 = vmatpush.bf16.msra.mxu1 %v5586_v55  ;;  %v3307_v16 = vpop.f32.mrf.mxu3  ;;  %v5616_v55 = vld [vmem:[%s7001_s1 + $0x750] sm:$0xff] }
  0xd0   :  { %3546 = vmatpush.bf16.msra.mxu2 %v5594_v58  ;;  %v5632_v58 = vld [vmem:[%s7001_s1 + $0x7d0] sm:$0xff] }
  0xd1   :  { %3559 = vmatpush.bf16.msra.mxu3 %v5602_v59  ;;  %v5607_v59 = vld [vmem:[%s7001_s1 + $0x708] sm:$0xff]  ;;  %v5652_v15 = vld [vmem:[%s7001_s1 + $0x870] sm:$0xff] }
  0xd2   :  { %3521 = vmatpush.bf16.msra.mxu0 %v5577_v61  ;;  %v5623_v61 = vld [vmem:[%s7001_s1 + $0x788] sm:$0xff]  ;;  %v5660_v16 = vld [vmem:[%s7001_s1 + $0x8b0] sm:$0xff] }
  0xd3   :  { %3534 = vmatpush.bf16.msra.mxu1 %v5585_v62  ;;  %v5631_v62 = vld [vmem:[%s7001_s1 + $0x7c8] sm:$0xff] }
  0xd4   :  { %3547 = vmatpush.bf16.msra.mxu2 %v5593_v63  ;;  %v829_v63 = vld [vmem:[#allocation1 + $0x24] sm:$0xff] }
  0xd5   :  { %3560 = vmatpush.bf16.msra.mxu3 %v5601_v0  ;;  %v831_v0 = vld [vmem:[#allocation1 + $0x36] sm:$0xff] }
  0xd6   :  { %3522 = vmatpush.bf16.msra.mxu0 %v5576_v5  ;;  %v19_v5 = vld [vmem:[%s7000_s0 + $0x20] sm:$0xff] }
  0xd7   :  { %3535 = vmatpush.bf16.msra.mxu1 %v5584_v6  ;;  %834 = vst [vmem:[#allocation1] ss:$9 sm:$0xff] %v19_v5  ;;  %v5606_v6 = vld [vmem:[%s7001_s1 + $0x700] sm:$0xff]  ;;  %v5699_v5 = vld [vmem:[%s7001_s1 + $0x9e8] sm:$0xff] }
  0xd8   :  { %3548 = vmatpush.bf16.msra.mxu2 %v5592_v9  ;;  %v5630_v9 = vld [vmem:[%s7001_s1 + $0x7c0] sm:$0xff] }
  0xd9   :  { %3561 = vmatpush.bf16.msra.mxu3 %v5600_v10  ;;  %v5645_v10 = vld [vmem:[%s7001_s1 + $0x838] sm:$0xff] }
  0xda   :  { %3523 = vmatpush.bf16.msra.mxu0 %v5575_v11  ;;  %v5653_v11 = vld [vmem:[%s7001_s1 + $0x878] sm:$0xff] }
  0xdb   :  { %3536 = vmatpush.bf16.msra.mxu1 %v5583_v12  ;;  %v5661_v12 = vld [vmem:[%s7001_s1 + $0x8b8] sm:$0xff] }
  0xdc   :  { %3549 = vmatpush.bf16.msra.mxu2 %v5591_v13  ;;  %v5669_v13 = vld [vmem:[%s7001_s1 + $0x8f8] sm:$0xff] }
  0xdd   :  { %3562 = vmatpush.bf16.msra.mxu3 %v5599_v14  ;;  %v5644_v14 = vld [vmem:[%s7001_s1 + $0x830] sm:$0xff] }
  0xde   :  { %3524 = vmatpush.bf16.msra.mxu0 %v5574_v17  ;;  %v3318_v37 = vpop.f32.mrf.mxu0  ;;  %v5668_v17 = vld [vmem:[%s7001_s1 + $0x8f0] sm:$0xff] }
  0xdf   :  { %3537 = vmatpush.bf16.msra.mxu1 %v5582_v18  ;;  %v3319_v38 = vadd.f32 %v3318_v37, %v3306_v7  ;;  %v3331_v41 = vpop.f32.mrf.mxu1  ;;  %v5614_v7 = vld [vmem:[%s7001_s1 + $0x740] sm:$0xff]  ;;  %v5643_v18 = vld [vmem:[%s7001_s1 + $0x828] sm:$0xff] }
  0xe0   :  { %3550 = vmatpush.bf16.msra.mxu2 %v5590_v19  ;;  %v5651_v19 = vld [vmem:[%s7001_s1 + $0x868] sm:$0xff] }
  0xe1   :  { %3563 = vmatpush.bf16.msra.mxu3 %v5598_v20  ;;  %3525 = vmatmul.bf16.vlgmr.msra.gmra.mxu0 %v825_v25  ;;  %v3332_v44 = vadd.f32 %v3331_v41, %v3319_v38  ;;  %v5659_v20 = vld [vmem:[%s7001_s1 + $0x8a8] sm:$0xff]  ;;  %v5650_v25 = vld [vmem:[%s7001_s1 + $0x860] sm:$0xff] }
  0xe2   :  { %3569 = vmatpush.bf16.msrb.mxu0 %v5613_v21  ;;  %3538 = vmatmul.bf16.vlgmr.msra.gmra.mxu1 %v826_v27  ;;  %v5667_v21 = vld [vmem:[%s7001_s1 + $0x8e8] sm:$0xff]  ;;  %v5658_v27 = vld [vmem:[%s7001_s1 + $0x8a0] sm:$0xff] }
  0xe3   :  { %3582 = vmatpush.bf16.msrb.mxu1 %v5621_v22  ;;  %3551 = vmatmul.bf16.vlgmr.msra.gmra.mxu2 %v827_v26 }
  0xe4   :  { %3595 = vmatpush.bf16.msrb.mxu2 %v5629_v23  ;;  %3564 = vmatmul.bf16.vlgmr.msra.gmra.mxu3 %v828_v28  ;;  %v5666_v28 = vld [vmem:[%s7001_s1 + $0x8e0] sm:$0xff] }
  0xe5   :  { %3608 = vmatpush.bf16.msrb.mxu3 %v5637_v24  ;;  %v5642_v24 = vld [vmem:[%s7001_s1 + $0x820] sm:$0xff] }
  0xe6   :  { %3570 = vmatpush.bf16.msrb.mxu0 %v5612_v29  ;;  %v3344_v49 = vpop.f32.mrf.mxu2  ;;  %v3320_v52 = vpop.f32.mrf.mxu0 }
  0xe7   :  { %3583 = vmatpush.bf16.msrb.mxu1 %v5620_v30  ;;  %v3345_v50 = vadd.f32 %v3344_v49, %v3332_v44  ;;  %v3357_v51 = vpop.f32.mrf.mxu3  ;;  %v3333_v56 = vpop.f32.mrf.mxu1  ;;  %v5641_v30 = vld [vmem:[%s7001_s1 + $0x818] sm:$0xff]  ;;  %v5639_v44 = vld [vmem:[%s7001_s1 + $0x808] sm:$0xff]  ;;  %v5654_v52 = vld [vmem:[%s7001_s1 + $0x880] sm:$0xff] }
  0xe8   :  { %3596 = vmatpush.bf16.msrb.mxu2 %v5628_v31  ;;  %v5649_v31 = vld [vmem:[%s7001_s1 + $0x858] sm:$0xff] }
  0xe9   :  { %3609 = vmatpush.bf16.msrb.mxu3 %v5636_v32  ;;  %v6565_v53 = vadd.f32 %v3357_v51, %v3345_v50  ;;  %v5657_v32 = vld [vmem:[%s7001_s1 + $0x898] sm:$0xff]  ;;  %v5638_v50 = vld [vmem:[%s7001_s1 + $0x800] sm:$0xff] }
  0xea   :  { %3571 = vmatpush.bf16.msrb.mxu0 %v5611_v33  ;;  %v5665_v33 = vld [vmem:[%s7001_s1 + $0x8d8] sm:$0xff]  ;;  %v5646_v51 = vld [vmem:[%s7001_s1 + $0x840] sm:$0xff] }
  0xeb   :  { %3584 = vmatpush.bf16.msrb.mxu1 %v5619_v34  ;;  %v5693_v56 = vld [vmem:[%s7001_s1 + $0x9b8] sm:$0xff] }
  0xec   :  { %3597 = vmatpush.bf16.msrb.mxu2 %v5627_v35 }
  0xed   :  { %3610 = vmatpush.bf16.msrb.mxu3 %v5635_v36 }
  0xee   :  { %3572 = vmatpush.bf16.msrb.mxu0 %v5610_v39  ;;  %v3346_v1 = vpop.f32.mrf.mxu2  ;;  %v5640_v39 = vld [vmem:[%s7001_s1 + $0x810] sm:$0xff] }
  0xef   :  { %3585 = vmatpush.bf16.msrb.mxu1 %v5618_v40  ;;  %v3359_v4 = vpop.f32.mrf.mxu3  ;;  %v5648_v40 = vld [vmem:[%s7001_s1 + $0x850] sm:$0xff] }
  0xf0   :  { %3598 = vmatpush.bf16.msrb.mxu2 %v5626_v42  ;;  %v5656_v42 = vld [vmem:[%s7001_s1 + $0x890] sm:$0xff]  ;;  %v5691_v4 = vld [vmem:[%s7001_s1 + $0x9a8] sm:$0xff] }
  0xf1   :  { %3611 = vmatpush.bf16.msrb.mxu3 %v5634_v43  ;;  %v5664_v43 = vld [vmem:[%s7001_s1 + $0x8d0] sm:$0xff] }
  0xf2   :  { %3573 = vmatpush.bf16.msrb.mxu0 %v5609_v45  ;;  %v5647_v45 = vld [vmem:[%s7001_s1 + $0x848] sm:$0xff]  ;;  %v5700_v1 = vld [vmem:[%s7001_s1 + $0x9f0] sm:$0xff] }
  0xf3   :  { %3586 = vmatpush.bf16.msrb.mxu1 %v5617_v46  ;;  %v5655_v46 = vld [vmem:[%s7001_s1 + $0x888] sm:$0xff] }
  0xf4   :  { %3599 = vmatpush.bf16.msrb.mxu2 %v5625_v47  ;;  %v5663_v47 = vld [vmem:[%s7001_s1 + $0x8c8] sm:$0xff] }
  0xf5   :  { %3612 = vmatpush.bf16.msrb.mxu3 %v5633_v48 }
  0xf6   :  { %3574 = vmatpush.bf16.msrb.mxu0 %v5608_v54  ;;  %v5677_v54 = vld [vmem:[%s7001_s1 + $0x938] sm:$0xff] }
  0xf7   :  { %3587 = vmatpush.bf16.msrb.mxu1 %v5616_v55  ;;  %v5685_v55 = vld [vmem:[%s7001_s1 + $0x978] sm:$0xff] }
  0xf8   :  { %3600 = vmatpush.bf16.msrb.mxu2 %v5624_v57  ;;  %v5701_v57 = vld [vmem:[%s7001_s1 + $0x9f8] sm:$0xff] }
  0xf9   :  { %3613 = vmatpush.bf16.msrb.mxu3 %v5632_v58  ;;  %v835_v58 = vld [vmem:[#allocation1] sm:$0xff] }
  0xfa   :  { %3575 = vmatpush.bf16.msrb.mxu0 %v5607_v59  ;;  %v837_v59 = vld [vmem:[#allocation1 + $0x12] sm:$0xff] }
  0xfb   :  { %3588 = vmatpush.bf16.msrb.mxu1 %v5615_v60  ;;  %v836_v60 = vld [vmem:[#allocation1 + $0x9] sm:$0xff] }
  0xfc   :  { %3601 = vmatpush.bf16.msrb.mxu2 %v5623_v61  ;;  %v838_v61 = vld [vmem:[#allocation1 + $0x1b] sm:$0xff] }
  0xfd   :  { %3614 = vmatpush.bf16.msrb.mxu3 %v5631_v62  ;;  %v5676_v62 = vld [vmem:[%s7001_s1 + $0x930] sm:$0xff] }
  0xfe   :  { %3576 = vmatpush.bf16.msrb.mxu0 %v5606_v6  ;;  %v3370_v22 = vpop.f32.mrf.mxu0 }
  0xff   :  { %3589 = vmatpush.bf16.msrb.mxu1 %v5614_v7  ;;  %v3371_v23 = vadd.f32 %v3370_v22, %v6565_v53  ;;  %v3383_v26 = vpop.f32.mrf.mxu1  ;;  %v5662_v53 = vld [vmem:[%s7001_s1 + $0x8c0] sm:$0xff] }
 0x100   :  { %3602 = vmatpush.bf16.msrb.mxu2 %v5622_v8  ;;  %v5674_v8 = vld [vmem:[%s7001_s1 + $0x920] sm:$0xff] }
 0x101   :  { %3615 = vmatpush.bf16.msrb.mxu3 %v5630_v9  ;;  %3577 = vmatmul.bf16.vlgmr.msrb.gmra.mxu0 %v829_v63  ;;  %v3384_v29 = vadd.f32 %v3383_v26, %v3371_v23  ;;  %v5684_v63 = vld [vmem:[%s7001_s1 + $0x970] sm:$0xff]  ;;  %v5682_v9 = vld [vmem:[%s7001_s1 + $0x960] sm:$0xff] }
 0x102   :  { %3621 = vmatpush.bf16.msra.mxu0 %v5645_v10  ;;  %3590 = vmatmul.bf16.vlgmr.msrb.gmra.mxu1 %v830_v2  ;;  %v5675_v2 = vld [vmem:[%s7001_s1 + $0x928] sm:$0xff]  ;;  %v5672_v23 = vld [vmem:[%s7001_s1 + $0x910] sm:$0xff] }
 0x103   :  { %3634 = vmatpush.bf16.msra.mxu1 %v5653_v11  ;;  %3603 = vmatmul.bf16.vlgmr.msrb.gmra.mxu2 %v831_v0  ;;  %v5692_v0 = vld [vmem:[%s7001_s1 + $0x9b0] sm:$0xff]  ;;  %v5690_v11 = vld [vmem:[%s7001_s1 + $0x9a0] sm:$0xff] }
 0x104   :  { %3647 = vmatpush.bf16.msra.mxu2 %v5661_v12  ;;  %3616 = vmatmul.bf16.vlgmr.msrb.gmra.mxu3 %v832_v3  ;;  %v5683_v3 = vld [vmem:[%s7001_s1 + $0x968] sm:$0xff]  ;;  %v5698_v12 = vld [vmem:[%s7001_s1 + $0x9e0] sm:$0xff]  ;;  %v5688_v26 = vld [vmem:[%s7001_s1 + $0x990] sm:$0xff] }
 0x105   :  { %3660 = vmatpush.bf16.msra.mxu3 %v5669_v13 }
 0x106   :  { %3622 = vmatpush.bf16.msra.mxu0 %v5644_v14  ;;  %v3396_v34 = vpop.f32.mrf.mxu2  ;;  %v3372_v37 = vpop.f32.mrf.mxu0  ;;  %v5673_v14 = vld [vmem:[%s7001_s1 + $0x918] sm:$0xff] }
 0x107   :  { %3635 = vmatpush.bf16.msra.mxu1 %v5652_v15  ;;  %v3397_v35 = vadd.f32 %v3396_v34, %v3384_v29  ;;  %v3409_v36 = vpop.f32.mrf.mxu3  ;;  %v3385_v41 = vpop.f32.mrf.mxu1  ;;  %v5681_v15 = vld [vmem:[%s7001_s1 + $0x958] sm:$0xff]  ;;  %v5679_v29 = vld [vmem:[%s7001_s1 + $0x948] sm:$0xff] }
 0x108   :  { %3648 = vmatpush.bf16.msra.mxu2 %v5660_v16  ;;  %v5689_v16 = vld [vmem:[%s7001_s1 + $0x998] sm:$0xff]  ;;  %v5686_v41 = vld [vmem:[%s7001_s1 + $0x980] sm:$0xff] }
 0x109   :  { %3661 = vmatpush.bf16.msra.mxu3 %v5668_v17  ;;  %v3410_v38 = vadd.f32 %v3409_v36, %v3397_v35  ;;  %v5697_v17 = vld [vmem:[%s7001_s1 + $0x9d8] sm:$0xff]  ;;  %v840_v35 = vld [vmem:[#allocation1 + $0x2d] sm:$0xff] }
 0x10a   :  { %3623 = vmatpush.bf16.msra.mxu0 %v5643_v18  ;;  %v842_v36 = vld [vmem:[#allocation1 + $0x3f] sm:$0xff] }
 0x10b   :  { %3636 = vmatpush.bf16.msra.mxu1 %v5651_v19 }
 0x10c   :  { %3649 = vmatpush.bf16.msra.mxu2 %v5659_v20 }
 0x10d   :  { %3662 = vmatpush.bf16.msra.mxu3 %v5667_v21 }
 0x10e   :  { %3624 = vmatpush.bf16.msra.mxu0 %v5642_v24  ;;  %v3398_v48 = vpop.f32.mrf.mxu2  ;;  %v5680_v24 = vld [vmem:[%s7001_s1 + $0x950] sm:$0xff] }
 0x10f   :  { %3637 = vmatpush.bf16.msra.mxu1 %v5650_v25  ;;  %v3411_v49 = vpop.f32.mrf.mxu3  ;;  %v5716_v48 = vld [vmem:[%s7001_s1 + $0xa70] sm:$0xff] }
 0x110   :  { %3650 = vmatpush.bf16.msra.mxu2 %v5658_v27  ;;  %v5696_v27 = vld [vmem:[%s7001_s1 + $0x9d0] sm:$0xff] }
 0x111   :  { %3663 = vmatpush.bf16.msra.mxu3 %v5666_v28  ;;  %v5671_v28 = vld [vmem:[%s7001_s1 + $0x908] sm:$0xff]  ;;  %v5724_v49 = vld [vmem:[%s7001_s1 + $0xab0] sm:$0xff] }
 0x112   :  { %3625 = vmatpush.bf16.msra.mxu0 %v5641_v30  ;;  %v5687_v30 = vld [vmem:[%s7001_s1 + $0x988] sm:$0xff] }
 0x113   :  { %3638 = vmatpush.bf16.msra.mxu1 %v5649_v31  ;;  %v5695_v31 = vld [vmem:[%s7001_s1 + $0x9c8] sm:$0xff] }
 0x114   :  { %3651 = vmatpush.bf16.msra.mxu2 %v5657_v32  ;;  %v839_v32 = vld [vmem:[#allocation1 + $0x24] sm:$0xff] }
 0x115   :  { %3664 = vmatpush.bf16.msra.mxu3 %v5665_v33  ;;  %v841_v33 = vld [vmem:[#allocation1 + $0x36] sm:$0xff] }
 0x116   :  { %3626 = vmatpush.bf16.msra.mxu0 %v5640_v39  ;;  %v5670_v39 = vld [vmem:[%s7001_s1 + $0x900] sm:$0xff] }
 0x117   :  { %3639 = vmatpush.bf16.msra.mxu1 %v5648_v40  ;;  %v5678_v40 = vld [vmem:[%s7001_s1 + $0x940] sm:$0xff] }
 0x118   :  { %3652 = vmatpush.bf16.msra.mxu2 %v5656_v42  ;;  %v5694_v42 = vld [vmem:[%s7001_s1 + $0x9c0] sm:$0xff] }
 0x119   :  { %3665 = vmatpush.bf16.msra.mxu3 %v5664_v43  ;;  %v5709_v43 = vld [vmem:[%s7001_s1 + $0xa38] sm:$0xff] }
 0x11a   :  { %3627 = vmatpush.bf16.msra.mxu0 %v5639_v44  ;;  %v5717_v44 = vld [vmem:[%s7001_s1 + $0xa78] sm:$0xff] }
 0x11b   :  { %3640 = vmatpush.bf16.msra.mxu1 %v5647_v45  ;;  %v5725_v45 = vld [vmem:[%s7001_s1 + $0xab8] sm:$0xff] }
 0x11c   :  { %3653 = vmatpush.bf16.msra.mxu2 %v5655_v46  ;;  %v5733_v46 = vld [vmem:[%s7001_s1 + $0xaf8] sm:$0xff] }
 0x11d   :  { %3666 = vmatpush.bf16.msra.mxu3 %v5663_v47  ;;  %v5708_v47 = vld [vmem:[%s7001_s1 + $0xa30] sm:$0xff] }
 0x11e   :  { %3628 = vmatpush.bf16.msra.mxu0 %v5638_v50  ;;  %v3422_v6 = vpop.f32.mrf.mxu0  ;;  %v5732_v50 = vld [vmem:[%s7001_s1 + $0xaf0] sm:$0xff] }
 0x11f   :  { %3641 = vmatpush.bf16.msra.mxu1 %v5646_v51  ;;  %v3423_v7 = vadd.f32 %v3422_v6, %v3410_v38  ;;  %v3435_v10 = vpop.f32.mrf.mxu1  ;;  %v20_v38 = vld [vmem:[%s7000_s0 + $0x28] sm:$0xff] }
 0x120   :  { %3654 = vmatpush.bf16.msra.mxu2 %v5654_v52  ;;  %844 = vst [vmem:[#allocation1] ss:$9 sm:$0xff] %v20_v38  ;;  %v5707_v51 = vld [vmem:[%s7001_s1 + $0xa28] sm:$0xff] }
 0x121   :  { %3667 = vmatpush.bf16.msra.mxu3 %v5662_v53  ;;  %3629 = vmatmul.bf16.vlgmr.msra.gmra.mxu0 %v835_v58  ;;  %v3436_v13 = vadd.f32 %v3435_v10, %v3423_v7  ;;  %v5715_v52 = vld [vmem:[%s7001_s1 + $0xa68] sm:$0xff]  ;;  %v5714_v58 = vld [vmem:[%s7001_s1 + $0xa60] sm:$0xff] }
 0x122   :  { %3673 = vmatpush.bf16.msrb.mxu0 %v5677_v54  ;;  %3642 = vmatmul.bf16.vlgmr.msra.gmra.mxu1 %v836_v60  ;;  %v5723_v53 = vld [vmem:[%s7001_s1 + $0xaa8] sm:$0xff]  ;;  %v5722_v60 = vld [vmem:[%s7001_s1 + $0xaa0] sm:$0xff] }
 0x123   :  { %3686 = vmatpush.bf16.msrb.mxu1 %v5685_v55  ;;  %3655 = vmatmul.bf16.vlgmr.msra.gmra.mxu2 %v837_v59  ;;  %v5731_v54 = vld [vmem:[%s7001_s1 + $0xae8] sm:$0xff] }
 0x124   :  { %3699 = vmatpush.bf16.msrb.mxu2 %v5693_v56  ;;  %3668 = vmatmul.bf16.vlgmr.msra.gmra.mxu3 %v838_v61  ;;  %v5730_v61 = vld [vmem:[%s7001_s1 + $0xae0] sm:$0xff]  ;;  %v5763_v38 = vld [vmem:[%s7001_s1 + $0xbe8] sm:$0xff] }
 0x125   :  { %3712 = vmatpush.bf16.msrb.mxu3 %v5701_v57  ;;  %v5706_v57 = vld [vmem:[%s7001_s1 + $0xa20] sm:$0xff] }
 0x126   :  { %3674 = vmatpush.bf16.msrb.mxu0 %v5676_v62  ;;  %v3448_v18 = vpop.f32.mrf.mxu2  ;;  %v3424_v21 = vpop.f32.mrf.mxu0 }
 0x127   :  { %3687 = vmatpush.bf16.msrb.mxu1 %v5684_v63  ;;  %v3449_v19 = vadd.f32 %v3448_v18, %v3436_v13  ;;  %v3461_v20 = vpop.f32.mrf.mxu3  ;;  %v3437_v25 = vpop.f32.mrf.mxu1  ;;  %v5705_v63 = vld [vmem:[%s7001_s1 + $0xa18] sm:$0xff]  ;;  %v5703_v13 = vld [vmem:[%s7001_s1 + $0xa08] sm:$0xff]  ;;  %v5718_v21 = vld [vmem:[%s7001_s1 + $0xa80] sm:$0xff] }
 0x128   :  { %3700 = vmatpush.bf16.msrb.mxu2 %v5692_v0  ;;  %v5713_v0 = vld [vmem:[%s7001_s1 + $0xa58] sm:$0xff] }
 0x129   :  { %3713 = vmatpush.bf16.msrb.mxu3 %v5700_v1  ;;  %v6763_v22 = vadd.f32 %v3461_v20, %v3449_v19  ;;  %v5721_v1 = vld [vmem:[%s7001_s1 + $0xa98] sm:$0xff]  ;;  %v5702_v19 = vld [vmem:[%s7001_s1 + $0xa00] sm:$0xff] }
 0x12a   :  { %3675 = vmatpush.bf16.msrb.mxu0 %v5675_v2  ;;  %v5729_v2 = vld [vmem:[%s7001_s1 + $0xad8] sm:$0xff]  ;;  %v5710_v20 = vld [vmem:[%s7001_s1 + $0xa40] sm:$0xff] }
 0x12b   :  { %3688 = vmatpush.bf16.msrb.mxu1 %v5683_v3  ;;  %v5757_v25 = vld [vmem:[%s7001_s1 + $0xbb8] sm:$0xff] }
 0x12c   :  { %3701 = vmatpush.bf16.msrb.mxu2 %v5691_v4 }
 0x12d   :  { %3714 = vmatpush.bf16.msrb.mxu3 %v5699_v5 }
 0x12e   :  { %3676 = vmatpush.bf16.msrb.mxu0 %v5674_v8  ;;  %v3450_v34 = vpop.f32.mrf.mxu2  ;;  %v5704_v8 = vld [vmem:[%s7001_s1 + $0xa10] sm:$0xff] }
 0x12f   :  { %3689 = vmatpush.bf16.msrb.mxu1 %v5682_v9  ;;  %v3463_v37 = vpop.f32.mrf.mxu3  ;;  %v5712_v9 = vld [vmem:[%s7001_s1 + $0xa50] sm:$0xff] }
 0x130   :  { %3702 = vmatpush.bf16.msrb.mxu2 %v5690_v11  ;;  %v5720_v11 = vld [vmem:[%s7001_s1 + $0xa90] sm:$0xff]  ;;  %v5755_v37 = vld [vmem:[%s7001_s1 + $0xba8] sm:$0xff] }
 0x131   :  { %3715 = vmatpush.bf16.msrb.mxu3 %v5698_v12  ;;  %v5728_v12 = vld [vmem:[%s7001_s1 + $0xad0] sm:$0xff] }
 0x132   :  { %3677 = vmatpush.bf16.msrb.mxu0 %v5673_v14  ;;  %v5711_v14 = vld [vmem:[%s7001_s1 + $0xa48] sm:$0xff]  ;;  %v5764_v34 = vld [vmem:[%s7001_s1 + $0xbf0] sm:$0xff] }
 0x133   :  { %3690 = vmatpush.bf16.msrb.mxu1 %v5681_v15  ;;  %v5719_v15 = vld [vmem:[%s7001_s1 + $0xa88] sm:$0xff] }
 0x134   :  { %3703 = vmatpush.bf16.msrb.mxu2 %v5689_v16  ;;  %v5727_v16 = vld [vmem:[%s7001_s1 + $0xac8] sm:$0xff] }
 0x135   :  { %3716 = vmatpush.bf16.msrb.mxu3 %v5697_v17 }
 0x136   :  { %3678 = vmatpush.bf16.msrb.mxu0 %v5672_v23  ;;  %v5741_v23 = vld [vmem:[%s7001_s1 + $0xb38] sm:$0xff] }
 0x137   :  { %3691 = vmatpush.bf16.msrb.mxu1 %v5680_v24  ;;  %v5749_v24 = vld [vmem:[%s7001_s1 + $0xb78] sm:$0xff] }
 0x138   :  { %3704 = vmatpush.bf16.msrb.mxu2 %v5688_v26  ;;  %v5765_v26 = vld [vmem:[%s7001_s1 + $0xbf8] sm:$0xff] }
 0x139   :  { %3717 = vmatpush.bf16.msrb.mxu3 %v5696_v27  ;;  %v845_v27 = vld [vmem:[#allocation1] sm:$0xff] }
 0x13a   :  { %3679 = vmatpush.bf16.msrb.mxu0 %v5671_v28  ;;  %v847_v28 = vld [vmem:[#allocation1 + $0x12] sm:$0xff] }
 0x13b   :  { %3692 = vmatpush.bf16.msrb.mxu1 %v5679_v29  ;;  %v846_v29 = vld [vmem:[#allocation1 + $0x9] sm:$0xff] }
 0x13c   :  { %3705 = vmatpush.bf16.msrb.mxu2 %v5687_v30  ;;  %v848_v30 = vld [vmem:[#allocation1 + $0x1b] sm:$0xff] }
 0x13d   :  { %3718 = vmatpush.bf16.msrb.mxu3 %v5695_v31  ;;  %v5740_v31 = vld [vmem:[%s7001_s1 + $0xb30] sm:$0xff] }
 0x13e   :  { %3680 = vmatpush.bf16.msrb.mxu0 %v5670_v39  ;;  %v3474_v55 = vpop.f32.mrf.mxu0 }
 0x13f   :  { %3693 = vmatpush.bf16.msrb.mxu1 %v5678_v40  ;;  %v3475_v56 = vadd.f32 %v3474_v55, %v6763_v22  ;;  %v3487_v59 = vpop.f32.mrf.mxu1  ;;  %v5726_v22 = vld [vmem:[%s7001_s1 + $0xac0] sm:$0xff] }
 0x140   :  { %3706 = vmatpush.bf16.msrb.mxu2 %v5686_v41  ;;  %v5738_v41 = vld [vmem:[%s7001_s1 + $0xb20] sm:$0xff] }
 0x141   :  { %3719 = vmatpush.bf16.msrb.mxu3 %v5694_v42  ;;  %3681 = vmatmul.bf16.vlgmr.msrb.gmra.mxu0 %v839_v32  ;;  %v3488_v62 = vadd.f32 %v3487_v59, %v3475_v56  ;;  %v5748_v32 = vld [vmem:[%s7001_s1 + $0xb70] sm:$0xff]  ;;  %v5746_v42 = vld [vmem:[%s7001_s1 + $0xb60] sm:$0xff] }
 0x142   :  { %3725 = vmatpush.bf16.msra.mxu0 %v5709_v43  ;;  %3694 = vmatmul.bf16.vlgmr.msrb.gmra.mxu1 %v840_v35  ;;  %v5739_v35 = vld [vmem:[%s7001_s1 + $0xb28] sm:$0xff]  ;;  %v5736_v56 = vld [vmem:[%s7001_s1 + $0xb10] sm:$0xff] }
 0x143   :  { %3738 = vmatpush.bf16.msra.mxu1 %v5717_v44  ;;  %3707 = vmatmul.bf16.vlgmr.msrb.gmra.mxu2 %v841_v33  ;;  %v5756_v33 = vld [vmem:[%s7001_s1 + $0xbb0] sm:$0xff]  ;;  %v5754_v44 = vld [vmem:[%s7001_s1 + $0xba0] sm:$0xff] }
 0x144   :  { %3751 = vmatpush.bf16.msra.mxu2 %v5725_v45  ;;  %3720 = vmatmul.bf16.vlgmr.msrb.gmra.mxu3 %v842_v36  ;;  %v5747_v36 = vld [vmem:[%s7001_s1 + $0xb68] sm:$0xff]  ;;  %v5762_v45 = vld [vmem:[%s7001_s1 + $0xbe0] sm:$0xff]  ;;  %v5752_v59 = vld [vmem:[%s7001_s1 + $0xb90] sm:$0xff] }
 0x145   :  { %3764 = vmatpush.bf16.msra.mxu3 %v5733_v46 }
 0x146   :  { %3726 = vmatpush.bf16.msra.mxu0 %v5708_v47  ;;  %v3500_v3 = vpop.f32.mrf.mxu2  ;;  %v3476_v6 = vpop.f32.mrf.mxu0  ;;  %v5737_v47 = vld [vmem:[%s7001_s1 + $0xb18] sm:$0xff] }
 0x147   :  { %3739 = vmatpush.bf16.msra.mxu1 %v5716_v48  ;;  %v3501_v4 = vadd.f32 %v3500_v3, %v3488_v62  ;;  %v3513_v5 = vpop.f32.mrf.mxu3  ;;  %v3489_v10 = vpop.f32.mrf.mxu1  ;;  %v5745_v48 = vld [vmem:[%s7001_s1 + $0xb58] sm:$0xff]  ;;  %v5743_v62 = vld [vmem:[%s7001_s1 + $0xb48] sm:$0xff]  ;;  %v5734_v3 = vld [vmem:[%s7001_s1 + $0xb00] sm:$0xff] }
 0x148   :  { %3752 = vmatpush.bf16.msra.mxu2 %v5724_v49  ;;  %v5753_v49 = vld [vmem:[%s7001_s1 + $0xb98] sm:$0xff]  ;;  %v5758_v6 = vld [vmem:[%s7001_s1 + $0xbc0] sm:$0xff] }
 0x149   :  { %3765 = vmatpush.bf16.msra.mxu3 %v5732_v50  ;;  %v3514_v7 = vadd.f32 %v3513_v5, %v3501_v4  ;;  %v5761_v50 = vld [vmem:[%s7001_s1 + $0xbd8] sm:$0xff]  ;;  %v5742_v4 = vld [vmem:[%s7001_s1 + $0xb40] sm:$0xff] }
 0x14a   :  { %3727 = vmatpush.bf16.msra.mxu0 %v5707_v51  ;;  %v5750_v5 = vld [vmem:[%s7001_s1 + $0xb80] sm:$0xff] }
 0x14b   :  { %3740 = vmatpush.bf16.msra.mxu1 %v5715_v52  ;;  %v852_v10 = vld [vmem:[#allocation1 + $0x3f] sm:$0xff] }
 0x14c   :  { %3753 = vmatpush.bf16.msra.mxu2 %v5723_v53 }
 0x14d   :  { %3766 = vmatpush.bf16.msra.mxu3 %v5731_v54 }
 0x14e   :  { %3728 = vmatpush.bf16.msra.mxu0 %v5706_v57  ;;  %v3502_v17 = vpop.f32.mrf.mxu2  ;;  %v5744_v57 = vld [vmem:[%s7001_s1 + $0xb50] sm:$0xff] }
 0x14f   :  { %3741 = vmatpush.bf16.msra.mxu1 %v5714_v58  ;;  %v3515_v18 = vpop.f32.mrf.mxu3 }
 0x150   :  { %3754 = vmatpush.bf16.msra.mxu2 %v5722_v60  ;;  %v5760_v60 = vld [vmem:[%s7001_s1 + $0xbd0] sm:$0xff] }
 0x151   :  { %3767 = vmatpush.bf16.msra.mxu3 %v5730_v61  ;;  %v5735_v61 = vld [vmem:[%s7001_s1 + $0xb08] sm:$0xff] }
 0x152   :  { %3729 = vmatpush.bf16.msra.mxu0 %v5705_v63  ;;  %v5751_v63 = vld [vmem:[%s7001_s1 + $0xb88] sm:$0xff] }
 0x153   :  { %3742 = vmatpush.bf16.msra.mxu1 %v5713_v0  ;;  %v5759_v0 = vld [vmem:[%s7001_s1 + $0xbc8] sm:$0xff]  ;;  %s5794_s1 = smov [#allocation2]  }
 0x154   :  { %3755 = vmatpush.bf16.msra.mxu2 %v5721_v1  ;;  %s3835_s17 = sshll.u32 %s5794_s1, 4  ;;  %s3836_s17 = int_to_ptr.vmem [resolvable:$true] %s3835_s17 }
 0x155   :  { %3768 = vmatpush.bf16.msra.mxu3 %v5729_v2 }
 0x156   :  { %3730 = vmatpush.bf16.msra.mxu0 %v5704_v8  ;;  %v850_v8 = vld [vmem:[#allocation1 + $0x2d] sm:$0xff] }
 0x157   :  { %3743 = vmatpush.bf16.msra.mxu1 %v5712_v9  ;;  %v851_v9 = vld [vmem:[#allocation1 + $0x36] sm:$0xff] }
 0x158   :  { %3756 = vmatpush.bf16.msra.mxu2 %v5720_v11 }
 0x159   :  { %3769 = vmatpush.bf16.msra.mxu3 %v5728_v12 }
 0x15a   :  { %3731 = vmatpush.bf16.msra.mxu0 %v5703_v13 }
 0x15b   :  { %3744 = vmatpush.bf16.msra.mxu1 %v5711_v14 }
 0x15c   :  { %3757 = vmatpush.bf16.msra.mxu2 %v5719_v15 }
 0x15d   :  { %3770 = vmatpush.bf16.msra.mxu3 %v5727_v16 }
 0x15e   :  { %3732 = vmatpush.bf16.msra.mxu0 %v5702_v19  ;;  %v3526_v39 = vpop.f32.mrf.mxu0 }
 0x15f   :  { %3745 = vmatpush.bf16.msra.mxu1 %v5710_v20  ;;  %v3527_v40 = vadd.f32 %v3526_v39, %v3514_v7  ;;  %v3539_v43 = vpop.f32.mrf.mxu1  ;;  %v849_v7 = vld [vmem:[#allocation1 + $0x24] sm:$0xff] }
 0x160   :  { %3758 = vmatpush.bf16.msra.mxu2 %v5718_v21 }
 0x161   :  { %3771 = vmatpush.bf16.msra.mxu3 %v5726_v22  ;;  %3733 = vmatmul.bf16.vlgmr.msra.gmra.mxu0 %v845_v27  ;;  %v3540_v46 = vadd.f32 %v3539_v43, %v3527_v40 }
 0x162   :  { %3777 = vmatpush.bf16.msrb.mxu0 %v5741_v23  ;;  %3746 = vmatmul.bf16.vlgmr.msra.gmra.mxu1 %v846_v29 }
 0x163   :  { %3790 = vmatpush.bf16.msrb.mxu1 %v5749_v24  ;;  %3759 = vmatmul.bf16.vlgmr.msra.gmra.mxu2 %v847_v28 }
 0x164   :  { %3803 = vmatpush.bf16.msrb.mxu2 %v5757_v25  ;;  %3772 = vmatmul.bf16.vlgmr.msra.gmra.mxu3 %v848_v30 }
 0x165   :  { %3816 = vmatpush.bf16.msrb.mxu3 %v5765_v26 }
 0x166   :  { %3778 = vmatpush.bf16.msrb.mxu0 %v5740_v31  ;;  %v3552_v51 = vpop.f32.mrf.mxu2  ;;  %v3528_v54 = vpop.f32.mrf.mxu0 }
 0x167   :  { %3791 = vmatpush.bf16.msrb.mxu1 %v5748_v32  ;;  %v3553_v52 = vadd.f32 %v3552_v51, %v3540_v46  ;;  %v3565_v53 = vpop.f32.mrf.mxu3  ;;  %v3541_v58 = vpop.f32.mrf.mxu1 }
 0x168   :  { %3804 = vmatpush.bf16.msrb.mxu2 %v5756_v33 }
 0x169   :  { %3817 = vmatpush.bf16.msrb.mxu3 %v5764_v34  ;;  %v3566_v55 = vadd.f32 %v3565_v53, %v3553_v52 }
 0x16a   :  { %3779 = vmatpush.bf16.msrb.mxu0 %v5739_v35 }
 0x16b   :  { %3792 = vmatpush.bf16.msrb.mxu1 %v5747_v36 }
 0x16c   :  { %3805 = vmatpush.bf16.msrb.mxu2 %v5755_v37 }
 0x16d   :  { %3818 = vmatpush.bf16.msrb.mxu3 %v5763_v38 }
 0x16e   :  { %3780 = vmatpush.bf16.msrb.mxu0 %v5738_v41  ;;  %v3554_v1 = vpop.f32.mrf.mxu2 }
 0x16f   :  { %3793 = vmatpush.bf16.msrb.mxu1 %v5746_v42  ;;  %v3567_v2 = vpop.f32.mrf.mxu3 }
 0x170   :  { %3806 = vmatpush.bf16.msrb.mxu2 %v5754_v44 }
 0x171   :  { %3819 = vmatpush.bf16.msrb.mxu3 %v5762_v45 }
 0x172   :  { %3781 = vmatpush.bf16.msrb.mxu0 %v5737_v47 }
 0x173   :  { %3794 = vmatpush.bf16.msrb.mxu1 %v5745_v48 }
 0x174   :  { %3807 = vmatpush.bf16.msrb.mxu2 %v5753_v49 }
 0x175   :  { %3820 = vmatpush.bf16.msrb.mxu3 %v5761_v50 }
 0x176   :  { %3782 = vmatpush.bf16.msrb.mxu0 %v5736_v56 }
 0x177   :  { %3795 = vmatpush.bf16.msrb.mxu1 %v5744_v57 }
 0x178   :  { %3808 = vmatpush.bf16.msrb.mxu2 %v5752_v59 }
 0x179   :  { %3821 = vmatpush.bf16.msrb.mxu3 %v5760_v60 }
 0x17a   :  { %3783 = vmatpush.bf16.msrb.mxu0 %v5735_v61 }
 0x17b   :  { %3796 = vmatpush.bf16.msrb.mxu1 %v5743_v62 }
 0x17c   :  { %3809 = vmatpush.bf16.msrb.mxu2 %v5751_v63 }
 0x17d   :  { %3822 = vmatpush.bf16.msrb.mxu3 %v5759_v0 }
 0x17e   :  { %3784 = vmatpush.bf16.msrb.mxu0 %v5734_v3  ;;  %v3578_v11 = vpop.f32.mrf.mxu0 }
 0x17f   :  { %3797 = vmatpush.bf16.msrb.mxu1 %v5742_v4  ;;  %v3579_v12 = vadd.f32 %v3578_v11, %v3566_v55  ;;  %v3591_v13 = vpop.f32.mrf.mxu1 }
 0x180   :  { %3810 = vmatpush.bf16.msrb.mxu2 %v5750_v5 }
 0x181   :  { %3823 = vmatpush.bf16.msrb.mxu3 %v5758_v6  ;;  %3785 = vmatmul.bf16.vlgmr.msrb.gmra.mxu0 %v849_v7  ;;  %v3592_v14 = vadd.f32 %v3591_v13, %v3579_v12 }
 0x182   :  { %3798 = vmatmul.bf16.vlgmr.msrb.gmra.mxu1 %v850_v8 }
 0x183   :  { %3811 = vmatmul.bf16.vlgmr.msrb.gmra.mxu2 %v851_v9 }
 0x184   :  { %3824 = vmatmul.bf16.vlgmr.msrb.gmra.mxu3 %v852_v10 }
 0x186   :  { %v3604_v15 = vpop.f32.mrf.mxu2  ;;  %v3580_v18 = vpop.f32.mrf.mxu0 }
 0x187   :  { %v3605_v16 = vadd.f32 %v3604_v15, %v3592_v14  ;;  %v3617_v17 = vpop.f32.mrf.mxu3  ;;  %v3593_v20 = vpop.f32.mrf.mxu1 }
 0x189   :  { %v3618_v19 = vadd.f32 %v3617_v17, %v3605_v16 }
 0x18e   :  { %v3606_v21 = vpop.f32.mrf.mxu2 }
 0x18f   :  { %v3619_v22 = vpop.f32.mrf.mxu3 }
 0x19e   :  { %v3630_v23 = vpop.f32.mrf.mxu0 }
 0x19f   :  { %v3631_v24 = vadd.f32 %v3630_v23, %v3618_v19  ;;  %v3643_v25 = vpop.f32.mrf.mxu1 }
 0x1a1   :  { %v3644_v26 = vadd.f32 %v3643_v25, %v3631_v24 }
 0x1a6   :  { %v3656_v27 = vpop.f32.mrf.mxu2  ;;  %v3632_v30 = vpop.f32.mrf.mxu0 }
 0x1a7   :  { %v3657_v28 = vadd.f32 %v3656_v27, %v3644_v26  ;;  %v3669_v29 = vpop.f32.mrf.mxu3  ;;  %v3645_v32 = vpop.f32.mrf.mxu1 }
 0x1a9   :  { %v3670_v31 = vadd.f32 %v3669_v29, %v3657_v28 }
 0x1ae   :  { %v3658_v33 = vpop.f32.mrf.mxu2 }
 0x1af   :  { %v3671_v34 = vpop.f32.mrf.mxu3 }
 0x1be   :  { %v3682_v35 = vpop.f32.mrf.mxu0 }
 0x1bf   :  { %v3695_v36 = vpop.f32.mrf.mxu1  ;;  %v3683_v46 = vadd.f32 %v3682_v35, %v3670_v31 }
 0x1c1   :  { %v3696_v50 = vadd.f32 %v3695_v36, %v3683_v46 }
 0x1c6   :  { %v3708_v37 = vpop.f32.mrf.mxu2  ;;  %v3684_v39 = vpop.f32.mrf.mxu0 }
 0x1c7   :  { %v3721_v38 = vpop.f32.mrf.mxu3  ;;  %v3697_v40 = vpop.f32.mrf.mxu1  ;;  %v3709_v51 = vadd.f32 %v3708_v37, %v3696_v50 }
 0x1c9   :  { %v3722_v54 = vadd.f32 %v3721_v38, %v3709_v51 }
 0x1ce   :  { %v3710_v41 = vpop.f32.mrf.mxu2 }
 0x1cf   :  { %v3723_v42 = vpop.f32.mrf.mxu3 }
 0x1de   :  { %v3734_v43 = vpop.f32.mrf.mxu0 }
 0x1df   :  { %v3747_v44 = vpop.f32.mrf.mxu1  ;;  %v3735_v55 = vadd.f32 %v3734_v43, %v3722_v54 }
 0x1e1   :  { %v3748_v56 = vadd.f32 %v3747_v44, %v3735_v55 }
 0x1e6   :  { %v3760_v45 = vpop.f32.mrf.mxu2  ;;  %v3736_v48 = vpop.f32.mrf.mxu0 }
 0x1e7   :  { %v3773_v47 = vpop.f32.mrf.mxu3  ;;  %v3749_v49 = vpop.f32.mrf.mxu1  ;;  %v3761_v57 = vadd.f32 %v3760_v45, %v3748_v56 }
 0x1e9   :  { %v3774_v58 = vadd.f32 %v3773_v47, %v3761_v57 }
 0x1ee   :  { %v3762_v52 = vpop.f32.mrf.mxu2 }
 0x1ef   :  { %v3775_v53 = vpop.f32.mrf.mxu3 }
 0x1fe   :  { %v3786_v59 = vpop.f32.mrf.mxu0 }
 0x1ff   :  { %v3799_v60 = vpop.f32.mrf.mxu1  ;;  %v3787_v61 = vadd.f32 %v3786_v59, %v3774_v58 }
 0x201   :  { %v3800_v62 = vadd.f32 %v3799_v60, %v3787_v61 }
 0x206   :  { %v3812_v63 = vpop.f32.mrf.mxu2  ;;  %v3788_v2 = vpop.f32.mrf.mxu0 }
 0x207   :  { %v3825_v0 = vpop.f32.mrf.mxu3  ;;  %v3813_v1 = vadd.f32 %v3812_v63, %v3800_v62  ;;  %v3801_v3 = vpop.f32.mrf.mxu1 }
 0x209   :  { %v3826_v4 = vadd.f32 %v3825_v0, %v3813_v1 }
 0x20b   :  { %3829 = vst [vmem:[#allocation2] sm:$0x3] %v3826_v4 }
 0x20c   :  { %3840 = dma.vmem_to_hbm [thread:$0]  %s3836_s17, 32, %s3838_s20, [#allocation3]  }
 0x20e   :  { %v3814_v5 = vpop.f32.mrf.mxu2 }
 0x20f   :  { %v3827_v6 = vpop.f32.mrf.mxu3 }
 0x210   :  { %5792 = dma.done.wait [#allocation3], 32  }
 0x211   :  { %5793 = vsyncadd [#allocation3], 4294967264 }
 0x212   :  { %3845 = vsyncpa [#allocation3], 1 }

</bundles_post_ra>
